<compile_context>
chip_gen: v7x
topology: tpu7x:2x2x1
jax: 0.10.0
libtpu: 0.0.40
codegen_flags: <defaults>
</compile_context>

<pallas_src>
import functools

import numpy as np
import jax
import jax.numpy as jnp
from jax.experimental import pallas as pl
from jax.experimental.pallas import tpu as pltpu


_EPS = 1e-6
_VMEM_LIMIT_BYTES = 32 * 1024 * 1024   # explicit; safe on v5e/v6e/v7x. Raise for bigger tiles.


# ----------------------------------------------------------------------------
# Spec helpers
# ----------------------------------------------------------------------------
def _row_spec(tile_n, cols):
    """Row-tiled (tile_n, cols) block; one tile per grid step."""
    return pl.BlockSpec((tile_n, cols), lambda i: (i, 0))


def _const_spec(shape):
    """Whole-array block with a constant block index (stays VMEM-resident)."""
    nd = len(shape)
    return pl.BlockSpec(shape, lambda i: (0,) * nd)


def _compiler_params(semantics):
    return pltpu.CompilerParams(dimension_semantics=(semantics,),
                                vmem_limit_bytes=_VMEM_LIMIT_BYTES)


def _pick_row_tile(rows_per_image, cap=512):
    """Largest row tile <= cap that divides H*W (tiles never straddle images)."""
    cap = min(cap, rows_per_image)
    for t in range(cap, 0, -1):
        if rows_per_image % t == 0 and (t % 8 == 0 or t == rows_per_image):
            return t
    return rows_per_image


# ----------------------------------------------------------------------------
# Kernel 1: ActNorm statistics of x (cross-tile reduction into VMEM scratch)
# ----------------------------------------------------------------------------
def _actnorm_stats_kernel(x_ref, mean_ref, factor_ref, sum_ref, sumsq_ref,
                          *, inv_n, scale, eps):
    i = pl.program_id(0)

    @pl.when(i == 0)
    def _():
        sum_ref[...] = jnp.zeros_like(sum_ref)
        sumsq_ref[...] = jnp.zeros_like(sumsq_ref)

    x = x_ref[...]
    sum_ref[...] += jnp.sum(x, axis=0, keepdims=True)
    sumsq_ref[...] += jnp.sum(x * x, axis=0, keepdims=True)

    @pl.when(i == pl.num_programs(0) - 1)
    def _():
        m = sum_ref[...] * inv_n
        var = jnp.maximum(sumsq_ref[...] * inv_n - m * m, 0.0)
        mean_ref[...] = m
        factor_ref[...] = scale / (jnp.sqrt(var) + eps)   # exp(logs) applied directly


# ----------------------------------------------------------------------------
# Kernel 2: apply ActNorm + invertible 1x1 conv, split z -> (z1, z2)
# ----------------------------------------------------------------------------
def _actnorm_permute_kernel(x_ref, mean_ref, factor_ref, wt_ref, z1_ref, z2_ref):
    ch = z1_ref.shape[-1]
    y = (x_ref[...] - mean_ref[...]) * factor_ref[...]
    z = jnp.dot(y, wt_ref[...], preferred_element_type=jnp.float32)
    z1_ref[...] = z[:, :ch]
    z2_ref[...] = z[:, ch:]


# ----------------------------------------------------------------------------
# Kernel 3: 3x3 conv as one packed-K matmul + stats of its output (for ActNorm)
# ----------------------------------------------------------------------------
def _conv_stats_kernel(taps_ref, w_ref, h_ref, mean_ref, factor_ref,
                       sum_ref, sumsq_ref, *, inv_n, eps):
    i = pl.program_id(0)

    @pl.when(i == 0)
    def _():
        sum_ref[...] = jnp.zeros_like(sum_ref)
        sumsq_ref[...] = jnp.zeros_like(sumsq_ref)

    h = jnp.dot(taps_ref[...], w_ref[...], preferred_element_type=jnp.float32)
    h_ref[...] = h
    sum_ref[...] += jnp.sum(h, axis=0, keepdims=True)
    sumsq_ref[...] += jnp.sum(h * h, axis=0, keepdims=True)

    @pl.when(i == pl.num_programs(0) - 1)
    def _():
        m = sum_ref[...] * inv_n
        var = jnp.maximum(sumsq_ref[...] * inv_n - m * m, 0.0)
        mean_ref[...] = m
        factor_ref[...] = 1.0 / (jnp.sqrt(var) + eps)


# ----------------------------------------------------------------------------
# Kernel 4: ActNorm+ReLU of previous stage, 1x1 conv, + stats of its output
# ----------------------------------------------------------------------------
def _actnorm_relu_matmul_stats_kernel(h_ref, m_ref, f_ref, w_ref,
                                      h2_ref, mean_ref, factor_ref,
                                      sum_ref, sumsq_ref, *, inv_n, eps):
    i = pl.program_id(0)

    @pl.when(i == 0)
    def _():
        sum_ref[...] = jnp.zeros_like(sum_ref)
        sumsq_ref[...] = jnp.zeros_like(sumsq_ref)

    a = jnp.maximum((h_ref[...] - m_ref[...]) * f_ref[...], 0.0)
    h2 = jnp.dot(a.astype(w_ref.dtype), w_ref[...],
                 preferred_element_type=jnp.float32)
    h2_ref[...] = h2
    sum_ref[...] += jnp.sum(h2, axis=0, keepdims=True)
    sumsq_ref[...] += jnp.sum(h2 * h2, axis=0, keepdims=True)

    @pl.when(i == pl.num_programs(0) - 1)
    def _():
        m2 = sum_ref[...] * inv_n
        var = jnp.maximum(sumsq_ref[...] * inv_n - m2 * m2, 0.0)
        mean_ref[...] = m2
        factor_ref[...] = 1.0 / (jnp.sqrt(var) + eps)


# ----------------------------------------------------------------------------
# Kernel 5: ActNorm + ReLU apply (last trunk activation, stored bf16)
# ----------------------------------------------------------------------------
def _actnorm_relu_kernel(h_ref, m_ref, f_ref, a_ref):
    a = jnp.maximum((h_ref[...] - m_ref[...]) * f_ref[...], 0.0)
    a_ref[...] = a.astype(a_ref.dtype)


# ----------------------------------------------------------------------------
# Kernel 6: Conv2dZeros (shift & scale fused in one matmul) + affine coupling
# ----------------------------------------------------------------------------
def _coupling_out_kernel(taps_ref, z2_ref, w3_ref, b3_ref, gain3_ref,
                         z2out_ref, rowsum_ref):
    ch = z2out_ref.shape[-1]
    h = jnp.dot(taps_ref[...], w3_ref[...], preferred_element_type=jnp.float32)
    out = (h + b3_ref[...]) * gain3_ref[...]        # Conv2dZeros: (conv + b) * exp(logs*3)
    shift = out[:, :ch]                              # shift channels packed first
    v = out[:, ch:] + 2.0                            # sigmoid(scale_raw + 2)
    e = jnp.exp(-v)
    scale = pl.reciprocal(1.0 + e, approx=True)      # sigmoid(v)
    log_scale = -jnp.log(1.0 + e)                    # log(sigmoid(v)) without a 2nd exp/log pair
    z2out_ref[...] = (z2_ref[...] + shift) * scale
    rowsum_ref[...] = jnp.sum(log_scale, axis=-1, keepdims=True)


# ----------------------------------------------------------------------------
# Glue: parameter setup + packed im2col + pallas_call wiring
# ----------------------------------------------------------------------------
def init_params(key, in_features, hidden_features, weight_std=0.05):
    C, Hd = in_features, hidden_features
    Ch = C // 2
    k1, k2 = jax.random.split(key)
    # InvertibleConv1x1 LU-parameterisation of a random orthogonal init.
    rng = np.random.RandomState(0)
    w_init = np.linalg.qr(rng.randn(C, C))[0].astype(np.float32)
    p, l, u = jax.scipy.linalg.lu(jnp.asarray(w_init))
    s = jnp.diag(u)
    params = dict(
        p=p.astype(jnp.float32),
        l=l.astype(jnp.float32),
        u=jnp.triu(u, k=1).astype(jnp.float32),
        sign_s=jnp.sign(s).astype(jnp.float32),
        log_s=jnp.log(jnp.abs(s)).astype(jnp.float32),
        l_mask=jnp.tril(jnp.ones((C, C), jnp.float32), -1),
        eye=jnp.eye(C, dtype=jnp.float32),
        # coupling net
        w1=jax.random.normal(k1, (Hd, Ch, 3, 3), jnp.float32) * weight_std,  # ActNormConv2d 3x3
        w2=jax.random.normal(k2, (Hd, Hd, 1, 1), jnp.float32) * weight_std,  # ActNormConv2d 1x1
        w3=jnp.zeros((C, Hd, 3, 3), jnp.float32),                            # Conv2dZeros
        b3=jnp.zeros((C,), jnp.float32),
        logs3=jnp.zeros((C, 1, 1), jnp.float32),
    )
    return params


def _im2col_packed(x_nhwc):
    """3x3 'same' taps packed along channels: (B*H*W, 9*C); column block t = dy*3 + dx."""
    B, H, W, Cc = x_nhwc.shape
    xp = jnp.pad(x_nhwc, ((0, 0), (1, 1), (1, 1), (0, 0)))
    taps = [xp[:, dy:dy + H, dx:dx + W, :] for dy in range(3) for dx in range(3)]
    return jnp.concatenate(taps, axis=-1).reshape(B * H * W, 9 * Cc)


def flow_step_forward(params, x_nchw, logdet, hidden_features, actnorm_scale=1.0):
    B, C, H, W = x_nchw.shape
    Ch, Hd, HW = C // 2, hidden_features, H * W
    N = B * HW
    tile_n = _pick_row_tile(HW)
    n_tiles = N // tile_n
    grid = (n_tiles,)
    f32, bf16 = jnp.float32, jnp.bfloat16

    x = jnp.transpose(x_nchw.astype(f32), (0, 2, 3, 1)).reshape(N, C)   # NHWC rows
    logdet = logdet.astype(f32).reshape(B)

    # invertible 1x1 conv weight from the LU parameterisation (get_weight, forward)
    l = params['l'] * params['l_mask'] + params['eye']
    u = (params['u'] * params['l_mask'].T
         + jnp.diag(params['sign_s'] * jnp.exp(params['log_s'])))
    wt = (params['p'] @ (l @ u)).T                                       # z = y @ W^T

    # ---- pass 1: ActNorm statistics of x (reduction over all rows) ----
    mean_x, factor_x = pl.pallas_call(
        functools.partial(_actnorm_stats_kernel, inv_n=1.0 / N,
                          scale=actnorm_scale, eps=_EPS),
        grid=grid,
        in_specs=[_row_spec(tile_n, C)],
        out_specs=(_const_spec((1, C)), _const_spec((1, C))),
        out_shape=(jax.ShapeDtypeStruct((1, C), f32),
                   jax.ShapeDtypeStruct((1, C), f32)),
        scratch_shapes=[pltpu.VMEM((1, C), f32), pltpu.VMEM((1, C), f32)],
        compiler_params=_compiler_params("arbitrary"),
    )(x)

    # ---- pass 2: apply ActNorm + invertible 1x1 conv, split into (z1, z2) ----
    z1, z2 = pl.pallas_call(
        _actnorm_permute_kernel,
        grid=grid,
        in_specs=[_row_spec(tile_n, C), _const_spec((1, C)), _const_spec((1, C)),
                  _const_spec((C, C))],
        out_specs=(_row_spec(tile_n, Ch), _row_spec(tile_n, Ch)),
        out_shape=(jax.ShapeDtypeStruct((N, Ch), f32),
                   jax.ShapeDtypeStruct((N, Ch), f32)),
        compiler_params=_compiler_params("parallel"),
    )(x, mean_x, factor_x, wt)

    # actnorm + permutation logdet terms (tiny (1,C)/(C,) reductions)
    logdet = logdet + (jnp.sum(jnp.log(factor_x)) + jnp.sum(params['log_s'])) * float(HW)

    # ---- pass 3: coupling conv1 (3x3 -> one K=9*Ch matmul) + output stats ----
    taps1 = _im2col_packed(z1.reshape(B, H, W, Ch)).astype(bf16)         # (N, 9*Ch)
    w1p = jnp.transpose(params['w1'], (2, 3, 1, 0)).reshape(9 * Ch, Hd).astype(bf16)
    h1, mean1, factor1 = pl.pallas_call(
        functools.partial(_conv_stats_kernel, inv_n=1.0 / N, eps=_EPS),
        grid=grid,
        in_specs=[_row_spec(tile_n, 9 * Ch), _const_spec((9 * Ch, Hd))],
        out_specs=(_row_spec(tile_n, Hd), _const_spec((1, Hd)), _const_spec((1, Hd))),
        out_shape=(jax.ShapeDtypeStruct((N, Hd), f32),
                   jax.ShapeDtypeStruct((1, Hd), f32),
                   jax.ShapeDtypeStruct((1, Hd), f32)),
        scratch_shapes=[pltpu.VMEM((1, Hd), f32), pltpu.VMEM((1, Hd), f32)],
        compiler_params=_compiler_params("arbitrary"),
    )(taps1, w1p)

    # ---- pass 4: ActNorm+ReLU of h1, conv2 (1x1) + output stats ----
    w2t = params['w2'][:, :, 0, 0].T.astype(bf16)                        # (Hd, Hd)
    h2, mean2, factor2 = pl.pallas_call(
        functools.partial(_actnorm_relu_matmul_stats_kernel, inv_n=1.0 / N, eps=_EPS),
        grid=grid,
        in_specs=[_row_spec(tile_n, Hd), _const_spec((1, Hd)), _const_spec((1, Hd)),
                  _const_spec((Hd, Hd))],
        out_specs=(_row_spec(tile_n, Hd), _const_spec((1, Hd)), _const_spec((1, Hd))),
        out_shape=(jax.ShapeDtypeStruct((N, Hd), f32),
                   jax.ShapeDtypeStruct((1, Hd), f32),
                   jax.ShapeDtypeStruct((1, Hd), f32)),
        scratch_shapes=[pltpu.VMEM((1, Hd), f32), pltpu.VMEM((1, Hd), f32)],
        compiler_params=_compiler_params("arbitrary"),
    )(h1, mean1, factor1, w2t)

    # ---- pass 5: ActNorm+ReLU of h2 -> a2 (bf16 activations for the final conv) ----
    a2 = pl.pallas_call(
        _actnorm_relu_kernel,
        grid=grid,
        in_specs=[_row_spec(tile_n, Hd), _const_spec((1, Hd)), _const_spec((1, Hd))],
        out_specs=_row_spec(tile_n, Hd),
        out_shape=jax.ShapeDtypeStruct((N, Hd), bf16),
        compiler_params=_compiler_params("parallel"),
    )(h2, mean2, factor2)

    # ---- pass 6: Conv2dZeros (shift+scale fused) + affine coupling + logdet rows ----
    taps2 = _im2col_packed(a2.reshape(B, H, W, Hd))                      # (N, 9*Hd) bf16
    perm = np.concatenate([np.arange(0, C, 2), np.arange(1, C, 2)])      # shift chans, then scale
    w3p = jnp.transpose(params['w3'], (2, 3, 1, 0)).reshape(9 * Hd, C)[:, perm].astype(bf16)
    b3p = params['b3'][perm].reshape(1, C).astype(f32)
    gain3p = jnp.exp(params['logs3'].reshape(C)[perm] * 3.0).reshape(1, C).astype(f32)

    z2_new, rowsum = pl.pallas_call(
        _coupling_out_kernel,
        grid=grid,
        in_specs=[_row_spec(tile_n, 9 * Hd), _row_spec(tile_n, Ch),
                  _const_spec((9 * Hd, C)), _const_spec((1, C)), _const_spec((1, C))],
        out_specs=(_row_spec(tile_n, Ch), _row_spec(tile_n, 1)),
        out_shape=(jax.ShapeDtypeStruct((N, Ch), f32),
                   jax.ShapeDtypeStruct((N, 1), f32)),
        compiler_params=_compiler_params("parallel"),
    )(taps2, z2, w3p, b3p, gain3p)

    logdet = logdet + jnp.sum(rowsum.reshape(B, HW), axis=1)

    z_out = jnp.concatenate(
        [z1.reshape(B, H, W, Ch), z2_new.reshape(B, H, W, Ch)], axis=-1)
    z_out = jnp.transpose(z_out, (0, 3, 1, 2))                           # back to NCHW
    return z_out, logdet


# ----------------------------------------------------------------------------
# Pure-JAX reference (mirrors the PyTorch module) for a sanity check
# ----------------------------------------------------------------------------
def reference_forward(params, x_nchw, logdet):
    x = x_nchw.astype(jnp.float32)
    B, C, H, W = x.shape

    mean = jnp.mean(x, axis=(0, 2, 3), keepdims=True)
    bias = -mean
    var = jnp.mean((x + bias) ** 2, axis=(0, 2, 3), keepdims=True)
    logs = jnp.log(1.0 / (jnp.sqrt(var) + 1e-6))
    z = (x + bias) * jnp.exp(logs)
    logdet = logdet + jnp.sum(logs) * (H * W)

    l = params['l'] * params['l_mask'] + params['eye']
    u = params['u'] * params['l_mask'].T + jnp.diag(params['sign_s'] * jnp.exp(params['log_s']))
    w = params['p'] @ (l @ u)
    z = jnp.einsum('oc,bchw->bohw', w, z)
    logdet = logdet + jnp.sum(params['log_s']) * (H * W)

    Ch = C // 2
    z1, z2 = z[:, :Ch], z[:, Ch:]

    def conv2d(xx, ww, pad):
        return jax.lax.conv_general_dilated(
            xx, ww, (1, 1), [(pad, pad), (pad, pad)],
            dimension_numbers=('NCHW', 'OIHW', 'NCHW'))

    def actnorm_apply(h):
        m = jnp.mean(h, axis=(0, 2, 3), keepdims=True)
        v = jnp.mean((h - m) ** 2, axis=(0, 2, 3), keepdims=True)
        lg = jnp.log(1.0 / (jnp.sqrt(v) + 1e-6))
        return (h - m) * jnp.exp(lg)

    h = jax.nn.relu(actnorm_apply(conv2d(z1, params['w1'], 1)))
    h = jax.nn.relu(actnorm_apply(conv2d(h, params['w2'], 0)))
    h = conv2d(h, params['w3'], 1) + params['b3'].reshape(1, C, 1, 1)
    h = h * jnp.exp(params['logs3'].reshape(1, C, 1, 1) * 3.0)
    shift, scale_raw = h[:, 0::2], h[:, 1::2]
    scale = jax.nn.sigmoid(scale_raw + 2.0)
    z2 = (z2 + shift) * scale
    logdet = logdet + jnp.sum(jnp.log(scale), axis=(1, 2, 3))
    return jnp.concatenate([z1, z2], axis=1), logdet


if __name__ == "__main__":
    B, C, H, W = 2, 4, 16, 16          # in_features = 4
    hidden = 8                          # hidden_features = 8
    key = jax.random.PRNGKey(0)
    kx, kp = jax.random.split(key)
    x = jax.random.normal(kx, (B, C, H, W), jnp.float32)
    logdet0 = jnp.zeros((B,), jnp.float32)
    params = init_params(kp, C, hidden)

    fwd = jax.jit(flow_step_forward, static_argnums=(3,))
    z, logdet = fwd(params, x, logdet0, hidden)
    z = jax.block_until_ready(z)
    logdet = jax.block_until_ready(logdet)

    z_ref, logdet_ref = reference_forward(params, x, logdet0)
    np.testing.assert_allclose(np.asarray(z), np.asarray(z_ref), rtol=1e-2, atol=1e-2)
    np.testing.assert_allclose(np.asarray(logdet), np.asarray(logdet_ref), rtol=1e-2, atol=1e-2)

    print("KERNEL_OK")
</pallas_src>

<mosaic_0001>
module attributes {stable_mosaic.version = 11 : i64} {
  func.func @_actnorm_stats_kernel(%arg0: i32, %arg1: memref<256x4xf32, #tpu.memory_space<vmem>>, %arg2: memref<1x4xf32, #tpu.memory_space<vmem>>, %arg3: memref<1x4xf32, #tpu.memory_space<vmem>>, %arg4: memref<1x4xf32, #tpu.memory_space<vmem>>, %arg5: memref<1x4xf32, #tpu.memory_space<vmem>>) attributes {dimension_semantics = [#tpu.dimension_semantics<arbitrary>], iteration_bounds = array<i64: 2>, scalar_prefetch = 0 : i64, scratch_operands = 2 : i64, tpu.core_type = #tpu.core_type<tc>, window_params = [{transform_indices = @transform_0, window_bounds = array<i64: 256, 4>}, {pipeline_mode = #tpu.pipeline_mode<synchronous>, transform_indices = @transform_1, window_bounds = array<i64: 1, 4>}, {pipeline_mode = #tpu.pipeline_mode<synchronous>, transform_indices = @transform_2, window_bounds = array<i64: 1, 4>}]} {
    %c0_i32 = arith.constant 0 : i32
    %0 = arith.cmpi eq, %arg0, %c0_i32 : i32
    %1 = arith.extui %0 : i1 to i32
    %c0_i32_0 = arith.constant 0 : i32
    %2 = arith.cmpi ne, %1, %c0_i32_0 : i32
    scf.if %2 {
      %cst_12 = arith.constant 0.000000e+00 : f32
      %18 = vector.broadcast %cst_12 : f32 to vector<1x4xf32>
      %c0_13 = arith.constant 0 : index
      %c0_14 = arith.constant 0 : index
      %19 = vector.load %arg4[%c0_13, %c0_14] : memref<1x4xf32, #tpu.memory_space<vmem>>, vector<1x4xf32>
      tpu.vector_store %arg4[%c0_13, %c0_14], %18 {strides = array<i32>} : memref<1x4xf32, #tpu.memory_space<vmem>>, vector<1x4xf32>,
      %cst_15 = arith.constant 0.000000e+00 : f32
      %20 = vector.broadcast %cst_15 : f32 to vector<1x4xf32>
      %c0_16 = arith.constant 0 : index
      %c0_17 = arith.constant 0 : index
      %21 = vector.load %arg5[%c0_16, %c0_17] : memref<1x4xf32, #tpu.memory_space<vmem>>, vector<1x4xf32>
      tpu.vector_store %arg5[%c0_16, %c0_17], %20 {strides = array<i32>} : memref<1x4xf32, #tpu.memory_space<vmem>>, vector<1x4xf32>,
    } else {
    }
    %c0 = arith.constant 0 : index
    %c0_1 = arith.constant 0 : index
    %3 = vector.load %arg1[%c0, %c0_1] : memref<256x4xf32, #tpu.memory_space<vmem>>, vector<256x4xf32>
    %c0_2 = arith.constant 0 : index
    %c0_3 = arith.constant 0 : index
    %4 = vector.load %arg4[%c0_2, %c0_3] : memref<1x4xf32, #tpu.memory_space<vmem>>, vector<1x4xf32>
    %cst = arith.constant dense<0.000000e+00> : vector<4xf32>
    %5 = vector.multi_reduction <add>, %3, %cst [0] : vector<256x4xf32> to vector<4xf32>
    %6 = vector.shape_cast %5 : vector<4xf32> to vector<1x4xf32>
    %7 = arith.addf %4, %6 : vector<1x4xf32>
    %c0_4 = arith.constant 0 : index
    %c0_5 = arith.constant 0 : index
    %8 = vector.load %arg4[%c0_4, %c0_5] : memref<1x4xf32, #tpu.memory_space<vmem>>, vector<1x4xf32>
    tpu.vector_store %arg4[%c0_4, %c0_5], %7 {strides = array<i32>} : memref<1x4xf32, #tpu.memory_space<vmem>>, vector<1x4xf32>,
    %c0_6 = arith.constant 0 : index
    %c0_7 = arith.constant 0 : index
    %9 = vector.load %arg5[%c0_6, %c0_7] : memref<1x4xf32, #tpu.memory_space<vmem>>, vector<1x4xf32>
    %10 = arith.mulf %3, %3 : vector<256x4xf32>
    %cst_8 = arith.constant dense<0.000000e+00> : vector<4xf32>
    %11 = vector.multi_reduction <add>, %10, %cst_8 [0] : vector<256x4xf32> to vector<4xf32>
    %12 = vector.shape_cast %11 : vector<4xf32> to vector<1x4xf32>
    %13 = arith.addf %9, %12 : vector<1x4xf32>
    %c0_9 = arith.constant 0 : index
    %c0_10 = arith.constant 0 : index
    %14 = vector.load %arg5[%c0_9, %c0_10] : memref<1x4xf32, #tpu.memory_space<vmem>>, vector<1x4xf32>
    tpu.vector_store %arg5[%c0_9, %c0_10], %13 {strides = array<i32>} : memref<1x4xf32, #tpu.memory_space<vmem>>, vector<1x4xf32>,
    %c1_i32 = arith.constant 1 : i32
    %15 = arith.cmpi eq, %arg0, %c1_i32 : i32
    %16 = arith.extui %15 : i1 to i32
    %c0_i32_11 = arith.constant 0 : i32
    %17 = arith.cmpi ne, %16, %c0_i32_11 : i32
    scf.if %17 {
      %c0_12 = arith.constant 0 : index
      %c0_13 = arith.constant 0 : index
      %18 = vector.load %arg4[%c0_12, %c0_13] : memref<1x4xf32, #tpu.memory_space<vmem>>, vector<1x4xf32>
      %cst_14 = arith.constant 0.001953125 : f32
      %19 = vector.broadcast %cst_14 : f32 to vector<1x4xf32>
      %20 = arith.mulf %18, %19 : vector<1x4xf32>
      %c0_15 = arith.constant 0 : index
      %c0_16 = arith.constant 0 : index
      %21 = vector.load %arg5[%c0_15, %c0_16] : memref<1x4xf32, #tpu.memory_space<vmem>>, vector<1x4xf32>
      %cst_17 = arith.constant 0.001953125 : f32
      %22 = vector.broadcast %cst_17 : f32 to vector<1x4xf32>
      %23 = arith.mulf %21, %22 : vector<1x4xf32>
      %24 = arith.mulf %20, %20 : vector<1x4xf32>
      %25 = arith.subf %23, %24 : vector<1x4xf32>
      %cst_18 = arith.constant 0.000000e+00 : f32
      %26 = vector.broadcast %cst_18 : f32 to vector<1x4xf32>
      %27 = arith.maximumf %25, %26 : vector<1x4xf32>
      %c0_19 = arith.constant 0 : index
      %c0_20 = arith.constant 0 : index
      %28 = vector.load %arg2[%c0_19, %c0_20] : memref<1x4xf32, #tpu.memory_space<vmem>>, vector<1x4xf32>
      tpu.vector_store %arg2[%c0_19, %c0_20], %20 {strides = array<i32>} : memref<1x4xf32, #tpu.memory_space<vmem>>, vector<1x4xf32>,
      %29 = math.sqrt %27 : vector<1x4xf32>
      %cst_21 = arith.constant 9.99999997E-7 : f32
      %30 = vector.broadcast %cst_21 : f32 to vector<1x4xf32>
      %31 = arith.addf %29, %30 : vector<1x4xf32>
      %cst_22 = arith.constant 1.000000e+00 : f32
      %32 = vector.broadcast %cst_22 : f32 to vector<1x4xf32>
      %33 = arith.divf %32, %31 : vector<1x4xf32>
      %c0_23 = arith.constant 0 : index
      %c0_24 = arith.constant 0 : index
      %34 = vector.load %arg3[%c0_23, %c0_24] : memref<1x4xf32, #tpu.memory_space<vmem>>, vector<1x4xf32>
      tpu.vector_store %arg3[%c0_23, %c0_24], %33 {strides = array<i32>} : memref<1x4xf32, #tpu.memory_space<vmem>>, vector<1x4xf32>,
    } else {
    }
    return
  }
  func.func @transform_0(%arg0: i32) -> (i32, i32) {
    %c0_i32 = arith.constant 0 : i32
    %c0_i32_0 = arith.constant 0 : i32
    return %arg0, %c0_i32 : i32, i32
  }
  func.func @transform_1(%arg0: i32) -> (i32, i32) {
    %c0_i32 = arith.constant 0 : i32
    %c0_i32_0 = arith.constant 0 : i32
    %c0_i32_1 = arith.constant 0 : i32
    return %c0_i32, %c0_i32_0 : i32, i32
  }
  func.func @transform_2(%arg0: i32) -> (i32, i32) {
    %c0_i32 = arith.constant 0 : i32
    %c0_i32_0 = arith.constant 0 : i32
    %c0_i32_1 = arith.constant 0 : i32
    return %c0_i32, %c0_i32_0 : i32, i32
  }
}

module attributes {stable_mosaic.version = 11 : i64} {
  func.func @_actnorm_permute_kernel(%arg0: i32, %arg1: memref<256x4xf32, #tpu.memory_space<vmem>>, %arg2: memref<1x4xf32, #tpu.memory_space<vmem>>, %arg3: memref<1x4xf32, #tpu.memory_space<vmem>>, %arg4: memref<4x4xf32, #tpu.memory_space<vmem>>, %arg5: memref<256x2xf32, #tpu.memory_space<vmem>>, %arg6: memref<256x2xf32, #tpu.memory_space<vmem>>) attributes {dimension_semantics = [#tpu.dimension_semantics<parallel>], iteration_bounds = array<i64: 2>, scalar_prefetch = 0 : i64, scratch_operands = 0 : i64, tpu.core_type = #tpu.core_type<tc>, window_params = [{transform_indices = @transform_0, window_bounds = array<i64: 256, 4>}, {pipeline_mode = #tpu.pipeline_mode<synchronous>, transform_indices = @transform_1, window_bounds = array<i64: 1, 4>}, {pipeline_mode = #tpu.pipeline_mode<synchronous>, transform_indices = @transform_2, window_bounds = array<i64: 1, 4>}, {pipeline_mode = #tpu.pipeline_mode<synchronous>, transform_indices = @transform_3, window_bounds = array<i64: 4, 4>}, {transform_indices = @transform_4, window_bounds = array<i64: 256, 2>}, {transform_indices = @transform_5, window_bounds = array<i64: 256, 2>}]} {
    %c0 = arith.constant 0 : index
    %c0_0 = arith.constant 0 : index
    %0 = vector.load %arg1[%c0, %c0_0] : memref<256x4xf32, #tpu.memory_space<vmem>>, vector<256x4xf32>
    %c0_1 = arith.constant 0 : index
    %c0_2 = arith.constant 0 : index
    %1 = vector.load %arg2[%c0_1, %c0_2] : memref<1x4xf32, #tpu.memory_space<vmem>>, vector<1x4xf32>
    %2 = vector.broadcast %1 : vector<1x4xf32> to vector<256x4xf32>
    %3 = arith.subf %0, %2 : vector<256x4xf32>
    %c0_3 = arith.constant 0 : index
    %c0_4 = arith.constant 0 : index
    %4 = vector.load %arg3[%c0_3, %c0_4] : memref<1x4xf32, #tpu.memory_space<vmem>>, vector<1x4xf32>
    %5 = vector.broadcast %4 : vector<1x4xf32> to vector<256x4xf32>
    %6 = arith.mulf %3, %5 : vector<256x4xf32>
    %c0_5 = arith.constant 0 : index
    %c0_6 = arith.constant 0 : index
    %7 = vector.load %arg4[%c0_5, %c0_6] : memref<4x4xf32, #tpu.memory_space<vmem>>, vector<4x4xf32>
    %cst = arith.constant dense<0.000000e+00> : vector<256x4xf32>
    %8 = tpu.matmul %6, %7, %cst {dimension_numbers = #tpu.dot_dimension_numbers<[1], [0], [0], [1], [0, 0, 1, 1], [], []>} : vector<256x4xf32>, vector<4x4xf32>, vector<256x4xf32> -> vector<256x4xf32>
    %9 = vector.extract_strided_slice %8 {offsets = [0, 0], sizes = [256, 2], strides = [1, 1]} : vector<256x4xf32> to vector<256x2xf32>
    %c0_7 = arith.constant 0 : index
    %c0_8 = arith.constant 0 : index
    %10 = vector.load %arg5[%c0_7, %c0_8] : memref<256x2xf32, #tpu.memory_space<vmem>>, vector<256x2xf32>
    tpu.vector_store %arg5[%c0_7, %c0_8], %9 {strides = array<i32>} : memref<256x2xf32, #tpu.memory_space<vmem>>, vector<256x2xf32>,
    %11 = vector.extract_strided_slice %8 {offsets = [0, 2], sizes = [256, 2], strides = [1, 1]} : vector<256x4xf32> to vector<256x2xf32>
    %c0_9 = arith.constant 0 : index
    %c0_10 = arith.constant 0 : index
    %12 = vector.load %arg6[%c0_9, %c0_10] : memref<256x2xf32, #tpu.memory_space<vmem>>, vector<256x2xf32>
    tpu.vector_store %arg6[%c0_9, %c0_10], %11 {strides = array<i32>} : memref<256x2xf32, #tpu.memory_space<vmem>>, vector<256x2xf32>,
    return
  }
  func.func @transform_0(%arg0: i32) -> (i32, i32) {
    %c0_i32 = arith.constant 0 : i32
    %c0_i32_0 = arith.constant 0 : i32
    return %arg0, %c0_i32 : i32, i32
  }
  func.func @transform_1(%arg0: i32) -> (i32, i32) {
    %c0_i32 = arith.constant 0 : i32
    %c0_i32_0 = arith.constant 0 : i32
    %c0_i32_1 = arith.constant 0 : i32
    return %c0_i32, %c0_i32_0 : i32, i32
  }
  func.func @transform_2(%arg0: i32) -> (i32, i32) {
    %c0_i32 = arith.constant 0 : i32
    %c0_i32_0 = arith.constant 0 : i32
    %c0_i32_1 = arith.constant 0 : i32
    return %c0_i32, %c0_i32_0 : i32, i32
  }
  func.func @transform_3(%arg0: i32) -> (i32, i32) {
    %c0_i32 = arith.constant 0 : i32
    %c0_i32_0 = arith.constant 0 : i32
    %c0_i32_1 = arith.constant 0 : i32
    return %c0_i32, %c0_i32_0 : i32, i32
  }
  func.func @transform_4(%arg0: i32) -> (i32, i32) {
    %c0_i32 = arith.constant 0 : i32
    %c0_i32_0 = arith.constant 0 : i32
    return %arg0, %c0_i32 : i32, i32
  }
  func.func @transform_5(%arg0: i32) -> (i32, i32) {
    %c0_i32 = arith.constant 0 : i32
    %c0_i32_0 = arith.constant 0 : i32
    return %arg0, %c0_i32 : i32, i32
  }
}

module attributes {stable_mosaic.version = 11 : i64} {
  func.func @_conv_stats_kernel(%arg0: i32, %arg1: memref<256x18xbf16, #tpu.memory_space<vmem>>, %arg2: memref<18x8xbf16, #tpu.memory_space<vmem>>, %arg3: memref<256x8xf32, #tpu.memory_space<vmem>>, %arg4: memref<1x8xf32, #tpu.memory_space<vmem>>, %arg5: memref<1x8xf32, #tpu.memory_space<vmem>>, %arg6: memref<1x8xf32, #tpu.memory_space<vmem>>, %arg7: memref<1x8xf32, #tpu.memory_space<vmem>>) attributes {dimension_semantics = [#tpu.dimension_semantics<arbitrary>], iteration_bounds = array<i64: 2>, scalar_prefetch = 0 : i64, scratch_operands = 2 : i64, tpu.core_type = #tpu.core_type<tc>, window_params = [{transform_indices = @transform_0, window_bounds = array<i64: 256, 18>}, {pipeline_mode = #tpu.pipeline_mode<synchronous>, transform_indices = @transform_1, window_bounds = array<i64: 18, 8>}, {transform_indices = @transform_2, window_bounds = array<i64: 256, 8>}, {pipeline_mode = #tpu.pipeline_mode<synchronous>, transform_indices = @transform_3, window_bounds = array<i64: 1, 8>}, {pipeline_mode = #tpu.pipeline_mode<synchronous>, transform_indices = @transform_4, window_bounds = array<i64: 1, 8>}]} {
    %c0_i32 = arith.constant 0 : i32
    %0 = arith.cmpi eq, %arg0, %c0_i32 : i32
    %1 = arith.extui %0 : i1 to i32
    %c0_i32_0 = arith.constant 0 : i32
    %2 = arith.cmpi ne, %1, %c0_i32_0 : i32
    scf.if %2 {
      %cst_17 = arith.constant 0.000000e+00 : f32
      %21 = vector.broadcast %cst_17 : f32 to vector<1x8xf32>
      %c0_18 = arith.constant 0 : index
      %c0_19 = arith.constant 0 : index
      %22 = vector.load %arg6[%c0_18, %c0_19] : memref<1x8xf32, #tpu.memory_space<vmem>>, vector<1x8xf32>
      tpu.vector_store %arg6[%c0_18, %c0_19], %21 {strides = array<i32>} : memref<1x8xf32, #tpu.memory_space<vmem>>, vector<1x8xf32>,
      %cst_20 = arith.constant 0.000000e+00 : f32
      %23 = vector.broadcast %cst_20 : f32 to vector<1x8xf32>
      %c0_21 = arith.constant 0 : index
      %c0_22 = arith.constant 0 : index
      %24 = vector.load %arg7[%c0_21, %c0_22] : memref<1x8xf32, #tpu.memory_space<vmem>>, vector<1x8xf32>
      tpu.vector_store %arg7[%c0_21, %c0_22], %23 {strides = array<i32>} : memref<1x8xf32, #tpu.memory_space<vmem>>, vector<1x8xf32>,
    } else {
    }
    %c0 = arith.constant 0 : index
    %c0_1 = arith.constant 0 : index
    %3 = vector.load %arg1[%c0, %c0_1] : memref<256x18xbf16, #tpu.memory_space<vmem>>, vector<256x18xbf16>
    %c0_2 = arith.constant 0 : index
    %c0_3 = arith.constant 0 : index
    %4 = vector.load %arg2[%c0_2, %c0_3] : memref<18x8xbf16, #tpu.memory_space<vmem>>, vector<18x8xbf16>
    %cst = arith.constant dense<0.000000e+00> : vector<256x8xf32>
    %5 = tpu.matmul %3, %4, %cst {dimension_numbers = #tpu.dot_dimension_numbers<[1], [0], [0], [1], [0, 0, 1, 1], [], []>} : vector<256x18xbf16>, vector<18x8xbf16>, vector<256x8xf32> -> vector<256x8xf32>
    %c0_4 = arith.constant 0 : index
    %c0_5 = arith.constant 0 : index
    %6 = vector.load %arg3[%c0_4, %c0_5] : memref<256x8xf32, #tpu.memory_space<vmem>>, vector<256x8xf32>
    tpu.vector_store %arg3[%c0_4, %c0_5], %5 {strides = array<i32>} : memref<256x8xf32, #tpu.memory_space<vmem>>, vector<256x8xf32>,
    %c0_6 = arith.constant 0 : index
    %c0_7 = arith.constant 0 : index
    %7 = vector.load %arg6[%c0_6, %c0_7] : memref<1x8xf32, #tpu.memory_space<vmem>>, vector<1x8xf32>
    %cst_8 = arith.constant dense<0.000000e+00> : vector<8xf32>
    %8 = vector.multi_reduction <add>, %5, %cst_8 [0] : vector<256x8xf32> to vector<8xf32>
    %9 = vector.shape_cast %8 : vector<8xf32> to vector<1x8xf32>
    %10 = arith.addf %7, %9 : vector<1x8xf32>
    %c0_9 = arith.constant 0 : index
    %c0_10 = arith.constant 0 : index
    %11 = vector.load %arg6[%c0_9, %c0_10] : memref<1x8xf32, #tpu.memory_space<vmem>>, vector<1x8xf32>
    tpu.vector_store %arg6[%c0_9, %c0_10], %10 {strides = array<i32>} : memref<1x8xf32, #tpu.memory_space<vmem>>, vector<1x8xf32>,
    %c0_11 = arith.constant 0 : index
    %c0_12 = arith.constant 0 : index
    %12 = vector.load %arg7[%c0_11, %c0_12] : memref<1x8xf32, #tpu.memory_space<vmem>>, vector<1x8xf32>
    %13 = arith.mulf %5, %5 : vector<256x8xf32>
    %cst_13 = arith.constant dense<0.000000e+00> : vector<8xf32>
    %14 = vector.multi_reduction <add>, %13, %cst_13 [0] : vector<256x8xf32> to vector<8xf32>
    %15 = vector.shape_cast %14 : vector<8xf32> to vector<1x8xf32>
    %16 = arith.addf %12, %15 : vector<1x8xf32>
    %c0_14 = arith.constant 0 : index
    %c0_15 = arith.constant 0 : index
    %17 = vector.load %arg7[%c0_14, %c0_15] : memref<1x8xf32, #tpu.memory_space<vmem>>, vector<1x8xf32>
    tpu.vector_store %arg7[%c0_14, %c0_15], %16 {strides = array<i32>} : memref<1x8xf32, #tpu.memory_space<vmem>>, vector<1x8xf32>,
    %c1_i32 = arith.constant 1 : i32
    %18 = arith.cmpi eq, %arg0, %c1_i32 : i32
    %19 = arith.extui %18 : i1 to i32
    %c0_i32_16 = arith.constant 0 : i32
    %20 = arith.cmpi ne, %19, %c0_i32_16 : i32
    scf.if %20 {
      %c0_17 = arith.constant 0 : index
      %c0_18 = arith.constant 0 : index
      %21 = vector.load %arg6[%c0_17, %c0_18] : memref<1x8xf32, #tpu.memory_space<vmem>>, vector<1x8xf32>
      %cst_19 = arith.constant 0.001953125 : f32
      %22 = vector.broadcast %cst_19 : f32 to vector<1x8xf32>
      %23 = arith.mulf %21, %22 : vector<1x8xf32>
      %c0_20 = arith.constant 0 : index
      %c0_21 = arith.constant 0 : index
      %24 = vector.load %arg7[%c0_20, %c0_21] : memref<1x8xf32, #tpu.memory_space<vmem>>, vector<1x8xf32>
      %cst_22 = arith.constant 0.001953125 : f32
      %25 = vector.broadcast %cst_22 : f32 to vector<1x8xf32>
      %26 = arith.mulf %24, %25 : vector<1x8xf32>
      %27 = arith.mulf %23, %23 : vector<1x8xf32>
      %28 = arith.subf %26, %27 : vector<1x8xf32>
      %cst_23 = arith.constant 0.000000e+00 : f32
      %29 = vector.broadcast %cst_23 : f32 to vector<1x8xf32>
      %30 = arith.maximumf %28, %29 : vector<1x8xf32>
      %c0_24 = arith.constant 0 : index
      %c0_25 = arith.constant 0 : index
      %31 = vector.load %arg4[%c0_24, %c0_25] : memref<1x8xf32, #tpu.memory_space<vmem>>, vector<1x8xf32>
      tpu.vector_store %arg4[%c0_24, %c0_25], %23 {strides = array<i32>} : memref<1x8xf32, #tpu.memory_space<vmem>>, vector<1x8xf32>,
      %32 = math.sqrt %30 : vector<1x8xf32>
      %cst_26 = arith.constant 9.99999997E-7 : f32
      %33 = vector.broadcast %cst_26 : f32 to vector<1x8xf32>
      %34 = arith.addf %32, %33 : vector<1x8xf32>
      %cst_27 = arith.constant 1.000000e+00 : f32
      %35 = vector.broadcast %cst_27 : f32 to vector<1x8xf32>
      %36 = arith.divf %35, %34 : vector<1x8xf32>
      %c0_28 = arith.constant 0 : index
      %c0_29 = arith.constant 0 : index
      %37 = vector.load %arg5[%c0_28, %c0_29] : memref<1x8xf32, #tpu.memory_space<vmem>>, vector<1x8xf32>
      tpu.vector_store %arg5[%c0_28, %c0_29], %36 {strides = array<i32>} : memref<1x8xf32, #tpu.memory_space<vmem>>, vector<1x8xf32>,
    } else {
    }
    return
  }
  func.func @transform_0(%arg0: i32) -> (i32, i32) {
    %c0_i32 = arith.constant 0 : i32
    %c0_i32_0 = arith.constant 0 : i32
    return %arg0, %c0_i32 : i32, i32
  }
  func.func @transform_1(%arg0: i32) -> (i32, i32) {
    %c0_i32 = arith.constant 0 : i32
    %c0_i32_0 = arith.constant 0 : i32
    %c0_i32_1 = arith.constant 0 : i32
    return %c0_i32, %c0_i32_0 : i32, i32
  }
  func.func @transform_2(%arg0: i32) -> (i32, i32) {
    %c0_i32 = arith.constant 0 : i32
    %c0_i32_0 = arith.constant 0 : i32
    return %arg0, %c0_i32 : i32, i32
  }
  func.func @transform_3(%arg0: i32) -> (i32, i32) {
    %c0_i32 = arith.constant 0 : i32
    %c0_i32_0 = arith.constant 0 : i32
    %c0_i32_1 = arith.constant 0 : i32
    return %c0_i32, %c0_i32_0 : i32, i32
  }
  func.func @transform_4(%arg0: i32) -> (i32, i32) {
    %c0_i32 = arith.constant 0 : i32
    %c0_i32_0 = arith.constant 0 : i32
    %c0_i32_1 = arith.constant 0 : i32
    return %c0_i32, %c0_i32_0 : i32, i32
  }
}

module attributes {stable_mosaic.version = 11 : i64} {
  func.func @_actnorm_relu_matmul_stats_kernel(%arg0: i32, %arg1: memref<256x8xf32, #tpu.memory_space<vmem>>, %arg2: memref<1x8xf32, #tpu.memory_space<vmem>>, %arg3: memref<1x8xf32, #tpu.memory_space<vmem>>, %arg4: memref<8x8xbf16, #tpu.memory_space<vmem>>, %arg5: memref<256x8xf32, #tpu.memory_space<vmem>>, %arg6: memref<1x8xf32, #tpu.memory_space<vmem>>, %arg7: memref<1x8xf32, #tpu.memory_space<vmem>>, %arg8: memref<1x8xf32, #tpu.memory_space<vmem>>, %arg9: memref<1x8xf32, #tpu.memory_space<vmem>>) attributes {dimension_semantics = [#tpu.dimension_semantics<arbitrary>], iteration_bounds = array<i64: 2>, scalar_prefetch = 0 : i64, scratch_operands = 2 : i64, tpu.core_type = #tpu.core_type<tc>, window_params = [{transform_indices = @transform_0, window_bounds = array<i64: 256, 8>}, {pipeline_mode = #tpu.pipeline_mode<synchronous>, transform_indices = @transform_1, window_bounds = array<i64: 1, 8>}, {pipeline_mode = #tpu.pipeline_mode<synchronous>, transform_indices = @transform_2, window_bounds = array<i64: 1, 8>}, {pipeline_mode = #tpu.pipeline_mode<synchronous>, transform_indices = @transform_3, window_bounds = array<i64: 8, 8>}, {transform_indices = @transform_4, window_bounds = array<i64: 256, 8>}, {pipeline_mode = #tpu.pipeline_mode<synchronous>, transform_indices = @transform_5, window_bounds = array<i64: 1, 8>}, {pipeline_mode = #tpu.pipeline_mode<synchronous>, transform_indices = @transform_6, window_bounds = array<i64: 1, 8>}]} {
    %c0_i32 = arith.constant 0 : i32
    %0 = arith.cmpi eq, %arg0, %c0_i32 : i32
    %1 = arith.extui %0 : i1 to i32
    %c0_i32_0 = arith.constant 0 : i32
    %2 = arith.cmpi ne, %1, %c0_i32_0 : i32
    scf.if %2 {
      %cst_22 = arith.constant 0.000000e+00 : f32
      %30 = vector.broadcast %cst_22 : f32 to vector<1x8xf32>
      %c0_23 = arith.constant 0 : index
      %c0_24 = arith.constant 0 : index
      %31 = vector.load %arg8[%c0_23, %c0_24] : memref<1x8xf32, #tpu.memory_space<vmem>>, vector<1x8xf32>
      tpu.vector_store %arg8[%c0_23, %c0_24], %30 {strides = array<i32>} : memref<1x8xf32, #tpu.memory_space<vmem>>, vector<1x8xf32>,
      %cst_25 = arith.constant 0.000000e+00 : f32
      %32 = vector.broadcast %cst_25 : f32 to vector<1x8xf32>
      %c0_26 = arith.constant 0 : index
      %c0_27 = arith.constant 0 : index
      %33 = vector.load %arg9[%c0_26, %c0_27] : memref<1x8xf32, #tpu.memory_space<vmem>>, vector<1x8xf32>
      tpu.vector_store %arg9[%c0_26, %c0_27], %32 {strides = array<i32>} : memref<1x8xf32, #tpu.memory_space<vmem>>, vector<1x8xf32>,
    } else {
    }
    %c0 = arith.constant 0 : index
    %c0_1 = arith.constant 0 : index
    %3 = vector.load %arg1[%c0, %c0_1] : memref<256x8xf32, #tpu.memory_space<vmem>>, vector<256x8xf32>
    %c0_2 = arith.constant 0 : index
    %c0_3 = arith.constant 0 : index
    %4 = vector.load %arg2[%c0_2, %c0_3] : memref<1x8xf32, #tpu.memory_space<vmem>>, vector<1x8xf32>
    %5 = vector.broadcast %4 : vector<1x8xf32> to vector<256x8xf32>
    %6 = arith.subf %3, %5 : vector<256x8xf32>
    %c0_4 = arith.constant 0 : index
    %c0_5 = arith.constant 0 : index
    %7 = vector.load %arg3[%c0_4, %c0_5] : memref<1x8xf32, #tpu.memory_space<vmem>>, vector<1x8xf32>
    %8 = vector.broadcast %7 : vector<1x8xf32> to vector<256x8xf32>
    %9 = arith.mulf %6, %8 : vector<256x8xf32>
    %cst = arith.constant 0.000000e+00 : f32
    %10 = vector.broadcast %cst : f32 to vector<256x8xf32>
    %11 = arith.maximumf %9, %10 : vector<256x8xf32>
    %12 = arith.truncf %11 : vector<256x8xf32> to vector<256x8xbf16>
    %c0_6 = arith.constant 0 : index
    %c0_7 = arith.constant 0 : index
    %13 = vector.load %arg4[%c0_6, %c0_7] : memref<8x8xbf16, #tpu.memory_space<vmem>>, vector<8x8xbf16>
    %cst_8 = arith.constant dense<0.000000e+00> : vector<256x8xf32>
    %14 = tpu.matmul %12, %13, %cst_8 {dimension_numbers = #tpu.dot_dimension_numbers<[1], [0], [0], [1], [0, 0, 1, 1], [], []>} : vector<256x8xbf16>, vector<8x8xbf16>, vector<256x8xf32> -> vector<256x8xf32>
    %c0_9 = arith.constant 0 : index
    %c0_10 = arith.constant 0 : index
    %15 = vector.load %arg5[%c0_9, %c0_10] : memref<256x8xf32, #tpu.memory_space<vmem>>, vector<256x8xf32>
    tpu.vector_store %arg5[%c0_9, %c0_10], %14 {strides = array<i32>} : memref<256x8xf32, #tpu.memory_space<vmem>>, vector<256x8xf32>,
    %c0_11 = arith.constant 0 : index
    %c0_12 = arith.constant 0 : index
    %16 = vector.load %arg8[%c0_11, %c0_12] : memref<1x8xf32, #tpu.memory_space<vmem>>, vector<1x8xf32>
    %cst_13 = arith.constant dense<0.000000e+00> : vector<8xf32>
    %17 = vector.multi_reduction <add>, %14, %cst_13 [0] : vector<256x8xf32> to vector<8xf32>
    %18 = vector.shape_cast %17 : vector<8xf32> to vector<1x8xf32>
    %19 = arith.addf %16, %18 : vector<1x8xf32>
    %c0_14 = arith.constant 0 : index
    %c0_15 = arith.constant 0 : index
    %20 = vector.load %arg8[%c0_14, %c0_15] : memref<1x8xf32, #tpu.memory_space<vmem>>, vector<1x8xf32>
    tpu.vector_store %arg8[%c0_14, %c0_15], %19 {strides = array<i32>} : memref<1x8xf32, #tpu.memory_space<vmem>>, vector<1x8xf32>,
    %c0_16 = arith.constant 0 : index
    %c0_17 = arith.constant 0 : index
    %21 = vector.load %arg9[%c0_16, %c0_17] : memref<1x8xf32, #tpu.memory_space<vmem>>, vector<1x8xf32>
    %22 = arith.mulf %14, %14 : vector<256x8xf32>
    %cst_18 = arith.constant dense<0.000000e+00> : vector<8xf32>
    %23 = vector.multi_reduction <add>, %22, %cst_18 [0] : vector<256x8xf32> to vector<8xf32>
    %24 = vector.shape_cast %23 : vector<8xf32> to vector<1x8xf32>
    %25 = arith.addf %21, %24 : vector<1x8xf32>
    %c0_19 = arith.constant 0 : index
    %c0_20 = arith.constant 0 : index
    %26 = vector.load %arg9[%c0_19, %c0_20] : memref<1x8xf32, #tpu.memory_space<vmem>>, vector<1x8xf32>
    tpu.vector_store %arg9[%c0_19, %c0_20], %25 {strides = array<i32>} : memref<1x8xf32, #tpu.memory_space<vmem>>, vector<1x8xf32>,
    %c1_i32 = arith.constant 1 : i32
    %27 = arith.cmpi eq, %arg0, %c1_i32 : i32
    %28 = arith.extui %27 : i1 to i32
    %c0_i32_21 = arith.constant 0 : i32
    %29 = arith.cmpi ne, %28, %c0_i32_21 : i32
    scf.if %29 {
      %c0_22 = arith.constant 0 : index
      %c0_23 = arith.constant 0 : index
      %30 = vector.load %arg8[%c0_22, %c0_23] : memref<1x8xf32, #tpu.memory_space<vmem>>, vector<1x8xf32>
      %cst_24 = arith.constant 0.001953125 : f32
      %31 = vector.broadcast %cst_24 : f32 to vector<1x8xf32>
      %32 = arith.mulf %30, %31 : vector<1x8xf32>
      %c0_25 = arith.constant 0 : index
      %c0_26 = arith.constant 0 : index
      %33 = vector.load %arg9[%c0_25, %c0_26] : memref<1x8xf32, #tpu.memory_space<vmem>>, vector<1x8xf32>
      %cst_27 = arith.constant 0.001953125 : f32
      %34 = vector.broadcast %cst_27 : f32 to vector<1x8xf32>
      %35 = arith.mulf %33, %34 : vector<1x8xf32>
      %36 = arith.mulf %32, %32 : vector<1x8xf32>
      %37 = arith.subf %35, %36 : vector<1x8xf32>
      %cst_28 = arith.constant 0.000000e+00 : f32
      %38 = vector.broadcast %cst_28 : f32 to vector<1x8xf32>
      %39 = arith.maximumf %37, %38 : vector<1x8xf32>
      %c0_29 = arith.constant 0 : index
      %c0_30 = arith.constant 0 : index
      %40 = vector.load %arg6[%c0_29, %c0_30] : memref<1x8xf32, #tpu.memory_space<vmem>>, vector<1x8xf32>
      tpu.vector_store %arg6[%c0_29, %c0_30], %32 {strides = array<i32>} : memref<1x8xf32, #tpu.memory_space<vmem>>, vector<1x8xf32>,
      %41 = math.sqrt %39 : vector<1x8xf32>
      %cst_31 = arith.constant 9.99999997E-7 : f32
      %42 = vector.broadcast %cst_31 : f32 to vector<1x8xf32>
      %43 = arith.addf %41, %42 : vector<1x8xf32>
      %cst_32 = arith.constant 1.000000e+00 : f32
      %44 = vector.broadcast %cst_32 : f32 to vector<1x8xf32>
      %45 = arith.divf %44, %43 : vector<1x8xf32>
      %c0_33 = arith.constant 0 : index
      %c0_34 = arith.constant 0 : index
      %46 = vector.load %arg7[%c0_33, %c0_34] : memref<1x8xf32, #tpu.memory_space<vmem>>, vector<1x8xf32>
      tpu.vector_store %arg7[%c0_33, %c0_34], %45 {strides = array<i32>} : memref<1x8xf32, #tpu.memory_space<vmem>>, vector<1x8xf32>,
    } else {
    }
    return
  }
  func.func @transform_0(%arg0: i32) -> (i32, i32) {
    %c0_i32 = arith.constant 0 : i32
    %c0_i32_0 = arith.constant 0 : i32
    return %arg0, %c0_i32 : i32, i32
  }
  func.func @transform_1(%arg0: i32) -> (i32, i32) {
    %c0_i32 = arith.constant 0 : i32
    %c0_i32_0 = arith.constant 0 : i32
    %c0_i32_1 = arith.constant 0 : i32
    return %c0_i32, %c0_i32_0 : i32, i32
  }
  func.func @transform_2(%arg0: i32) -> (i32, i32) {
    %c0_i32 = arith.constant 0 : i32
    %c0_i32_0 = arith.constant 0 : i32
    %c0_i32_1 = arith.constant 0 : i32
    return %c0_i32, %c0_i32_0 : i32, i32
  }
  func.func @transform_3(%arg0: i32) -> (i32, i32) {
    %c0_i32 = arith.constant 0 : i32
    %c0_i32_0 = arith.constant 0 : i32
    %c0_i32_1 = arith.constant 0 : i32
    return %c0_i32, %c0_i32_0 : i32, i32
  }
  func.func @transform_4(%arg0: i32) -> (i32, i32) {
    %c0_i32 = arith.constant 0 : i32
    %c0_i32_0 = arith.constant 0 : i32
    return %arg0, %c0_i32 : i32, i32
  }
  func.func @transform_5(%arg0: i32) -> (i32, i32) {
    %c0_i32 = arith.constant 0 : i32
    %c0_i32_0 = arith.constant 0 : i32
    %c0_i32_1 = arith.constant 0 : i32
    return %c0_i32, %c0_i32_0 : i32, i32
  }
  func.func @transform_6(%arg0: i32) -> (i32, i32) {
    %c0_i32 = arith.constant 0 : i32
    %c0_i32_0 = arith.constant 0 : i32
    %c0_i32_1 = arith.constant 0 : i32
    return %c0_i32, %c0_i32_0 : i32, i32
  }
}

module attributes {stable_mosaic.version = 11 : i64} {
  func.func @_actnorm_relu_kernel(%arg0: i32, %arg1: memref<256x8xf32, #tpu.memory_space<vmem>>, %arg2: memref<1x8xf32, #tpu.memory_space<vmem>>, %arg3: memref<1x8xf32, #tpu.memory_space<vmem>>, %arg4: memref<256x8xbf16, #tpu.memory_space<vmem>>) attributes {dimension_semantics = [#tpu.dimension_semantics<parallel>], iteration_bounds = array<i64: 2>, scalar_prefetch = 0 : i64, scratch_operands = 0 : i64, tpu.core_type = #tpu.core_type<tc>, window_params = [{transform_indices = @transform_0, window_bounds = array<i64: 256, 8>}, {pipeline_mode = #tpu.pipeline_mode<synchronous>, transform_indices = @transform_1, window_bounds = array<i64: 1, 8>}, {pipeline_mode = #tpu.pipeline_mode<synchronous>, transform_indices = @transform_2, window_bounds = array<i64: 1, 8>}, {transform_indices = @transform_3, window_bounds = array<i64: 256, 8>}]} {
    %c0 = arith.constant 0 : index
    %c0_0 = arith.constant 0 : index
    %0 = vector.load %arg1[%c0, %c0_0] : memref<256x8xf32, #tpu.memory_space<vmem>>, vector<256x8xf32>
    %c0_1 = arith.constant 0 : index
    %c0_2 = arith.constant 0 : index
    %1 = vector.load %arg2[%c0_1, %c0_2] : memref<1x8xf32, #tpu.memory_space<vmem>>, vector<1x8xf32>
    %2 = vector.broadcast %1 : vector<1x8xf32> to vector<256x8xf32>
    %3 = arith.subf %0, %2 : vector<256x8xf32>
    %c0_3 = arith.constant 0 : index
    %c0_4 = arith.constant 0 : index
    %4 = vector.load %arg3[%c0_3, %c0_4] : memref<1x8xf32, #tpu.memory_space<vmem>>, vector<1x8xf32>
    %5 = vector.broadcast %4 : vector<1x8xf32> to vector<256x8xf32>
    %6 = arith.mulf %3, %5 : vector<256x8xf32>
    %cst = arith.constant 0.000000e+00 : f32
    %7 = vector.broadcast %cst : f32 to vector<256x8xf32>
    %8 = arith.maximumf %6, %7 : vector<256x8xf32>
    %9 = arith.truncf %8 : vector<256x8xf32> to vector<256x8xbf16>
    %c0_5 = arith.constant 0 : index
    %c0_6 = arith.constant 0 : index
    %10 = vector.load %arg4[%c0_5, %c0_6] : memref<256x8xbf16, #tpu.memory_space<vmem>>, vector<256x8xbf16>
    tpu.vector_store %arg4[%c0_5, %c0_6], %9 {strides = array<i32>} : memref<256x8xbf16, #tpu.memory_space<vmem>>, vector<256x8xbf16>,
    return
  }
  func.func @transform_0(%arg0: i32) -> (i32, i32) {
    %c0_i32 = arith.constant 0 : i32
    %c0_i32_0 = arith.constant 0 : i32
    return %arg0, %c0_i32 : i32, i32
  }
  func.func @transform_1(%arg0: i32) -> (i32, i32) {
    %c0_i32 = arith.constant 0 : i32
    %c0_i32_0 = arith.constant 0 : i32
    %c0_i32_1 = arith.constant 0 : i32
    return %c0_i32, %c0_i32_0 : i32, i32
  }
  func.func @transform_2(%arg0: i32) -> (i32, i32) {
    %c0_i32 = arith.constant 0 : i32
    %c0_i32_0 = arith.constant 0 : i32
    %c0_i32_1 = arith.constant 0 : i32
    return %c0_i32, %c0_i32_0 : i32, i32
  }
  func.func @transform_3(%arg0: i32) -> (i32, i32) {
    %c0_i32 = arith.constant 0 : i32
    %c0_i32_0 = arith.constant 0 : i32
    return %arg0, %c0_i32 : i32, i32
  }
}

module attributes {stable_mosaic.version = 11 : i64} {
  func.func @_coupling_out_kernel(%arg0: i32, %arg1: memref<256x72xbf16, #tpu.memory_space<vmem>>, %arg2: memref<256x2xf32, #tpu.memory_space<vmem>>, %arg3: memref<72x4xbf16, #tpu.memory_space<vmem>>, %arg4: memref<1x4xf32, #tpu.memory_space<vmem>>, %arg5: memref<1x4xf32, #tpu.memory_space<vmem>>, %arg6: memref<256x2xf32, #tpu.memory_space<vmem>>, %arg7: memref<256x1xf32, #tpu.memory_space<vmem>>) attributes {dimension_semantics = [#tpu.dimension_semantics<parallel>], iteration_bounds = array<i64: 2>, scalar_prefetch = 0 : i64, scratch_operands = 0 : i64, tpu.core_type = #tpu.core_type<tc>, window_params = [{transform_indices = @transform_0, window_bounds = array<i64: 256, 72>}, {transform_indices = @transform_1, window_bounds = array<i64: 256, 2>}, {pipeline_mode = #tpu.pipeline_mode<synchronous>, transform_indices = @transform_2, window_bounds = array<i64: 72, 4>}, {pipeline_mode = #tpu.pipeline_mode<synchronous>, transform_indices = @transform_3, window_bounds = array<i64: 1, 4>}, {pipeline_mode = #tpu.pipeline_mode<synchronous>, transform_indices = @transform_4, window_bounds = array<i64: 1, 4>}, {transform_indices = @transform_5, window_bounds = array<i64: 256, 2>}, {transform_indices = @transform_6, window_bounds = array<i64: 256, 1>}]} {
    %c0 = arith.constant 0 : index
    %c0_0 = arith.constant 0 : index
    %0 = vector.load %arg1[%c0, %c0_0] : memref<256x72xbf16, #tpu.memory_space<vmem>>, vector<256x72xbf16>
    %c0_1 = arith.constant 0 : index
    %c0_2 = arith.constant 0 : index
    %1 = vector.load %arg3[%c0_1, %c0_2] : memref<72x4xbf16, #tpu.memory_space<vmem>>, vector<72x4xbf16>
    %cst = arith.constant dense<0.000000e+00> : vector<256x4xf32>
    %2 = tpu.matmul %0, %1, %cst {dimension_numbers = #tpu.dot_dimension_numbers<[1], [0], [0], [1], [0, 0, 1, 1], [], []>} : vector<256x72xbf16>, vector<72x4xbf16>, vector<256x4xf32> -> vector<256x4xf32>
    %c0_3 = arith.constant 0 : index
    %c0_4 = arith.constant 0 : index
    %3 = vector.load %arg4[%c0_3, %c0_4] : memref<1x4xf32, #tpu.memory_space<vmem>>, vector<1x4xf32>
    %4 = vector.broadcast %3 : vector<1x4xf32> to vector<256x4xf32>
    %5 = arith.addf %2, %4 : vector<256x4xf32>
    %c0_5 = arith.constant 0 : index
    %c0_6 = arith.constant 0 : index
    %6 = vector.load %arg5[%c0_5, %c0_6] : memref<1x4xf32, #tpu.memory_space<vmem>>, vector<1x4xf32>
    %7 = vector.broadcast %6 : vector<1x4xf32> to vector<256x4xf32>
    %8 = arith.mulf %5, %7 : vector<256x4xf32>
    %9 = vector.extract_strided_slice %8 {offsets = [0, 0], sizes = [256, 2], strides = [1, 1]} : vector<256x4xf32> to vector<256x2xf32>
    %10 = vector.extract_strided_slice %8 {offsets = [0, 2], sizes = [256, 2], strides = [1, 1]} : vector<256x4xf32> to vector<256x2xf32>
    %cst_7 = arith.constant 2.000000e+00 : f32
    %11 = vector.broadcast %cst_7 : f32 to vector<256x2xf32>
    %12 = arith.addf %10, %11 : vector<256x2xf32>
    %cst_8 = arith.constant 0.000000e+00 : f32
    %13 = vector.broadcast %cst_8 : f32 to vector<256x2xf32>
    %14 = arith.subf %13, %12 : vector<256x2xf32>
    %15 = math.exp %14 : vector<256x2xf32>
    %cst_9 = arith.constant 1.000000e+00 : f32
    %16 = vector.broadcast %cst_9 : f32 to vector<256x2xf32>
    %17 = arith.addf %16, %15 : vector<256x2xf32>
    %18 = tpu.reciprocal %17 {approx = true} : vector<256x2xf32> -> vector<256x2xf32>
    %cst_10 = arith.constant 1.000000e+00 : f32
    %19 = vector.broadcast %cst_10 : f32 to vector<256x2xf32>
    %20 = arith.addf %19, %15 : vector<256x2xf32>
    %21 = math.log %20 : vector<256x2xf32>
    %cst_11 = arith.constant 0.000000e+00 : f32
    %22 = vector.broadcast %cst_11 : f32 to vector<256x2xf32>
    %23 = arith.subf %22, %21 : vector<256x2xf32>
    %c0_12 = arith.constant 0 : index
    %c0_13 = arith.constant 0 : index
    %24 = vector.load %arg2[%c0_12, %c0_13] : memref<256x2xf32, #tpu.memory_space<vmem>>, vector<256x2xf32>
    %25 = arith.addf %24, %9 : vector<256x2xf32>
    %26 = arith.mulf %25, %18 : vector<256x2xf32>
    %c0_14 = arith.constant 0 : index
    %c0_15 = arith.constant 0 : index
    %27 = vector.load %arg6[%c0_14, %c0_15] : memref<256x2xf32, #tpu.memory_space<vmem>>, vector<256x2xf32>
    tpu.vector_store %arg6[%c0_14, %c0_15], %26 {strides = array<i32>} : memref<256x2xf32, #tpu.memory_space<vmem>>, vector<256x2xf32>,
    %cst_16 = arith.constant dense<0.000000e+00> : vector<256xf32>
    %28 = vector.multi_reduction <add>, %23, %cst_16 [1] : vector<256x2xf32> to vector<256xf32>
    %29 = vector.shape_cast %28 : vector<256xf32> to vector<256x1xf32>
    %c0_17 = arith.constant 0 : index
    %c0_18 = arith.constant 0 : index
    %30 = vector.load %arg7[%c0_17, %c0_18] : memref<256x1xf32, #tpu.memory_space<vmem>>, vector<256x1xf32>
    tpu.vector_store %arg7[%c0_17, %c0_18], %29 {strides = array<i32>} : memref<256x1xf32, #tpu.memory_space<vmem>>, vector<256x1xf32>,
    return
  }
  func.func @transform_0(%arg0: i32) -> (i32, i32) {
    %c0_i32 = arith.constant 0 : i32
    %c0_i32_0 = arith.constant 0 : i32
    return %arg0, %c0_i32 : i32, i32
  }
  func.func @transform_1(%arg0: i32) -> (i32, i32) {
    %c0_i32 = arith.constant 0 : i32
    %c0_i32_0 = arith.constant 0 : i32
    return %arg0, %c0_i32 : i32, i32
  }
  func.func @transform_2(%arg0: i32) -> (i32, i32) {
    %c0_i32 = arith.constant 0 : i32
    %c0_i32_0 = arith.constant 0 : i32
    %c0_i32_1 = arith.constant 0 : i32
    return %c0_i32, %c0_i32_0 : i32, i32
  }
  func.func @transform_3(%arg0: i32) -> (i32, i32) {
    %c0_i32 = arith.constant 0 : i32
    %c0_i32_0 = arith.constant 0 : i32
    %c0_i32_1 = arith.constant 0 : i32
    return %c0_i32, %c0_i32_0 : i32, i32
  }
  func.func @transform_4(%arg0: i32) -> (i32, i32) {
    %c0_i32 = arith.constant 0 : i32
    %c0_i32_0 = arith.constant 0 : i32
    %c0_i32_1 = arith.constant 0 : i32
    return %c0_i32, %c0_i32_0 : i32, i32
  }
  func.func @transform_5(%arg0: i32) -> (i32, i32) {
    %c0_i32 = arith.constant 0 : i32
    %c0_i32_0 = arith.constant 0 : i32
    return %arg0, %c0_i32 : i32, i32
  }
  func.func @transform_6(%arg0: i32) -> (i32, i32) {
    %c0_i32 = arith.constant 0 : i32
    %c0_i32_0 = arith.constant 0 : i32
    return %arg0, %c0_i32 : i32, i32
  }
}

</mosaic_0001>

<bundles_post_ra>
// kernel: flow_step_forward.6
= control target key start
LH: loop header
LB: loop body
LE: loop exit
PB: predicated region body
PF: predicated region fallthrough
CT: control target
= control target key end

     0   :  { %s450_s9 = smov 0   ;;  %s577_s0 = inlined_call_operand.vmem [shape: f32[512,4], index: 0, kind: input, shape index: {}]   ;;  %s578_s1 = inlined_call_operand.vmem [shape: f32[1,4], index: 1, kind: output, shape index: {0}]   ;;  %s579_s2 = inlined_call_operand.vmem [shape: f32[1,4], index: 2, kind: output, shape index: {1}]  }
   0x1 LB: > { %s456_s10 = sadd.s32 4294967295, %s432_s9   ;;  %p406_p0 = scmp.ge.s32.totalorder %s432_s9, 1  ;;  %s432_s9 = sphi %s450_s9, %s13_s9  }
   0x2   : > { %p106_p1 = scmp.lt.s32.totalorder %s432_s9, 3 }
   0x4   : > { %p107_p2 = pnand %p406_p0, %p106_p1 }
   0x5   : > { %s407_s11 = sshll.u32 (!%p107_p2), %s456_s10, 5  ;;  %p409_p4 = scmp.ne.s32.totalorder (!%p107_p2), %s456_s10, 0 }
   0x6   : > { %110 = sbr.rel (%p107_p2) target bundleno = 146 (0x92), region = 24  ;;  %p124_p3 = scmp.lt.s32.totalorder (!%p107_p2), %s407_s11, 63 }
   0xd   : > { %s581_s11 = smov (!%p124_p3, %s407_s11), 63  ;;  %132 = sbr.rel (%p409_p4) target bundleno = 20 (0x14), region = 28 }
   0xe   : > { %s408_s12 = sshll.u32 %s581_s11, 3  ;;  %vm133_vm0 = vcmask (!%p409_p4), 24576   ;;  %v434_v0 = vmov (!%p409_p4), 0.0  }
   0xf   : > { %s464_s15 = scalar_lea.vmem %s577_s0, %s408_s12  ;;  %134 = vst.msk [vmem:[#allocation2] sm:$0x1] (!%p409_p4), %vm133_vm0, %v434_v0  ;;  %135 = vst.msk [vmem:[#allocation3] sm:$0x1] (!%p409_p4), %vm133_vm0, %v434_v0 }
  0x14 PF: > { %v136_v1 = vld [vmem:[%s464_s15] sm:$0xff]  ;;  %v137_v2 = vld [vmem:[%s464_s15 + $0x8] sm:$0xff]  ;;  %v138_v3 = vld [vmem:[%s464_s15 + $0x10] sm:$0xff]  ;;  %vm169_vm1 = vcmask 31744   ;;  %vm240_vm2 = vcmask 24576   ;;  %p410_p5 = scmp.ne.s32.totalorder %s456_s10, 1 }
  0x15   : > { %v170_v4 = vsel %vm169_vm1, %v136_v1, 0.0  ;;  %v171_v5 = vsel %vm169_vm1, %v137_v2, 0.0  ;;  %v173_v6 = vsel %vm169_vm1, %v138_v3, 0.0  ;;  %v139_v7 = vld [vmem:[%s464_s15 + $0x18] sm:$0xff]  ;;  %v140_v10 = vld [vmem:[%s464_s15 + $0x20] sm:$0xff]  ;;  %v141_v13 = vld [vmem:[%s464_s15 + $0x28] sm:$0xff]  ;;  %v243_v28 = vmul.f32 %v136_v1, %v136_v1 }
  0x16   : > { %v172_v8 = vadd.f32 %v171_v5, %v170_v4  ;;  %v175_v9 = vsel %vm169_vm1, %v139_v7, 0.0  ;;  %v177_v12 = vsel %vm169_vm1, %v140_v10, 0.0  ;;  %v179_v15 = vsel %vm169_vm1, %v141_v13, 0.0  ;;  %v142_v16 = vld [vmem:[%s464_s15 + $0x30] sm:$0xff]  ;;  %v143_v19 = vld [vmem:[%s464_s15 + $0x38] sm:$0xff]  ;;  %v144_v22 = vld [vmem:[%s464_s15 + $0x40] sm:$0xff] }
  0x17   : > { %v181_v18 = vsel %vm169_vm1, %v142_v16, 0.0  ;;  %v183_v21 = vsel %vm169_vm1, %v143_v19, 0.0  ;;  %v185_v24 = vsel %vm169_vm1, %v144_v22, 0.0  ;;  %v145_v25 = vld [vmem:[%s464_s15 + $0x48] sm:$0xff]  ;;  %v244_v29 = vmul.f32 %v137_v2, %v137_v2  ;;  %v146_v31 = vld [vmem:[%s464_s15 + $0x50] sm:$0xff]  ;;  %v147_v33 = vld [vmem:[%s464_s15 + $0x58] sm:$0xff] }
  0x18   : > { %v174_v11 = vadd.f32 %v173_v6, %v172_v8  ;;  %v187_v27 = vsel %vm169_vm1, %v145_v25, 0.0  ;;  %v245_v30 = vmul.f32 %v138_v3, %v138_v3  ;;  %v189_v34 = vsel %vm169_vm1, %v146_v31, 0.0  ;;  %v148_v42 = vld [vmem:[%s464_s15 + $0x60] sm:$0xff]  ;;  %v149_v48 = vld [vmem:[%s464_s15 + $0x68] sm:$0xff]  ;;  %v150_v54 = vld [vmem:[%s464_s15 + $0x70] sm:$0xff] }
  0x19   : > { %v246_v35 = vmul.f32 %v139_v7, %v139_v7  ;;  %v191_v37 = vsel %vm169_vm1, %v147_v33, 0.0  ;;  %v247_v38 = vmul.f32 %v140_v10, %v140_v10  ;;  %v275_v39 = vsel %vm169_vm1, %v243_v28, 0.0  ;;  %v151_v60 = vld [vmem:[%s464_s15 + $0x78] sm:$0xff]  ;;  %v152_v2 = vld [vmem:[%s464_s15 + $0x80] sm:$0xff]  ;;  %v153_v8 = vld [vmem:[%s464_s15 + $0x88] sm:$0xff] }
  0x1a   : > { %v176_v14 = vadd.f32 %v175_v9, %v174_v11  ;;  %v276_v40 = vsel %vm169_vm1, %v244_v29, 0.0  ;;  %v278_v41 = vsel %vm169_vm1, %v245_v30, 0.0  ;;  %v193_v45 = vsel %vm169_vm1, %v148_v42, 0.0 }
  0x1b   : > { %v277_v44 = vadd.f32 %v276_v40, %v275_v39  ;;  %v248_v46 = vmul.f32 %v141_v13, %v141_v13  ;;  %v280_v47 = vsel %vm169_vm1, %v246_v35, 0.0  ;;  %v195_v51 = vsel %vm169_vm1, %v149_v48, 0.0 }
  0x1c   : > { %v178_v17 = vadd.f32 %v177_v12, %v176_v14  ;;  %v249_v52 = vmul.f32 %v142_v16, %v142_v16  ;;  %v282_v53 = vsel %vm169_vm1, %v247_v38, 0.0  ;;  %v197_v57 = vsel %vm169_vm1, %v150_v54, 0.0  ;;  %v154_v14 = vld [vmem:[%s464_s15 + $0x90] sm:$0xff] }
  0x1d   : > { %v279_v50 = vadd.f32 %v278_v41, %v277_v44  ;;  %v250_v58 = vmul.f32 %v143_v19, %v143_v19  ;;  %v284_v59 = vsel %vm169_vm1, %v248_v46, 0.0  ;;  %v199_v63 = vsel %vm169_vm1, %v151_v60, 0.0  ;;  %v158_v38 = vld [vmem:[%s464_s15 + $0xb0] sm:$0xff]  ;;  %v159_v44 = vld [vmem:[%s464_s15 + $0xb8] sm:$0xff] }
  0x1e   : > { %v180_v20 = vadd.f32 %v179_v15, %v178_v17  ;;  %v251_v0 = vmul.f32 %v144_v22, %v144_v22  ;;  %v286_v1 = vsel %vm169_vm1, %v249_v52, 0.0  ;;  %v201_v5 = vsel %vm169_vm1, %v152_v2, 0.0 }
  0x1f   : > { %v281_v56 = vadd.f32 %v280_v47, %v279_v50  ;;  %v252_v6 = vmul.f32 %v145_v25, %v145_v25  ;;  %v288_v7 = vsel %vm169_vm1, %v250_v58, 0.0  ;;  %v203_v11 = vsel %vm169_vm1, %v153_v8, 0.0  ;;  %v160_v50 = vld [vmem:[%s464_s15 + $0xc0] sm:$0xff] }
  0x20   : > { %v182_v23 = vadd.f32 %v181_v18, %v180_v20  ;;  %v253_v12 = vmul.f32 %v146_v31, %v146_v31  ;;  %v290_v13 = vsel %vm169_vm1, %v251_v0, 0.0  ;;  %v205_v17 = vsel %vm169_vm1, %v154_v14, 0.0  ;;  %v155_v20 = vld [vmem:[%s464_s15 + $0x98] sm:$0xff] }
  0x21   : > { %v283_v62 = vadd.f32 %v282_v53, %v281_v56  ;;  %v254_v18 = vmul.f32 %v147_v33, %v147_v33  ;;  %v292_v19 = vsel %vm169_vm1, %v252_v6, 0.0  ;;  %v256_v30 = vmul.f32 %v149_v48, %v149_v48  ;;  %v161_v56 = vld [vmem:[%s464_s15 + $0xc8] sm:$0xff] }
  0x22   : > { %v184_v26 = vadd.f32 %v183_v21, %v182_v23  ;;  %v207_v23 = vsel %vm169_vm1, %v155_v20, 0.0  ;;  %v294_v25 = vsel %vm169_vm1, %v253_v12, 0.0  ;;  %v213_v41 = vsel %vm169_vm1, %v158_v38, 0.0 }
  0x23   : > { %v285_v4 = vadd.f32 %v284_v59, %v283_v62  ;;  %v296_v31 = vsel %vm169_vm1, %v254_v18, 0.0  ;;  %v215_v47 = vsel %vm169_vm1, %v159_v44, 0.0  ;;  %v259_v48 = vmul.f32 %v152_v2, %v152_v2  ;;  %v162_v62 = vld [vmem:[%s464_s15 + $0xd0] sm:$0xff] }
  0x24   : > { %v186_v32 = vadd.f32 %v185_v24, %v184_v26  ;;  %v255_v24 = vmul.f32 %v148_v42, %v148_v42  ;;  %v156_v26 = vld [vmem:[%s464_s15 + $0xa0] sm:$0xff]  ;;  %v258_v42 = vmul.f32 %v151_v60, %v151_v60  ;;  %v217_v53 = vsel %vm169_vm1, %v160_v50, 0.0 }
  0x25   : > { %v287_v10 = vadd.f32 %v286_v1, %v285_v4  ;;  %v209_v29 = vsel %vm169_vm1, %v156_v26, 0.0  ;;  %v219_v59 = vsel %vm169_vm1, %v161_v56, 0.0  ;;  %v261_v60 = vmul.f32 %v154_v14, %v154_v14  ;;  %v163_v4 = vld [vmem:[%s464_s15 + $0xd8] sm:$0xff] }
  0x26   : > { %v188_v36 = vadd.f32 %v187_v27, %v186_v32  ;;  %v157_v32 = vld [vmem:[%s464_s15 + $0xa8] sm:$0xff]  ;;  %v221_v1 = vsel %vm169_vm1, %v162_v62, 0.0  ;;  %v262_v2 = vmul.f32 %v155_v20, %v155_v20  ;;  %v265_v20 = vmul.f32 %v158_v38, %v158_v38 }
  0x27   : > { %v289_v16 = vadd.f32 %v288_v7, %v287_v10  ;;  %v211_v35 = vsel %vm169_vm1, %v157_v32, 0.0  ;;  %v223_v7 = vsel %vm169_vm1, %v163_v4, 0.0  ;;  %v164_v10 = vld [vmem:[%s464_s15 + $0xe0] sm:$0xff]  ;;  %v264_v14 = vmul.f32 %v157_v32, %v157_v32 }
  0x28   : > { %v190_v43 = vadd.f32 %v189_v34, %v188_v36  ;;  %v257_v36 = vmul.f32 %v150_v54, %v150_v54  ;;  %v260_v54 = vmul.f32 %v153_v8, %v153_v8  ;;  %v263_v8 = vmul.f32 %v156_v26, %v156_v26 }
  0x29   : > { %v291_v22 = vadd.f32 %v290_v13, %v289_v16  ;;  %v225_v13 = vsel %vm169_vm1, %v164_v10, 0.0  ;;  %v165_v16 = vld [vmem:[%s464_s15 + $0xe8] sm:$0xff]  ;;  %v266_v26 = vmul.f32 %v159_v44, %v159_v44  ;;  %v267_v32 = vmul.f32 %v160_v50, %v160_v50 }
  0x2a   : > { %v192_v49 = vadd.f32 %v191_v37, %v190_v43  ;;  %v298_v37 = vsel %vm169_vm1, %v255_v24, 0.0  ;;  %v300_v43 = vsel %vm169_vm1, %v256_v30, 0.0  ;;  %v270_v44 = vmul.f32 %v163_v4, %v163_v4 }
  0x2b   : > { %v293_v28 = vadd.f32 %v292_v19, %v291_v22  ;;  %v227_v19 = vsel %vm169_vm1, %v165_v16, 0.0  ;;  %v166_v22 = vld [vmem:[%s464_s15 + $0xf0] sm:$0xff] }
  0x2c   : > { %v194_v55 = vadd.f32 %v193_v45, %v192_v49  ;;  %v302_v49 = vsel %vm169_vm1, %v257_v36, 0.0  ;;  %v268_v36 = vmul.f32 %v161_v56, %v161_v56  ;;  %v273_v56 = vmul.f32 %v166_v22, %v166_v22 }
  0x2d   : > { %v295_v34 = vadd.f32 %v294_v25, %v293_v28  ;;  %v229_v25 = vsel %vm169_vm1, %v166_v22, 0.0  ;;  %v167_v28 = vld [vmem:[%s464_s15 + $0xf8] sm:$0xff] }
  0x2e   : > { %v196_v61 = vadd.f32 %v195_v51, %v194_v55  ;;  %v304_v55 = vsel %vm169_vm1, %v258_v42, 0.0 }
  0x2f   : > { %v297_v40 = vadd.f32 %v296_v31, %v295_v34  ;;  %v231_v31 = vsel %vm169_vm1, %v167_v28, 0.0 }
  0x30   : > { %v198_v3 = vadd.f32 %v197_v57, %v196_v61  ;;  %v306_v61 = vsel %vm169_vm1, %v259_v48, 0.0  ;;  %v271_v48 = vmul.f32 %v164_v10, %v164_v10 }
  0x31   : > { %v299_v46 = vadd.f32 %v298_v37, %v297_v40  ;;  %v320_v37 = vsel %vm169_vm1, %v266_v26, 0.0  ;;  %v269_v40 = vmul.f32 %v162_v62, %v162_v62 }
  0x32   : > { %v200_v9 = vadd.f32 %v199_v63, %v198_v3  ;;  %v308_v3 = vsel %vm169_vm1, %v260_v54, 0.0 }
  0x33   : > { %v301_v52 = vadd.f32 %v300_v43, %v299_v46 }
  0x34   : > { %v202_v15 = vadd.f32 %v201_v5, %v200_v9  ;;  %v310_v9 = vsel %vm169_vm1, %v261_v60, 0.0  ;;  %v168_v60 = vld [vmem:[#allocation2] sm:$0x1] }
  0x35   : > { %v303_v58 = vadd.f32 %v302_v49, %v301_v52  ;;  %v326_v49 = vsel %vm169_vm1, %v269_v40, 0.0  ;;  %v272_v52 = vmul.f32 %v165_v16, %v165_v16 }
  0x36   : > { %v204_v21 = vadd.f32 %v203_v11, %v202_v15  ;;  %v312_v15 = vsel %vm169_vm1, %v262_v2, 0.0 }
  0x37   : > { %v305_v0 = vadd.f32 %v304_v55, %v303_v58  ;;  %v332_v62 = vsel %vm169_vm1, %v272_v52, 0.0 }
  0x38   : > { %v206_v27 = vadd.f32 %v205_v17, %v204_v21  ;;  %v314_v21 = vsel %vm169_vm1, %v263_v8, 0.0 }
  0x39   : > { %v307_v6 = vadd.f32 %v306_v61, %v305_v0  ;;  %v274_v61 = vmul.f32 %v167_v28, %v167_v28 }
  0x3a   : > { %v208_v33 = vadd.f32 %v207_v23, %v206_v27  ;;  %v316_v27 = vsel %vm169_vm1, %v264_v14, 0.0 }
  0x3b   : > { %v309_v12 = vadd.f32 %v308_v3, %v307_v6  ;;  %v336_v4 = vsel %vm169_vm1, %v274_v61, 0.0 }
  0x3c   : > { %v210_v39 = vadd.f32 %v209_v29, %v208_v33  ;;  %v318_v33 = vsel %vm169_vm1, %v265_v20, 0.0 }
  0x3d   : > { %v311_v18 = vadd.f32 %v310_v9, %v309_v12  ;;  %v242_v12 = vld [vmem:[#allocation3] sm:$0x1] }
  0x3e   : > { %v212_v45 = vadd.f32 %v211_v35, %v210_v39 }
  0x3f   : > { %v313_v24 = vadd.f32 %v312_v15, %v311_v18 }
  0x40   : > { %v214_v51 = vadd.f32 %v213_v41, %v212_v45  ;;  %v322_v41 = vsel %vm169_vm1, %v267_v32, 0.0  ;;  %v324_v45 = vsel %vm169_vm1, %v268_v36, 0.0 }
  0x41   : > { %v315_v30 = vadd.f32 %v314_v21, %v313_v24 }
  0x42   : > { %v216_v57 = vadd.f32 %v215_v47, %v214_v51 }
  0x43   : > { %v317_v35 = vadd.f32 %v316_v27, %v315_v30 }
  0x44   : > { %v218_v63 = vadd.f32 %v217_v53, %v216_v57  ;;  %v328_v53 = vsel %vm169_vm1, %v270_v44, 0.0  ;;  %v330_v57 = vsel %vm169_vm1, %v271_v48, 0.0 }
  0x45   : > { %v319_v39 = vadd.f32 %v318_v33, %v317_v35 }
  0x46   : > { %v220_v5 = vadd.f32 %v219_v59, %v218_v63 }
  0x47   : > { %v321_v43 = vadd.f32 %v320_v37, %v319_v39 }
  0x48   : > { %v222_v11 = vadd.f32 %v221_v1, %v220_v5  ;;  %v334_v1 = vsel %vm169_vm1, %v273_v56, 0.0 }
  0x49   : > { %v323_v47 = vadd.f32 %v322_v41, %v321_v43 }
  0x4a   : > { %v224_v17 = vadd.f32 %v223_v7, %v222_v11 }
  0x4b   : > { %v325_v51 = vadd.f32 %v324_v45, %v323_v47 }
  0x4c   : > { %v226_v23 = vadd.f32 %v225_v13, %v224_v17 }
  0x4d   : > { %v327_v55 = vadd.f32 %v326_v49, %v325_v51 }
  0x4e   : > { %v228_v29 = vadd.f32 %v227_v19, %v226_v23 }
  0x4f   : > { %v329_v59 = vadd.f32 %v328_v53, %v327_v55 }
  0x50   : > { %v230_v34 = vadd.f32 %v229_v25, %v228_v29 }
  0x51   : > { %v331_v0 = vadd.f32 %v330_v57, %v329_v59 }
  0x52   : > { %v232_v38 = vadd.f32 %v231_v31, %v230_v34 }
  0x53   : > { %v333_v3 = vadd.f32 %v332_v62, %v331_v0 }
  0x54   : > { %v233_v42 = vrot.slane %v232_v38, 4 }
  0x55   : > { %v335_v5 = vadd.f32 %v334_v1, %v333_v3 }
  0x56   : > { %v234_v46 = vadd.f32 %v233_v42, %v232_v38 }
  0x57   : > { %v337_v6 = vadd.f32 %v336_v4, %v335_v5 }
  0x58   : > { %v235_v50 = vrot.slane %v234_v46, 2 }
  0x59   : > { %v338_v7 = vrot.slane %v337_v6, 4 }
  0x5a   : > { %v236_v54 = vadd.f32 %v235_v50, %v234_v46 }
  0x5b   : > { %v339_v8 = vadd.f32 %v338_v7, %v337_v6 }
  0x5c   : > { %v237_v58 = vrot.slane %v236_v54, 1 }
  0x5d   : > { %v340_v9 = vrot.slane %v339_v8, 2 }
  0x5e   : > { %v238_v63 = vadd.f32 %v237_v58, %v236_v54 }
  0x5f   : > { %v341_v10 = vadd.f32 %v340_v9, %v339_v8 }
  0x60   : > { %v239_v2 = vadd.f32 %v238_v63, %v168_v60 }
  0x61   : > { %v342_v11 = vrot.slane %v341_v10, 1  ;;  %349 = sbr.rel (%p410_p5) target bundleno = 146 (0x92), region = 32 }
  0x62   : > { %241 = vst.msk [vmem:[#allocation2] sm:$0x1] %vm240_vm2, %v239_v2 }
  0x63   : > { %v343_v13 = vadd.f32 %v342_v11, %v341_v10 }
  0x65   : > { %v344_v14 = vadd.f32 %v343_v13, %v242_v12 }
  0x67   : > { %345 = vst.msk [vmem:[#allocation3] sm:$0x1] %vm240_vm2, %v344_v14 }
  0x69   : > { %v350_v15 = vld [vmem:[#allocation2] sm:$0x1] }
  0x6a   : > { %v351_v17 = vmul.f32 0.001953125, %v350_v15 }
  0x6c   : > { %v354_v19 = vmul.f32 %v351_v17, %v351_v17  ;;  %357 = vst.msk [vmem:[%s578_s1] sm:$0x1] %vm240_vm2, %v351_v17 }
  0x6e   : > { %v352_v16 = vld [vmem:[#allocation3] sm:$0x1] }
  0x6f   : > { %v353_v18 = vmul.f32 0.001953125, %v352_v16 }
  0x71   : > { %v355_v20 = vsub.f32 %v353_v18, %v354_v19 }
  0x73   : > { %v356_v21 = vmax.f32 %v355_v20, 0.0 }
  0x75   : > { %422 = vrsqrt.f32 %v356_v21  ;;  %vm360_vm3 = vcmp.eq.f32.partialorder %v356_v21, inf  ;;  %v363_v23 = vand.u32 2147483648, %v356_v21  ;;  %vm362_vm4 = vcmp.eq.f32.partialorder %v356_v21, 0.0 }
  0x7f   : > { %v423_v22 = vpop.eup %422 }
  0x80   : > { %v359_v24 = vmul.f32 %v423_v22, %v356_v21 }
  0x82   : > { %v361_v25 = vsel %vm360_vm3, %v356_v21, %v359_v24 }
  0x83   : > { %v364_v26 = vsel %vm362_vm4, %v363_v23, %v361_v25 }
  0x84   : > { %v365_v27 = vadd.f32 1e-06, %v364_v26 }
  0x86   : > { %424 = vrcp.f32 %v365_v27 }
  0x90   : > { %v425_v28 = vpop.eup %424 }
  0x91   : > { %368 = vst.msk [vmem:[%s579_s2] sm:$0x1] %vm240_vm2, %v425_v28 }
  0x92 PF: > { %s13_s9 = sadd.s32 1, %s432_s9  }
  0x93   : > { %p10_p6 = scmp.ge.s32.totalorder %s13_s9, 4  }
  0x95   :  { %12 = sbr.rel (!%p10_p6) target bundleno = 1 (0x1), region = 66 }

// kernel: flow_step_forward.7
= control target key start
LH: loop header
LB: loop body
LE: loop exit
PB: predicated region body
PF: predicated region fallthrough
CT: control target
= control target key end

     0   :  { %s1143_s18 = smov 0   ;;  %s1475_s0 = inlined_call_operand.vmem [shape: f32[512,4], index: 0, kind: input, shape index: {}]   ;;  %s1476_s1 = inlined_call_operand.vmem [shape: f32[1,4], index: 1, kind: input, shape index: {}]   ;;  %s1477_s2 = inlined_call_operand.vmem [shape: f32[1,4], index: 2, kind: input, shape index: {}]   ;;  %s1478_s3 = inlined_call_operand.vmem [shape: f32[4,4], index: 3, kind: input, shape index: {}]   ;;  %s1479_s4 = inlined_call_operand.vmem [shape: f32[512,2], index: 4, kind: output, shape index: {0}]   ;;  %s1480_s5 = inlined_call_operand.vmem [shape: f32[512,2], index: 5, kind: output, shape index: {1}]  }
   0x1 LB: > { %s962_s19 = sadd.s32 4294967295, %s1110_s18   ;;  %p966_p0 = scmp.ge.s32.totalorder %s1110_s18, 1  ;;  %s1110_s18 = sphi %s1143_s18, %s16_s18  }
   0x2   : > { %p191_p1 = scmp.lt.s32.totalorder %s1110_s18, 3 }
   0x4   : > { %p192_p2 = pnand %p966_p0, %p191_p1 }
   0x5   : > { %v352_v0 = vld [vmem:[%s1478_s3] sm:$0xf] (!%p192_p2)  ;;  %vm450_vm0 = vcmask (!%p192_p2), 1043456   ;;  %s967_s22 = sshll.u32 (!%p192_p2), %s962_s19, 5  ;;  %vm353_vm1 = vcmask (!%p192_p2), 31744   ;;  %vm679_vm2 = vcmask (!%p192_p2), 15360  }
   0x6   : > { %195 = sbr.rel (%p192_p2) target bundleno = 411 (0x19b), region = 36  ;;  %1043 = vmatprep.subr.msk.mxu0 (!%p192_p2), %vm450_vm0, %v352_v0  ;;  %1093 = vmatprep.subr.msk.mxu1 (!%p192_p2), %vm450_vm0, %v352_v0  ;;  %p225_p3 = scmp.lt.s32.totalorder (!%p192_p2), %s967_s22, 63  ;;  %v1159_v1 = vld [vmem:[%s1476_s1] ss:$0 sm:$0xff] (!%p192_p2) }
   0x7   : > { %1044 = vmatpush3.msk.msra.mxu0 (!%p192_p2), %vm450_vm0, %v352_v0  ;;  %1094 = vmatpush3.msk.msra.mxu1 (!%p192_p2), %vm450_vm0, %v352_v0  ;;  %v1170_v2 = vld [vmem:[%s1477_s2] ss:$0 sm:$0xff] (!%p192_p2)  ;;  %s1112_s9 = smov (!%p192_p2), 126  }
   0xd   : > { %s1482_s22 = smov (!%p225_p3, %s967_s22), 63 }
   0xe   : > { %s1154_s23 = sshll.u32 %s1482_s22, 3 }
   0xf   : > { %s1165_s28 = scalar_lea.vmem %s1475_s0, %s1154_s23  ;;  %s1304_s8 = scalar_lea.vmem %s1479_s4, %s1154_s23 }
  0x10   : > { %v242_v3 = vld [vmem:[%s1165_s28] sm:$0xff]  ;;  %v243_v5 = vld [vmem:[%s1165_s28 + $0x8] sm:$0xff]  ;;  %v244_v10 = vld [vmem:[%s1165_s28 + $0x10] sm:$0xff]  ;;  %s1406_s12 = scalar_lea.vmem %s1480_s5, %s1154_s23 }
  0x11   : > { %v258_v4 = vld [vmem:[%s1165_s28 + $0x80] sm:$0xff]  ;;  %v281_v6 = vsub.f32 %v242_v3, %v1159_v1  ;;  %v282_v8 = vsub.f32 %v243_v5, %v1159_v1  ;;  %v259_v9 = vld [vmem:[%s1165_s28 + $0x88] sm:$0xff]  ;;  %v245_v11 = vld [vmem:[%s1165_s28 + $0x18] sm:$0xff]  ;;  %v283_v13 = vsub.f32 %v244_v10, %v1159_v1 }
  0x12   : > { %v297_v7 = vsub.f32 %v258_v4, %v1159_v1  ;;  %v298_v12 = vsub.f32 %v259_v9, %v1159_v1  ;;  %v284_v14 = vsub.f32 %v245_v11, %v1159_v1  ;;  %v260_v15 = vld [vmem:[%s1165_s28 + $0x90] sm:$0xff]  ;;  %v261_v16 = vld [vmem:[%s1165_s28 + $0x98] sm:$0xff]  ;;  %v246_v17 = vld [vmem:[%s1165_s28 + $0x20] sm:$0xff] }
  0x13   : > { %v320_v18 = vmul.f32 %v1170_v2, %v281_v6  ;;  %v321_v20 = vmul.f32 %v1170_v2, %v282_v8  ;;  %v299_v21 = vsub.f32 %v260_v15, %v1159_v1  ;;  %v247_v22 = vld [vmem:[%s1165_s28 + $0x28] sm:$0xff]  ;;  %v262_v23 = vld [vmem:[%s1165_s28 + $0xa0] sm:$0xff]  ;;  %v322_v26 = vmul.f32 %v1170_v2, %v283_v13  ;;  %v248_v29 = vld [vmem:[%s1165_s28 + $0x30] sm:$0xff] }
  0x14   : > { %v336_v19 = vmul.f32 %v1170_v2, %v297_v7  ;;  %v263_v24 = vld [vmem:[%s1165_s28 + $0xa8] sm:$0xff]  ;;  %v337_v25 = vmul.f32 %v1170_v2, %v298_v12  ;;  %v323_v27 = vmul.f32 %v1170_v2, %v284_v14  ;;  %v300_v28 = vsub.f32 %v261_v16, %v1159_v1  ;;  %v264_v33 = vld [vmem:[%s1165_s28 + $0xb0] sm:$0xff]  ;;  %v249_v37 = vld [vmem:[%s1165_s28 + $0x38] sm:$0xff] }
  0x15   : > { %1045 = vmatprep.mubr.msk.f32.mxu0 %vm353_vm1, %v320_v18  ;;  %v338_v30 = vmul.f32 %v1170_v2, %v299_v21  ;;  %v285_v31 = vsub.f32 %v246_v17, %v1159_v1  ;;  %v286_v32 = vsub.f32 %v247_v22, %v1159_v1  ;;  %v301_v35 = vsub.f32 %v262_v23, %v1159_v1  ;;  %v265_v40 = vld [vmem:[%s1165_s28 + $0xb8] sm:$0xff]  ;;  %v250_v41 = vld [vmem:[%s1165_s28 + $0x40] sm:$0xff]  ;;  %v251_v50 = vld [vmem:[%s1165_s28 + $0x48] sm:$0xff] }
  0x16   : > { %1069 = vmatprep.mubr.msk.f32.mxu1 %vm353_vm1, %v336_v19  ;;  %1046 = vmatmul.mubr.msk.f32.vlgmr.msra.gmra.mrb[0].mxu0 %vm353_vm1, %v321_v20  ;;  %v339_v34 = vmul.f32 %v1170_v2, %v300_v28  ;;  %v302_v36 = vsub.f32 %v263_v24, %v1159_v1  ;;  %v287_v39 = vsub.f32 %v248_v29, %v1159_v1  ;;  %v266_v44 = vld [vmem:[%s1165_s28 + $0xc0] sm:$0xff]  ;;  %v267_v54 = vld [vmem:[%s1165_s28 + $0xc8] sm:$0xff]  ;;  %v252_v55 = vld [vmem:[%s1165_s28 + $0x50] sm:$0xff] }
  0x17   : > { %1070 = vmatmul.mubr.msk.f32.vlgmr.msra.gmra.mrb[0].mxu1 %vm353_vm1, %v337_v25  ;;  %1048 = vmatprep.mubr.msk.f32.mxu0 %vm353_vm1, %v322_v26  ;;  %v324_v38 = vmul.f32 %v1170_v2, %v285_v31  ;;  %v340_v42 = vmul.f32 %v1170_v2, %v301_v35  ;;  %v303_v43 = vsub.f32 %v264_v33, %v1159_v1  ;;  %v268_v56 = vld [vmem:[%s1165_s28 + $0xd0] sm:$0xff]  ;;  %v253_v62 = vld [vmem:[%s1165_s28 + $0x58] sm:$0xff]  ;;  %v254_v5 = vld [vmem:[%s1165_s28 + $0x60] sm:$0xff] }
  0x18   : > { %1072 = vmatprep.mubr.msk.f32.mxu1 %vm353_vm1, %v338_v30  ;;  %v325_v45 = vmul.f32 %v1170_v2, %v286_v32  ;;  %v288_v46 = vsub.f32 %v249_v37, %v1159_v1  ;;  %v341_v47 = vmul.f32 %v1170_v2, %v302_v36  ;;  %v304_v48 = vsub.f32 %v265_v40, %v1159_v1  ;;  %v269_v4 = vld [vmem:[%s1165_s28 + $0xd8] sm:$0xff]  ;;  %v270_v6 = vld [vmem:[%s1165_s28 + $0xe0] sm:$0xff]  ;;  %v255_v12 = vld [vmem:[%s1165_s28 + $0x68] sm:$0xff] }
  0x19   : > { %v289_v49 = vsub.f32 %v250_v41, %v1159_v1  ;;  %v326_v51 = vmul.f32 %v1170_v2, %v287_v39  ;;  %v342_v52 = vmul.f32 %v1170_v2, %v303_v43  ;;  %v305_v53 = vsub.f32 %v266_v44, %v1159_v1  ;;  %v271_v16 = vld [vmem:[%s1165_s28 + $0xe8] sm:$0xff]  ;;  %v256_v17 = vld [vmem:[%s1165_s28 + $0x70] sm:$0xff]  ;;  %v257_v26 = vld [vmem:[%s1165_s28 + $0x78] sm:$0xff] }
  0x1a   : > { %1049 = vmatmul.mubr.msk.f32.gmra.mrb[2].mxu0 %vm353_vm1, %v323_v27  ;;  %v327_v57 = vmul.f32 %v1170_v2, %v288_v46  ;;  %v290_v58 = vsub.f32 %v251_v50, %v1159_v1  ;;  %v343_v59 = vmul.f32 %v1170_v2, %v304_v48  ;;  %v306_v61 = vsub.f32 %v267_v54, %v1159_v1  ;;  %v272_v18 = vld [vmem:[%s1165_s28 + $0xf0] sm:$0xff]  ;;  %v273_v28 = vld [vmem:[%s1165_s28 + $0xf8] sm:$0xff] }
  0x1b   : > { %1073 = vmatmul.mubr.msk.f32.gmra.mrb[2].mxu1 %vm353_vm1, %v339_v34  ;;  %1051 = vmatprep.mubr.msk.f32.mxu0 %vm353_vm1, %v324_v38  ;;  %v328_v60 = vmul.f32 %v1170_v2, %v289_v49  ;;  %v344_v63 = vmul.f32 %v1170_v2, %v305_v53  ;;  %v291_v0 = vsub.f32 %v252_v55, %v1159_v1 }
  0x1c   : > { %1075 = vmatprep.mubr.msk.f32.mxu1 %vm353_vm1, %v340_v42  ;;  %v307_v3 = vsub.f32 %v268_v56, %v1159_v1  ;;  %v329_v7 = vmul.f32 %v1170_v2, %v290_v58  ;;  %v292_v8 = vsub.f32 %v253_v62, %v1159_v1  ;;  %v345_v9 = vmul.f32 %v1170_v2, %v306_v61 }
  0x1d   : > { %v308_v10 = vsub.f32 %v269_v4, %v1159_v1  ;;  %v293_v11 = vsub.f32 %v254_v5, %v1159_v1  ;;  %v330_v13 = vmul.f32 %v1170_v2, %v291_v0  ;;  %v309_v15 = vsub.f32 %v270_v6, %v1159_v1 }
  0x1e   : > { %1052 = vmatmul.mubr.msk.f32.gmra.mrb[4].mxu0 %vm353_vm1, %v325_v45  ;;  %v346_v14 = vmul.f32 %v1170_v2, %v307_v3  ;;  %v331_v19 = vmul.f32 %v1170_v2, %v292_v8  ;;  %v294_v20 = vsub.f32 %v255_v12, %v1159_v1  ;;  %v310_v23 = vsub.f32 %v271_v16, %v1159_v1 }
  0x1f   : > { %1076 = vmatmul.mubr.msk.f32.gmra.mrb[4].mxu1 %vm353_vm1, %v341_v47  ;;  %1054 = vmatprep.mubr.msk.f32.mxu0 %vm353_vm1, %v326_v51  ;;  %v347_v21 = vmul.f32 %v1170_v2, %v308_v10  ;;  %v332_v22 = vmul.f32 %v1170_v2, %v293_v11  ;;  %v348_v24 = vmul.f32 %v1170_v2, %v309_v15 }
  0x20   : > { %1078 = vmatprep.mubr.msk.f32.mxu1 %vm353_vm1, %v342_v52  ;;  %v295_v25 = vsub.f32 %v256_v17, %v1159_v1  ;;  %v311_v27 = vsub.f32 %v272_v18, %v1159_v1  ;;  %v333_v29 = vmul.f32 %v1170_v2, %v294_v20  ;;  %v349_v30 = vmul.f32 %v1170_v2, %v310_v23 }
  0x21   : > { %v296_v31 = vsub.f32 %v257_v26, %v1159_v1  ;;  %v312_v32 = vsub.f32 %v273_v28, %v1159_v1 }
  0x22   : > { %1055 = vmatmul.mubr.msk.f32.gmra.mrb[6].mxu0 %vm353_vm1, %v327_v57  ;;  %v334_v33 = vmul.f32 %v1170_v2, %v295_v25  ;;  %v350_v34 = vmul.f32 %v1170_v2, %v311_v27 }
  0x23   : > { %1079 = vmatmul.mubr.msk.f32.gmra.mrb[6].mxu1 %vm353_vm1, %v343_v59  ;;  %1057 = vmatprep.mubr.msk.f32.mxu0 %vm353_vm1, %v328_v60  ;;  %v335_v35 = vmul.f32 %v1170_v2, %v296_v31  ;;  %v351_v36 = vmul.f32 %v1170_v2, %v312_v32 }
  0x24   : > { %1081 = vmatprep.mubr.msk.f32.mxu1 %vm353_vm1, %v344_v63 }
  0x26   : > { %1058 = vmatmul.mubr.msk.f32.gmra.mrb[8].mxu0 %vm353_vm1, %v329_v7 }
  0x27   : > { %1082 = vmatmul.mubr.msk.f32.gmra.mrb[8].mxu1 %vm353_vm1, %v345_v9  ;;  %1060 = vmatprep.mubr.msk.f32.mxu0 %vm353_vm1, %v330_v13 }
  0x28   : > { %1084 = vmatprep.mubr.msk.f32.mxu1 %vm353_vm1, %v346_v14 }
  0x2a   : > { %1061 = vmatmul.mubr.msk.f32.gmra.mrb[10].mxu0 %vm353_vm1, %v331_v19 }
  0x2b   : > { %1085 = vmatmul.mubr.msk.f32.gmra.mrb[10].mxu1 %vm353_vm1, %v347_v21  ;;  %1063 = vmatprep.mubr.msk.f32.mxu0 %vm353_vm1, %v332_v22 }
  0x2c   : > { %1087 = vmatprep.mubr.msk.f32.mxu1 %vm353_vm1, %v348_v24 }
  0x2e   : > { %1064 = vmatmul.mubr.msk.f32.gmra.mrb[12].mxu0 %vm353_vm1, %v333_v29 }
  0x2f   : > { %1088 = vmatmul.mubr.msk.f32.gmra.mrb[12].mxu1 %vm353_vm1, %v349_v30  ;;  %1066 = vmatprep.mubr.msk.f32.mxu0 %vm353_vm1, %v334_v33 }
  0x30   : > { %1090 = vmatprep.mubr.msk.f32.mxu1 %vm353_vm1, %v350_v34 }
  0x32   : > { %1067 = vmatmul.mubr.msk.f32.gmra.mrb[14].mxu0 %vm353_vm1, %v335_v35 }
  0x33   : > { %1091 = vmatmul.mubr.msk.f32.gmra.mrb[14].mxu1 %vm353_vm1, %v351_v36 }
  0xe9   : > { %v1047_v1 = vpop.f32.mrb[0].mxu0 }
  0xea   : > { %v1071_v2 = vpop.f32.mrb[0].mxu1  ;;  %681 = vst.msk [vmem:[%s1304_s8 + $0x8] sm:$0xff] %vm679_vm2, %v1047_v1  ;;  %746 = vrot.lane.b32.xlu0 %v1047_v1, %s1112_s9  ;;  %v520_v38 = vpop.f32.mrb[1].mxu0 }
  0xeb   : > { %697 = vst.msk [vmem:[%s1304_s8 + $0x88] sm:$0xff] %vm679_vm2, %v1071_v2  ;;  %778 = vrot.lane.b32.xlu1 %v1071_v2, %s1112_s9  ;;  %v600_v37 = vpop.f32.mrb[1].mxu1  ;;  %680 = vst.msk [vmem:[%s1304_s8] sm:$0xff] %vm679_vm2, %v520_v38 }
  0xec   : > { %696 = vst.msk [vmem:[%s1304_s8 + $0x80] sm:$0xff] %vm679_vm2, %v600_v37 }
  0xed   : > { %v1050_v39 = vpop.f32.mrb[2].mxu0 }
  0xee   : > { %v1074_v40 = vpop.f32.mrb[2].mxu1  ;;  %683 = vst.msk [vmem:[%s1304_s8 + $0x18] sm:$0xff] %vm679_vm2, %v1050_v39  ;;  %744 = vrot.lane.b32.xlu0 %v520_v38, %s1112_s9  ;;  %v530_v41 = vpop.f32.mrb[3].mxu0 }
  0xef   : > { %750 = vrot.lane.b32.xlu1 %v1050_v39, %s1112_s9  ;;  %699 = vst.msk [vmem:[%s1304_s8 + $0x98] sm:$0xff] %vm679_vm2, %v1074_v40  ;;  %v610_v42 = vpop.f32.mrb[3].mxu1  ;;  %682 = vst.msk [vmem:[%s1304_s8 + $0x10] sm:$0xff] %vm679_vm2, %v530_v41 }
  0xf0   : > { %698 = vst.msk [vmem:[%s1304_s8 + $0x90] sm:$0xff] %vm679_vm2, %v610_v42 }
  0xf1   : > { %v1053_v43 = vpop.f32.mrb[4].mxu0 }
  0xf2   : > { %v1077_v44 = vpop.f32.mrb[4].mxu1  ;;  %776 = vrot.lane.b32.xlu0 %v600_v37, %s1112_s9  ;;  %685 = vst.msk [vmem:[%s1304_s8 + $0x28] sm:$0xff] %vm679_vm2, %v1053_v43  ;;  %v540_v45 = vpop.f32.mrb[5].mxu0 }
  0xf3   : > { %782 = vrot.lane.b32.xlu1 %v1074_v40, %s1112_s9  ;;  %701 = vst.msk [vmem:[%s1304_s8 + $0xa8] sm:$0xff] %vm679_vm2, %v1077_v44  ;;  %v620_v46 = vpop.f32.mrb[5].mxu1  ;;  %684 = vst.msk [vmem:[%s1304_s8 + $0x20] sm:$0xff] %vm679_vm2, %v540_v45 }
  0xf4   : > { %700 = vst.msk [vmem:[%s1304_s8 + $0xa0] sm:$0xff] %vm679_vm2, %v620_v46 }
  0xf5   : > { %v1056_v47 = vpop.f32.mrb[6].mxu0 }
  0xf6   : > { %v1080_v48 = vpop.f32.mrb[6].mxu1  ;;  %780 = vrot.lane.b32.xlu0 %v610_v42, %s1112_s9  ;;  %687 = vst.msk [vmem:[%s1304_s8 + $0x38] sm:$0xff] %vm679_vm2, %v1056_v47  ;;  %v550_v49 = vpop.f32.mrb[7].mxu0 }
  0xf7   : > { %748 = vrot.lane.b32.xlu1 %v530_v41, %s1112_s9  ;;  %703 = vst.msk [vmem:[%s1304_s8 + $0xb8] sm:$0xff] %vm679_vm2, %v1080_v48  ;;  %v630_v50 = vpop.f32.mrb[7].mxu1  ;;  %686 = vst.msk [vmem:[%s1304_s8 + $0x30] sm:$0xff] %vm679_vm2, %v550_v49 }
  0xf8   : > { %702 = vst.msk [vmem:[%s1304_s8 + $0xb0] sm:$0xff] %vm679_vm2, %v630_v50 }
  0xf9   : > { %v1059_v51 = vpop.f32.mrb[8].mxu0 }
  0xfa   : > { %v1083_v52 = vpop.f32.mrb[8].mxu1  ;;  %752 = vrot.lane.b32.xlu0 %v540_v45, %s1112_s9  ;;  %689 = vst.msk [vmem:[%s1304_s8 + $0x48] sm:$0xff] %vm679_vm2, %v1059_v51  ;;  %v560_v53 = vpop.f32.mrb[9].mxu0 }
  0xfb   : > { %754 = vrot.lane.b32.xlu1 %v1053_v43, %s1112_s9  ;;  %705 = vst.msk [vmem:[%s1304_s8 + $0xc8] sm:$0xff] %vm679_vm2, %v1083_v52  ;;  %v640_v54 = vpop.f32.mrb[9].mxu1  ;;  %688 = vst.msk [vmem:[%s1304_s8 + $0x40] sm:$0xff] %vm679_vm2, %v560_v53 }
  0xfc   : > { %704 = vst.msk [vmem:[%s1304_s8 + $0xc0] sm:$0xff] %vm679_vm2, %v640_v54 }
  0xfd   : > { %v1062_v55 = vpop.f32.mrb[10].mxu0 }
  0xfe   : > { %v1086_v56 = vpop.f32.mrb[10].mxu1  ;;  %784 = vrot.lane.b32.xlu0 %v620_v46, %s1112_s9  ;;  %691 = vst.msk [vmem:[%s1304_s8 + $0x58] sm:$0xff] %vm679_vm2, %v1062_v55  ;;  %v570_v57 = vpop.f32.mrb[11].mxu0 }
  0xff   : > { %786 = vrot.lane.b32.xlu1 %v1077_v44, %s1112_s9  ;;  %707 = vst.msk [vmem:[%s1304_s8 + $0xd8] sm:$0xff] %vm679_vm2, %v1086_v56  ;;  %v650_v58 = vpop.f32.mrb[11].mxu1  ;;  %690 = vst.msk [vmem:[%s1304_s8 + $0x50] sm:$0xff] %vm679_vm2, %v570_v57 }
 0x100   : > { %706 = vst.msk [vmem:[%s1304_s8 + $0xd0] sm:$0xff] %vm679_vm2, %v650_v58 }
 0x101   : > { %v1065_v59 = vpop.f32.mrb[12].mxu0 }
 0x102   : > { %v1089_v60 = vpop.f32.mrb[12].mxu1  ;;  %756 = vrot.lane.b32.xlu0 %v550_v49, %s1112_s9  ;;  %693 = vst.msk [vmem:[%s1304_s8 + $0x68] sm:$0xff] %vm679_vm2, %v1065_v59  ;;  %v580_v61 = vpop.f32.mrb[13].mxu0 }
 0x103   : > { %758 = vrot.lane.b32.xlu1 %v1056_v47, %s1112_s9  ;;  %709 = vst.msk [vmem:[%s1304_s8 + $0xe8] sm:$0xff] %vm679_vm2, %v1089_v60  ;;  %v660_v62 = vpop.f32.mrb[13].mxu1  ;;  %692 = vst.msk [vmem:[%s1304_s8 + $0x60] sm:$0xff] %vm679_vm2, %v580_v61 }
 0x104   : > { %708 = vst.msk [vmem:[%s1304_s8 + $0xe0] sm:$0xff] %vm679_vm2, %v660_v62 }
 0x105   : > { %v1068_v63 = vpop.f32.mrb[14].mxu0 }
 0x106   : > { %v1092_v0 = vpop.f32.mrb[14].mxu1  ;;  %788 = vrot.lane.b32.xlu0 %v630_v50, %s1112_s9  ;;  %695 = vst.msk [vmem:[%s1304_s8 + $0x78] sm:$0xff] %vm679_vm2, %v1068_v63  ;;  %v590_v3 = vpop.f32.mrb[15].mxu0 }
 0x107   : > { %790 = vrot.lane.b32.xlu1 %v1080_v48, %s1112_s9  ;;  %711 = vst.msk [vmem:[%s1304_s8 + $0xf8] sm:$0xff] %vm679_vm2, %v1092_v0  ;;  %v670_v4 = vpop.f32.mrb[15].mxu1  ;;  %694 = vst.msk [vmem:[%s1304_s8 + $0x70] sm:$0xff] %vm679_vm2, %v590_v3 }
 0x108   : > { %710 = vst.msk [vmem:[%s1304_s8 + $0xf0] sm:$0xff] %vm679_vm2, %v670_v4 }
 0x10a   : > { %760 = vrot.lane.b32.xlu0 %v560_v53, %s1112_s9 }
 0x10b   : > { %762 = vrot.lane.b32.xlu1 %v1059_v51, %s1112_s9 }
 0x10e   : > { %792 = vrot.lane.b32.xlu0 %v640_v54, %s1112_s9 }
 0x10f   : > { %794 = vrot.lane.b32.xlu1 %v1083_v52, %s1112_s9 }
 0x112   : > { %764 = vrot.lane.b32.xlu0 %v570_v57, %s1112_s9 }
 0x113   : > { %766 = vrot.lane.b32.xlu1 %v1062_v55, %s1112_s9 }
 0x116   : > { %796 = vrot.lane.b32.xlu0 %v650_v58, %s1112_s9 }
 0x117   : > { %798 = vrot.lane.b32.xlu1 %v1086_v56, %s1112_s9 }
 0x11a   : > { %768 = vrot.lane.b32.xlu0 %v580_v61, %s1112_s9 }
 0x11b   : > { %770 = vrot.lane.b32.xlu1 %v1065_v59, %s1112_s9 }
 0x11e   : > { %800 = vrot.lane.b32.xlu0 %v660_v62, %s1112_s9 }
 0x11f   : > { %802 = vrot.lane.b32.xlu1 %v1089_v60, %s1112_s9 }
 0x122   : > { %772 = vrot.lane.b32.xlu0 %v590_v3, %s1112_s9 }
 0x123   : > { %774 = vrot.lane.b32.xlu1 %v1068_v63, %s1112_s9 }
 0x126   : > { %804 = vrot.lane.b32.xlu0 %v670_v4, %s1112_s9 }
 0x127   : > { %806 = vrot.lane.b32.xlu1 %v1092_v0, %s1112_s9 }
 0x15c   : > { %v747_v6 = vpop.permute.xlu0 %746 }
 0x15d   : > { %v779_v5 = vpop.permute.xlu1 %778  ;;  %841 = vst.msk [vmem:[%s1406_s12 + $0x8] sm:$0xff] %vm679_vm2, %v747_v6 }
 0x15e   : > { %857 = vst.msk [vmem:[%s1406_s12 + $0x88] sm:$0xff] %vm679_vm2, %v779_v5 }
 0x160   : > { %v745_v7 = vpop.permute.xlu0 %744 }
 0x161   : > { %v751_v8 = vpop.permute.xlu1 %750  ;;  %840 = vst.msk [vmem:[%s1406_s12] sm:$0xff] %vm679_vm2, %v745_v7 }
 0x162   : > { %843 = vst.msk [vmem:[%s1406_s12 + $0x18] sm:$0xff] %vm679_vm2, %v751_v8 }
 0x164   : > { %v777_v9 = vpop.permute.xlu0 %776 }
 0x165   : > { %v783_v10 = vpop.permute.xlu1 %782  ;;  %856 = vst.msk [vmem:[%s1406_s12 + $0x80] sm:$0xff] %vm679_vm2, %v777_v9 }
 0x166   : > { %859 = vst.msk [vmem:[%s1406_s12 + $0x98] sm:$0xff] %vm679_vm2, %v783_v10 }
 0x168   : > { %v781_v11 = vpop.permute.xlu0 %780 }
 0x169   : > { %v749_v12 = vpop.permute.xlu1 %748  ;;  %858 = vst.msk [vmem:[%s1406_s12 + $0x90] sm:$0xff] %vm679_vm2, %v781_v11 }
 0x16a   : > { %842 = vst.msk [vmem:[%s1406_s12 + $0x10] sm:$0xff] %vm679_vm2, %v749_v12 }
 0x16c   : > { %v753_v14 = vpop.permute.xlu0 %752 }
 0x16d   : > { %v755_v13 = vpop.permute.xlu1 %754  ;;  %844 = vst.msk [vmem:[%s1406_s12 + $0x20] sm:$0xff] %vm679_vm2, %v753_v14 }
 0x16e   : > { %845 = vst.msk [vmem:[%s1406_s12 + $0x28] sm:$0xff] %vm679_vm2, %v755_v13 }
 0x170   : > { %v785_v16 = vpop.permute.xlu0 %784 }
 0x171   : > { %v787_v15 = vpop.permute.xlu1 %786  ;;  %860 = vst.msk [vmem:[%s1406_s12 + $0xa0] sm:$0xff] %vm679_vm2, %v785_v16 }
 0x172   : > { %861 = vst.msk [vmem:[%s1406_s12 + $0xa8] sm:$0xff] %vm679_vm2, %v787_v15 }
 0x174   : > { %v757_v18 = vpop.permute.xlu0 %756 }
 0x175   : > { %v759_v17 = vpop.permute.xlu1 %758  ;;  %846 = vst.msk [vmem:[%s1406_s12 + $0x30] sm:$0xff] %vm679_vm2, %v757_v18 }
 0x176   : > { %847 = vst.msk [vmem:[%s1406_s12 + $0x38] sm:$0xff] %vm679_vm2, %v759_v17 }
 0x178   : > { %v789_v20 = vpop.permute.xlu0 %788 }
 0x179   : > { %v791_v19 = vpop.permute.xlu1 %790  ;;  %862 = vst.msk [vmem:[%s1406_s12 + $0xb0] sm:$0xff] %vm679_vm2, %v789_v20 }
 0x17a   : > { %863 = vst.msk [vmem:[%s1406_s12 + $0xb8] sm:$0xff] %vm679_vm2, %v791_v19 }
 0x17c   : > { %v761_v22 = vpop.permute.xlu0 %760 }
 0x17d   : > { %v763_v21 = vpop.permute.xlu1 %762  ;;  %848 = vst.msk [vmem:[%s1406_s12 + $0x40] sm:$0xff] %vm679_vm2, %v761_v22 }
 0x17e   : > { %849 = vst.msk [vmem:[%s1406_s12 + $0x48] sm:$0xff] %vm679_vm2, %v763_v21 }
 0x180   : > { %v793_v24 = vpop.permute.xlu0 %792 }
 0x181   : > { %v795_v23 = vpop.permute.xlu1 %794  ;;  %864 = vst.msk [vmem:[%s1406_s12 + $0xc0] sm:$0xff] %vm679_vm2, %v793_v24 }
 0x182   : > { %865 = vst.msk [vmem:[%s1406_s12 + $0xc8] sm:$0xff] %vm679_vm2, %v795_v23 }
 0x184   : > { %v765_v26 = vpop.permute.xlu0 %764 }
 0x185   : > { %v767_v25 = vpop.permute.xlu1 %766  ;;  %850 = vst.msk [vmem:[%s1406_s12 + $0x50] sm:$0xff] %vm679_vm2, %v765_v26 }
 0x186   : > { %851 = vst.msk [vmem:[%s1406_s12 + $0x58] sm:$0xff] %vm679_vm2, %v767_v25 }
 0x188   : > { %v797_v28 = vpop.permute.xlu0 %796 }
 0x189   : > { %v799_v27 = vpop.permute.xlu1 %798  ;;  %866 = vst.msk [vmem:[%s1406_s12 + $0xd0] sm:$0xff] %vm679_vm2, %v797_v28 }
 0x18a   : > { %867 = vst.msk [vmem:[%s1406_s12 + $0xd8] sm:$0xff] %vm679_vm2, %v799_v27 }
 0x18c   : > { %v769_v30 = vpop.permute.xlu0 %768 }
 0x18d   : > { %v771_v29 = vpop.permute.xlu1 %770  ;;  %852 = vst.msk [vmem:[%s1406_s12 + $0x60] sm:$0xff] %vm679_vm2, %v769_v30 }
 0x18e   : > { %853 = vst.msk [vmem:[%s1406_s12 + $0x68] sm:$0xff] %vm679_vm2, %v771_v29 }
 0x190   : > { %v801_v32 = vpop.permute.xlu0 %800 }
 0x191   : > { %v803_v31 = vpop.permute.xlu1 %802  ;;  %868 = vst.msk [vmem:[%s1406_s12 + $0xe0] sm:$0xff] %vm679_vm2, %v801_v32 }
 0x192   : > { %869 = vst.msk [vmem:[%s1406_s12 + $0xe8] sm:$0xff] %vm679_vm2, %v803_v31 }
 0x194   : > { %v773_v34 = vpop.permute.xlu0 %772 }
 0x195   : > { %v775_v33 = vpop.permute.xlu1 %774  ;;  %854 = vst.msk [vmem:[%s1406_s12 + $0x70] sm:$0xff] %vm679_vm2, %v773_v34 }
 0x196   : > { %855 = vst.msk [vmem:[%s1406_s12 + $0x78] sm:$0xff] %vm679_vm2, %v775_v33 }
 0x198   : > { %v805_v36 = vpop.permute.xlu0 %804 }
 0x199   : > { %v807_v35 = vpop.permute.xlu1 %806  ;;  %870 = vst.msk [vmem:[%s1406_s12 + $0xf0] sm:$0xff] %vm679_vm2, %v805_v36 }
 0x19a   : > { %871 = vst.msk [vmem:[%s1406_s12 + $0xf8] sm:$0xff] %vm679_vm2, %v807_v35 }
 0x19b PF: > { %s16_s18 = sadd.s32 1, %s1110_s18  }
 0x19c   : > { %p13_p4 = scmp.ge.s32.totalorder %s16_s18, 4  }
 0x19e   :  { %15 = sbr.rel (!%p13_p4) target bundleno = 1 (0x1), region = 78 }

// kernel: flow_step_forward.8
= control target key start
LH: loop header
LB: loop body
LE: loop exit
PB: predicated region body
PF: predicated region fallthrough
CT: control target
= control target key end

     0   :  { %s1015_s15 = smov 0   ;;  %s1316_s0 = inlined_call_operand.vmem [shape: bf16[512,18], index: 0, kind: input, shape index: {}]   ;;  %s1317_s1 = inlined_call_operand.vmem [shape: bf16[18,8], index: 1, kind: input, shape index: {}]   ;;  %s1318_s2 = inlined_call_operand.vmem [shape: f32[512,8], index: 2, kind: output, shape index: {0}]   ;;  %s1319_s3 = inlined_call_operand.vmem [shape: f32[1,8], index: 3, kind: output, shape index: {1}]   ;;  %s1320_s4 = inlined_call_operand.vmem [shape: f32[1,8], index: 4, kind: output, shape index: {2}]  }
   0x1 LB: > { %s1021_s16 = sadd.s32 4294967295, %s987_s15   ;;  %p847_p0 = scmp.ge.s32.totalorder %s987_s15, 1  ;;  %s987_s15 = sphi %s1015_s15, %s15_s15  }
   0x2   : > { %p158_p1 = scmp.lt.s32.totalorder %s987_s15, 3 }
   0x4   : > { %p159_p2 = pnand %p847_p0, %p158_p1 }
   0x5   : > { %s848_s17 = sshll.u32 (!%p159_p2), %s1021_s16, 5  ;;  %p852_p4 = scmp.ne.s32.totalorder (!%p159_p2), %s1021_s16, 0 }
   0x6   : > { %162 = sbr.rel (%p159_p2) target bundleno = 366 (0x16e), region = 28  ;;  %p185_p3 = scmp.lt.s32.totalorder (!%p159_p2), %s848_s17, 63 }
   0xd   : > { %s1322_s17 = smov (!%p185_p3, %s848_s17), 63  ;;  %200 = sbr.rel (%p852_p4) target bundleno = 20 (0x14), region = 32 }
   0xe   : > { %s849_s18 = sshll.u32 %s1322_s17, 2  ;;  %s851_s19 = sshll.u32 %s1322_s17, 3  ;;  %vm201_vm0 = vcmask (!%p852_p4), 57344   ;;  %v989_v0 = vmov (!%p852_p4), 0.0  }
   0xf   : > { %s1029_s22 = scalar_lea.vmem %s1316_s0, %s849_s18  ;;  %s1034_s25 = scalar_lea.vmem %s1318_s2, %s851_s19  ;;  %202 = vst.msk [vmem:[#allocation2] sm:$0x1] (!%p852_p4), %vm201_vm0, %v989_v0  ;;  %203 = vst.msk [vmem:[#allocation3] sm:$0x1] (!%p852_p4), %vm201_vm0, %v989_v0 }
  0x14 PF: > { %v959_v1 = vld [vmem:[%s1317_s1] sm:$0xff]   ;;  %vm377_vm1 = vcmask 1040384   ;;  %v960_v2 = vld [vmem:[%s1317_s1 + $0x8] ss:$0 sps:$4 sm:$0x11]   ;;  %vm328_vm2 = vcmask 146432  }
  0x15   : > { %v961_v3 = vld [vmem:[%s1029_s22] sm:$0xff]   ;;  %908 = vmatprep.subr.bf16.mxu0 %v959_v1  ;;  %944 = vmatprep.subr.bf16.mxu1 %v959_v1  ;;  %v379_v4 = vsel %vm377_vm1, %v960_v2, 0  ;;  %v962_v5 = vld [vmem:[%s1029_s22 + $0x8] sm:$0xff]   ;;  %v963_v6 = vld [vmem:[%s1029_s22 + $0x10] sm:$0xff]   ;;  %vm542_vm3 = vcmask 64512   ;;  %vm646_vm4 = vcmask 57344  }
  0x16   : > { %909 = vmatpush3.bf16.msra.mxu0 %v959_v1  ;;  %912 = vmatprep.mubr.msk.bf16.mxu0 %vm328_vm2, %v961_v3  ;;  %v969_v7 = vld [vmem:[%s1029_s22 + $0x40] sm:$0xff]   ;;  %v970_v8 = vld [vmem:[%s1029_s22 + $0x48] sm:$0xff]   ;;  %v971_v9 = vld [vmem:[%s1029_s22 + $0x50] sm:$0xff]   ;;  %p887_p5 = scmp.ne.s32.totalorder %s1021_s16, 1 }
  0x17   : > { %948 = vmatprep.subr.msk.bf16.mxu0 %vm377_vm1, %v960_v2  ;;  %946 = vmatpush3.bf16.msra.mxu1 %v959_v1  ;;  %v964_v10 = vld [vmem:[%s1029_s22 + $0x18] sm:$0xff]   ;;  %v965_v11 = vld [vmem:[%s1029_s22 + $0x20] sm:$0xff]   ;;  %v966_v14 = vld [vmem:[%s1029_s22 + $0x28] sm:$0xff]  }
  0x18   : > { %949 = vmatprep.subr.msk.bf16.mxu1 %vm377_vm1, %v960_v2  ;;  %928 = vmatprep.mubr.msk.bf16.mxu1 %vm328_vm2, %v969_v7  ;;  %v972_v12 = vld [vmem:[%s1029_s22 + $0x58] sm:$0xff]   ;;  %v973_v13 = vld [vmem:[%s1029_s22 + $0x60] sm:$0xff]   ;;  %v967_v15 = vld [vmem:[%s1029_s22 + $0x30] sm:$0xff]  }
  0x19   : > { %v974_v16 = vld [vmem:[%s1029_s22 + $0x68] sm:$0xff]   ;;  %v975_v17 = vld [vmem:[%s1029_s22 + $0x70] sm:$0xff]   ;;  %v968_v18 = vld [vmem:[%s1029_s22 + $0x38] sm:$0xff]  }
  0x1a   : > { %911 = vmatpush3.bf16.msra.mxu0 %v379_v4  ;;  %v976_v19 = vld [vmem:[%s1029_s22 + $0x78] sm:$0xff]  }
  0x1b   : > { %947 = vmatpush3.bf16.msra.mxu1 %v379_v4 }
  0x1d   : > { %913 = vmatmul.mubr.msk.bf16.vlgmr.msra.gmra.mrb[0].mxu0 %vm328_vm2, %v962_v5 }
  0x1e   : > { %916 = vmatprep.mubr.msk.bf16.mxu0 %vm328_vm2, %v963_v6  ;;  %929 = vmatmul.mubr.msk.bf16.vlgmr.msra.gmra.mrb[0].mxu1 %vm328_vm2, %v970_v8 }
  0x1f   : > { %932 = vmatprep.mubr.msk.bf16.mxu1 %vm328_vm2, %v971_v9 }
  0x25   : > { %917 = vmatmul.mubr.msk.bf16.gmra.mrb[4].mxu0 %vm328_vm2, %v964_v10 }
  0x26   : > { %920 = vmatprep.mubr.msk.bf16.mxu0 %vm328_vm2, %v965_v11  ;;  %933 = vmatmul.mubr.msk.bf16.gmra.mrb[4].mxu1 %vm328_vm2, %v972_v12 }
  0x27   : > { %936 = vmatprep.mubr.msk.bf16.mxu1 %vm328_vm2, %v973_v13 }
  0x2d   : > { %921 = vmatmul.mubr.msk.bf16.gmra.mrb[8].mxu0 %vm328_vm2, %v966_v14 }
  0x2e   : > { %924 = vmatprep.mubr.msk.bf16.mxu0 %vm328_vm2, %v967_v15  ;;  %937 = vmatmul.mubr.msk.bf16.gmra.mrb[8].mxu1 %vm328_vm2, %v974_v16 }
  0x2f   : > { %940 = vmatprep.mubr.msk.bf16.mxu1 %vm328_vm2, %v975_v17 }
  0x35   : > { %925 = vmatmul.mubr.msk.bf16.gmra.mrb[12].mxu0 %vm328_vm2, %v968_v18 }
  0x36   : > { %941 = vmatmul.mubr.msk.bf16.gmra.mrb[12].mxu1 %vm328_vm2, %v976_v19 }
  0xf0   : > { %v914_v20 = vpop.f32.mrb[0].mxu0 }
  0xf1   : > { %545 = vst.msk [vmem:[%s1034_s25 + $0x10] sm:$0xff] %vm542_vm3, %v914_v20  ;;  %v415_v21 = vpop.f32.mrb[1].mxu0  ;;  %v1081_v25 = vpop.f32.mrb[0].mxu1  ;;  %v651_v26 = vmul.f32 %v914_v20, %v914_v20  ;;  %v579_v33 = vsel %vm542_vm3, %v914_v20, 0.0 }
  0xf2   : > { %543 = vst.msk [vmem:[%s1034_s25] sm:$0xff] %vm542_vm3, %v415_v21  ;;  %v649_v22 = vmul.f32 %v415_v21, %v415_v21  ;;  %v915_v23 = vpop.f32.mrb[2].mxu0  ;;  %v576_v27 = vsel %vm542_vm3, %v415_v21, 0.0  ;;  %561 = vst.msk [vmem:[%s1034_s25 + $0x90] sm:$0xff] %vm542_vm3, %v1081_v25  ;;  %v1090_v30 = vpop.f32.mrb[1].mxu1 }
  0xf3   : > { %546 = vst.msk [vmem:[%s1034_s25 + $0x18] sm:$0xff] %vm542_vm3, %v915_v23  ;;  %v418_v24 = vpop.f32.mrb[3].mxu0  ;;  %559 = vst.msk [vmem:[%s1034_s25 + $0x80] sm:$0xff] %vm542_vm3, %v1090_v30  ;;  %v1095_v32 = vpop.f32.mrb[2].mxu1  ;;  %v652_v35 = vmul.f32 %v915_v23, %v915_v23  ;;  %v684_v40 = vsel %vm542_vm3, %v651_v26, 0.0  ;;  %v581_v41 = vsel %vm542_vm3, %v915_v23, 0.0 }
  0xf4   : > { %544 = vst.msk [vmem:[%s1034_s25 + $0x8] sm:$0xff] %vm542_vm3, %v418_v24  ;;  %v577_v28 = vsel %vm542_vm3, %v418_v24, 0.0  ;;  %v650_v29 = vmul.f32 %v418_v24, %v418_v24  ;;  %v681_v34 = vsel %vm542_vm3, %v649_v22, 0.0  ;;  %562 = vst.msk [vmem:[%s1034_s25 + $0x98] sm:$0xff] %vm542_vm3, %v1095_v32  ;;  %v1103_v37 = vpop.f32.mrb[3].mxu1 }
  0xf5   : > { %v578_v31 = vadd.f32 %v577_v28, %v576_v27  ;;  %560 = vst.msk [vmem:[%s1034_s25 + $0x88] sm:$0xff] %vm542_vm3, %v1103_v37  ;;  %v686_v46 = vsel %vm542_vm3, %v652_v35, 0.0 }
  0xf6   : > { %v682_v36 = vsel %vm542_vm3, %v650_v29, 0.0 }
  0xf7   : > { %v580_v38 = vadd.f32 %v579_v33, %v578_v31  ;;  %v683_v39 = vadd.f32 %v682_v36, %v681_v34 }
  0xf8   : > { %v918_v42 = vpop.f32.mrb[4].mxu0 }
  0xf9   : > { %v685_v43 = vadd.f32 %v684_v40, %v683_v39  ;;  %549 = vst.msk [vmem:[%s1034_s25 + $0x30] sm:$0xff] %vm542_vm3, %v918_v42  ;;  %v431_v44 = vpop.f32.mrb[5].mxu0  ;;  %v582_v45 = vadd.f32 %v581_v41, %v580_v38  ;;  %v1118_v53 = vpop.f32.mrb[4].mxu1  ;;  %v655_v54 = vmul.f32 %v918_v42, %v918_v42  ;;  %v587_v62 = vsel %vm542_vm3, %v918_v42, 0.0 }
  0xfa   : > { %547 = vst.msk [vmem:[%s1034_s25 + $0x20] sm:$0xff] %vm542_vm3, %v431_v44  ;;  %v583_v47 = vsel %vm542_vm3, %v431_v44, 0.0  ;;  %v653_v48 = vmul.f32 %v431_v44, %v431_v44  ;;  %v919_v49 = vpop.f32.mrb[6].mxu0  ;;  %565 = vst.msk [vmem:[%s1034_s25 + $0xb0] sm:$0xff] %vm542_vm3, %v1118_v53  ;;  %v1127_v58 = vpop.f32.mrb[5].mxu1 }
  0xfb   : > { %v584_v50 = vadd.f32 %v583_v47, %v582_v45  ;;  %v687_v51 = vadd.f32 %v686_v46, %v685_v43  ;;  %550 = vst.msk [vmem:[%s1034_s25 + $0x38] sm:$0xff] %vm542_vm3, %v919_v49  ;;  %v434_v52 = vpop.f32.mrb[7].mxu0  ;;  %563 = vst.msk [vmem:[%s1034_s25 + $0xa0] sm:$0xff] %vm542_vm3, %v1127_v58  ;;  %v1132_v61 = vpop.f32.mrb[6].mxu1  ;;  %v656_v63 = vmul.f32 %v919_v49, %v919_v49  ;;  %v692_v4 = vsel %vm542_vm3, %v655_v54, 0.0 }
  0xfc   : > { %v688_v55 = vsel %vm542_vm3, %v653_v48, 0.0  ;;  %548 = vst.msk [vmem:[%s1034_s25 + $0x28] sm:$0xff] %vm542_vm3, %v434_v52  ;;  %v585_v56 = vsel %vm542_vm3, %v434_v52, 0.0  ;;  %v654_v57 = vmul.f32 %v434_v52, %v434_v52  ;;  %566 = vst.msk [vmem:[%s1034_s25 + $0xb8] sm:$0xff] %vm542_vm3, %v1132_v61  ;;  %v1139_v1 = vpop.f32.mrb[7].mxu1  ;;  %v589_v5 = vsel %vm542_vm3, %v919_v49, 0.0 }
  0xfd   : > { %v689_v59 = vadd.f32 %v688_v55, %v687_v51  ;;  %v586_v60 = vadd.f32 %v585_v56, %v584_v50  ;;  %564 = vst.msk [vmem:[%s1034_s25 + $0xa8] sm:$0xff] %vm542_vm3, %v1139_v1  ;;  %v694_v10 = vsel %vm542_vm3, %v656_v63, 0.0 }
  0xfe   : > { %v690_v0 = vsel %vm542_vm3, %v654_v57, 0.0 }
  0xff   : > { %v588_v2 = vadd.f32 %v587_v62, %v586_v60  ;;  %v691_v3 = vadd.f32 %v690_v0, %v689_v59  ;;  %v665_v0 = vmul.f32 %v1090_v30, %v1090_v30 }
 0x100   : > { %v922_v6 = vpop.f32.mrb[8].mxu0 }
 0x101   : > { %v693_v7 = vadd.f32 %v692_v4, %v691_v3  ;;  %553 = vst.msk [vmem:[%s1034_s25 + $0x50] sm:$0xff] %vm542_vm3, %v922_v6  ;;  %v447_v8 = vpop.f32.mrb[9].mxu0  ;;  %v590_v9 = vadd.f32 %v589_v5, %v588_v2  ;;  %v1154_v17 = vpop.f32.mrb[8].mxu1  ;;  %v659_v18 = vmul.f32 %v922_v6, %v922_v6  ;;  %v595_v27 = vsel %vm542_vm3, %v922_v6, 0.0 }
 0x102   : > { %551 = vst.msk [vmem:[%s1034_s25 + $0x40] sm:$0xff] %vm542_vm3, %v447_v8  ;;  %v591_v11 = vsel %vm542_vm3, %v447_v8, 0.0  ;;  %v657_v12 = vmul.f32 %v447_v8, %v447_v8  ;;  %v923_v13 = vpop.f32.mrb[10].mxu0  ;;  %569 = vst.msk [vmem:[%s1034_s25 + $0xd0] sm:$0xff] %vm542_vm3, %v1154_v17  ;;  %v1163_v22 = vpop.f32.mrb[9].mxu1 }
 0x103   : > { %v592_v14 = vadd.f32 %v591_v11, %v590_v9  ;;  %v695_v15 = vadd.f32 %v694_v10, %v693_v7  ;;  %554 = vst.msk [vmem:[%s1034_s25 + $0x58] sm:$0xff] %vm542_vm3, %v923_v13  ;;  %v450_v16 = vpop.f32.mrb[11].mxu0  ;;  %567 = vst.msk [vmem:[%s1034_s25 + $0xc0] sm:$0xff] %vm542_vm3, %v1163_v22  ;;  %v1168_v26 = vpop.f32.mrb[10].mxu1  ;;  %v660_v28 = vmul.f32 %v923_v13, %v923_v13  ;;  %v700_v35 = vsel %vm542_vm3, %v659_v18, 0.0 }
 0x104   : > { %v696_v19 = vsel %vm542_vm3, %v657_v12, 0.0  ;;  %552 = vst.msk [vmem:[%s1034_s25 + $0x48] sm:$0xff] %vm542_vm3, %v450_v16  ;;  %v593_v20 = vsel %vm542_vm3, %v450_v16, 0.0  ;;  %v658_v21 = vmul.f32 %v450_v16, %v450_v16  ;;  %570 = vst.msk [vmem:[%s1034_s25 + $0xd8] sm:$0xff] %vm542_vm3, %v1168_v26  ;;  %v1175_v31 = vpop.f32.mrb[11].mxu1  ;;  %v597_v36 = vsel %vm542_vm3, %v923_v13, 0.0 }
 0x105   : > { %v697_v23 = vadd.f32 %v696_v19, %v695_v15  ;;  %v594_v24 = vadd.f32 %v593_v20, %v592_v14  ;;  %568 = vst.msk [vmem:[%s1034_s25 + $0xc8] sm:$0xff] %vm542_vm3, %v1175_v31  ;;  %v702_v42 = vsel %vm542_vm3, %v660_v28, 0.0  ;;  %v607_v7 = vsel %vm542_vm3, %v1090_v30, 0.0 }
 0x106   : > { %v698_v29 = vsel %vm542_vm3, %v658_v21, 0.0  ;;  %v712_v12 = vsel %vm542_vm3, %v665_v0, 0.0  ;;  %v666_v13 = vmul.f32 %v1103_v37, %v1103_v37  ;;  %v667_v30 = vmul.f32 %v1081_v25, %v1081_v25 }
 0x107   : > { %v596_v33 = vadd.f32 %v595_v27, %v594_v24  ;;  %v699_v34 = vadd.f32 %v698_v29, %v697_v23  ;;  %v609_v18 = vsel %vm542_vm3, %v1103_v37, 0.0  ;;  %v611_v21 = vsel %vm542_vm3, %v1081_v25, 0.0 }
 0x108   : > { %v926_v38 = vpop.f32.mrb[12].mxu0  ;;  %v668_v23 = vmul.f32 %v1095_v32, %v1095_v32  ;;  %v714_v24 = vsel %vm542_vm3, %v666_v13, 0.0  ;;  %v669_v27 = vmul.f32 %v1127_v58, %v1127_v58  ;;  %v613_v37 = vsel %vm542_vm3, %v1095_v32, 0.0 }
 0x109   : > { %v701_v39 = vadd.f32 %v700_v35, %v699_v34  ;;  %557 = vst.msk [vmem:[%s1034_s25 + $0x70] sm:$0xff] %vm542_vm3, %v926_v38  ;;  %v463_v40 = vpop.f32.mrb[13].mxu0  ;;  %v598_v41 = vadd.f32 %v597_v36, %v596_v33  ;;  %v1190_v49 = vpop.f32.mrb[12].mxu1  ;;  %v663_v50 = vmul.f32 %v926_v38, %v926_v38  ;;  %v603_v60 = vsel %vm542_vm3, %v926_v38, 0.0 }
 0x10a   : > { %555 = vst.msk [vmem:[%s1034_s25 + $0x60] sm:$0xff] %vm542_vm3, %v463_v40  ;;  %v599_v43 = vsel %vm542_vm3, %v463_v40, 0.0  ;;  %v661_v44 = vmul.f32 %v463_v40, %v463_v40  ;;  %v927_v45 = vpop.f32.mrb[14].mxu0  ;;  %573 = vst.msk [vmem:[%s1034_s25 + $0xf0] sm:$0xff] %vm542_vm3, %v1190_v49  ;;  %v1199_v55 = vpop.f32.mrb[13].mxu1  ;;  %v716_v33 = vsel %vm542_vm3, %v667_v30, 0.0  ;;  %v675_v0 = vmul.f32 %v1154_v17, %v1154_v17 }
 0x10b   : > { %v600_v46 = vadd.f32 %v599_v43, %v598_v41  ;;  %v703_v47 = vadd.f32 %v702_v42, %v701_v39  ;;  %558 = vst.msk [vmem:[%s1034_s25 + $0x78] sm:$0xff] %vm542_vm3, %v927_v45  ;;  %v466_v48 = vpop.f32.mrb[15].mxu0  ;;  %571 = vst.msk [vmem:[%s1034_s25 + $0xe0] sm:$0xff] %vm542_vm3, %v1199_v55  ;;  %v1204_v59 = vpop.f32.mrb[14].mxu1  ;;  %v664_v62 = vmul.f32 %v927_v45, %v927_v45  ;;  %v708_v5 = vsel %vm542_vm3, %v663_v50, 0.0 }
 0x10c   : > { %v704_v51 = vsel %vm542_vm3, %v661_v44, 0.0  ;;  %556 = vst.msk [vmem:[%s1034_s25 + $0x68] sm:$0xff] %vm542_vm3, %v466_v48  ;;  %v601_v52 = vsel %vm542_vm3, %v466_v48, 0.0  ;;  %v662_v54 = vmul.f32 %v466_v48, %v466_v48  ;;  %574 = vst.msk [vmem:[%s1034_s25 + $0xf8] sm:$0xff] %vm542_vm3, %v1204_v59  ;;  %v1213_v2 = vpop.f32.mrb[15].mxu1  ;;  %v605_v6 = vsel %vm542_vm3, %v927_v45, 0.0 }
 0x10d   : > { %v705_v56 = vadd.f32 %v704_v51, %v703_v47  ;;  %v602_v57 = vadd.f32 %v601_v52, %v600_v46  ;;  %572 = vst.msk [vmem:[%s1034_s25 + $0xe8] sm:$0xff] %vm542_vm3, %v1213_v2  ;;  %v680_v8 = vmul.f32 %v1204_v59, %v1204_v59  ;;  %v710_v11 = vsel %vm542_vm3, %v664_v62, 0.0 }
 0x10e   : > { %v706_v63 = vsel %vm542_vm3, %v662_v54, 0.0  ;;  %v615_v34 = vsel %vm542_vm3, %v1127_v58, 0.0  ;;  %v718_v36 = vsel %vm542_vm3, %v668_v23, 0.0  ;;  %v720_v38 = vsel %vm542_vm3, %v669_v27, 0.0 }
 0x10f   : > { %v604_v3 = vadd.f32 %v603_v60, %v602_v57  ;;  %v707_v4 = vadd.f32 %v706_v63, %v705_v56  ;;  %v1229_v14 = vsel %vm542_vm3, %v680_v8, 0.0  ;;  %v670_v39 = vmul.f32 %v1139_v1, %v1139_v1 }
 0x110   : > { %v671_v42 = vmul.f32 %v1118_v53, %v1118_v53  ;;  %v617_v32 = vsel %vm542_vm3, %v1139_v1, 0.0  ;;  %v619_v58 = vsel %vm542_vm3, %v1118_v53, 0.0  ;;  %v672_v45 = vmul.f32 %v1132_v61, %v1132_v61 }
 0x111   : > { %v709_v9 = vadd.f32 %v708_v5, %v707_v4  ;;  %v606_v10 = vadd.f32 %v605_v6, %v604_v3  ;;  %v722_v46 = vsel %vm542_vm3, %v670_v39, 0.0  ;;  %v673_v47 = vmul.f32 %v1163_v22, %v1163_v22 }
 0x112   : > { %v724_v51 = vsel %vm542_vm3, %v671_v42, 0.0  ;;  %v621_v1 = vsel %vm542_vm3, %v1132_v61, 0.0  ;;  %v623_v52 = vsel %vm542_vm3, %v1163_v22, 0.0  ;;  %v726_v56 = vsel %vm542_vm3, %v672_v45, 0.0  ;;  %v575_v42 = vld [vmem:[#allocation2] sm:$0x1] }
 0x113   : > { %v608_v15 = vadd.f32 %v607_v7, %v606_v10  ;;  %v711_v16 = vadd.f32 %v710_v11, %v709_v9  ;;  %v728_v57 = vsel %vm542_vm3, %v673_v47, 0.0  ;;  %v674_v60 = vmul.f32 %v1175_v31, %v1175_v31 }
 0x114   : > { %v625_v61 = vsel %vm542_vm3, %v1175_v31, 0.0  ;;  %v627_v22 = vsel %vm542_vm3, %v1154_v17, 0.0  ;;  %v676_v5 = vmul.f32 %v1168_v26, %v1168_v26  ;;  %v677_v7 = vmul.f32 %v1199_v55, %v1199_v55 }
 0x115   : > { %v713_v19 = vadd.f32 %v712_v12, %v711_v16  ;;  %v610_v20 = vadd.f32 %v609_v18, %v608_v15  ;;  %v730_v6 = vsel %vm542_vm3, %v674_v60, 0.0  ;;  %v732_v10 = vsel %vm542_vm3, %v675_v0, 0.0 }
 0x116   : > { %v629_v31 = vsel %vm542_vm3, %v1168_v26, 0.0  ;;  %v631_v11 = vsel %vm542_vm3, %v1199_v55, 0.0  ;;  %v734_v13 = vsel %vm542_vm3, %v676_v5, 0.0  ;;  %v736_v15 = vsel %vm542_vm3, %v677_v7, 0.0 }
 0x117   : > { %v612_v28 = vadd.f32 %v611_v21, %v610_v20  ;;  %v715_v29 = vadd.f32 %v714_v24, %v713_v19  ;;  %v678_v16 = vmul.f32 %v1213_v2, %v1213_v2  ;;  %v679_v19 = vmul.f32 %v1190_v49, %v1190_v49 }
 0x118   : > { %v633_v26 = vsel %vm542_vm3, %v1213_v2, 0.0  ;;  %v635_v55 = vsel %vm542_vm3, %v1190_v49, 0.0 }
 0x119   : > { %v717_v35 = vadd.f32 %v716_v33, %v715_v29  ;;  %v614_v25 = vadd.f32 %v613_v37, %v612_v28  ;;  %v738_v23 = vsel %vm542_vm3, %v678_v16, 0.0  ;;  %v740_v28 = vsel %vm542_vm3, %v679_v19, 0.0 }
 0x11a   : > { %v637_v29 = vsel %vm542_vm3, %v1204_v59, 0.0 }
 0x11b   : > { %v616_v40 = vadd.f32 %v615_v34, %v614_v25  ;;  %v719_v41 = vadd.f32 %v718_v36, %v717_v35 }
 0x11d   : > { %v721_v43 = vadd.f32 %v720_v38, %v719_v41  ;;  %v618_v44 = vadd.f32 %v617_v32, %v616_v40 }
 0x11f   : > { %v620_v48 = vadd.f32 %v619_v58, %v618_v44  ;;  %v723_v50 = vadd.f32 %v722_v46, %v721_v43  ;;  %v648_v44 = vld [vmem:[#allocation3] sm:$0x1] }
 0x121   : > { %v725_v54 = vadd.f32 %v724_v51, %v723_v50  ;;  %v622_v53 = vadd.f32 %v621_v1, %v620_v48 }
 0x123   : > { %v624_v62 = vadd.f32 %v623_v52, %v622_v53  ;;  %v727_v63 = vadd.f32 %v726_v56, %v725_v54 }
 0x125   : > { %v729_v3 = vadd.f32 %v728_v57, %v727_v63  ;;  %v626_v4 = vadd.f32 %v625_v61, %v624_v62 }
 0x127   : > { %v628_v8 = vadd.f32 %v627_v22, %v626_v4  ;;  %v731_v9 = vadd.f32 %v730_v6, %v729_v3 }
 0x129   : > { %v733_v12 = vadd.f32 %v732_v10, %v731_v9  ;;  %v630_v17 = vadd.f32 %v629_v31, %v628_v8 }
 0x12b   : > { %v632_v30 = vadd.f32 %v631_v11, %v630_v17  ;;  %v735_v18 = vadd.f32 %v734_v13, %v733_v12 }
 0x12d   : > { %v737_v20 = vadd.f32 %v736_v15, %v735_v18  ;;  %v634_v21 = vadd.f32 %v633_v26, %v632_v30 }
 0x12f   : > { %v636_v24 = vadd.f32 %v635_v55, %v634_v21  ;;  %v739_v27 = vadd.f32 %v738_v23, %v737_v20 }
 0x131   : > { %v638_v33 = vadd.f32 %v637_v29, %v636_v24  ;;  %v741_v37 = vadd.f32 %v740_v28, %v739_v27 }
 0x133   : > { %v639_v34 = vrot.slane %v638_v33, 4  ;;  %v743_v35 = vadd.f32 %v1229_v14, %v741_v37 }
 0x135   : > { %v640_v2 = vadd.f32 %v639_v34, %v638_v33  ;;  %v744_v25 = vrot.slane %v743_v35, 4 }
 0x137   : > { %v641_v36 = vrot.slane %v640_v2, 2  ;;  %v745_v38 = vadd.f32 %v744_v25, %v743_v35 }
 0x139   : > { %v642_v39 = vadd.f32 %v641_v36, %v640_v2  ;;  %v746_v49 = vrot.slane %v745_v38, 2 }
 0x13b   : > { %v643_v40 = vrot.slane %v642_v39, 1  ;;  %v747_v41 = vadd.f32 %v746_v49, %v745_v38 }
 0x13d   : > { %v644_v32 = vadd.f32 %v643_v40, %v642_v39  ;;  %v748_v43 = vrot.slane %v747_v41, 1  ;;  %755 = sbr.rel (%p887_p5) target bundleno = 366 (0x16e), region = 36 }
 0x13f   : > { %v645_v58 = vadd.f32 %v644_v32, %v575_v42  ;;  %v749_v59 = vadd.f32 %v748_v43, %v747_v41 }
 0x141   : > { %647 = vst.msk [vmem:[#allocation2] sm:$0x1] %vm646_vm4, %v645_v58  ;;  %v750_v45 = vadd.f32 %v749_v59, %v648_v44 }
 0x143   : > { %751 = vst.msk [vmem:[#allocation3] sm:$0x1] %vm646_vm4, %v750_v45 }
 0x148   : > { %v756_v14 = vld [vmem:[#allocation2] sm:$0x1] }
 0x149   : > { %v757_v47 = vmul.f32 0.001953125, %v756_v14 }
 0x14a   : > { %v758_v46 = vld [vmem:[#allocation3] sm:$0x1] }
 0x14b   : > { %v759_v48 = vmul.f32 0.001953125, %v758_v46  ;;  %v760_v50 = vmul.f32 %v757_v47, %v757_v47  ;;  %763 = vst.msk [vmem:[%s1319_s3] sm:$0x1] %vm646_vm4, %v757_v47 }
 0x14d   : > { %v761_v51 = vsub.f32 %v759_v48, %v760_v50 }
 0x14f   : > { %v762_v1 = vmax.f32 %v761_v51, 0.0 }
 0x151   : > { %977 = vrsqrt.f32 %v762_v1  ;;  %vm766_vm5 = vcmp.eq.f32.partialorder %v762_v1, inf  ;;  %v769_v54 = vand.u32 2147483648, %v762_v1  ;;  %vm768_vm6 = vcmp.eq.f32.partialorder %v762_v1, 0.0 }
 0x15b   : > { %v978_v52 = vpop.eup %977 }
 0x15c   : > { %v765_v53 = vmul.f32 %v978_v52, %v762_v1 }
 0x15e   : > { %v767_v56 = vsel %vm766_vm5, %v762_v1, %v765_v53 }
 0x15f   : > { %v770_v57 = vsel %vm768_vm6, %v769_v54, %v767_v56 }
 0x160   : > { %v771_v60 = vadd.f32 1e-06, %v770_v57 }
 0x162   : > { %979 = vrcp.f32 %v771_v60 }
 0x16c   : > { %v980_v62 = vpop.eup %979 }
 0x16d   : > { %774 = vst.msk [vmem:[%s1320_s4] sm:$0x1] %vm646_vm4, %v980_v62 }
 0x16e PF: > { %s15_s15 = sadd.s32 1, %s987_s15  }
 0x16f   : > { %p12_p6 = scmp.ge.s32.totalorder %s15_s15, 4  }
 0x171   :  { %14 = sbr.rel (!%p12_p6) target bundleno = 1 (0x1), region = 82 }

// kernel: flow_step_forward.9
= control target key start
LH: loop header
LB: loop body
LE: loop exit
PB: predicated region body
PF: predicated region fallthrough
CT: control target
= control target key end

     0   :  { %s1074_s21 = smov 0   ;;  %s1438_s0 = inlined_call_operand.vmem [shape: f32[512,8], index: 0, kind: input, shape index: {}]   ;;  %s1439_s1 = inlined_call_operand.vmem [shape: f32[1,8], index: 1, kind: input, shape index: {}]   ;;  %s1440_s2 = inlined_call_operand.vmem [shape: f32[1,8], index: 2, kind: input, shape index: {}]   ;;  %s1441_s3 = inlined_call_operand.vmem [shape: bf16[8,8], index: 3, kind: input, shape index: {}]   ;;  %s1442_s4 = inlined_call_operand.vmem [shape: f32[512,8], index: 4, kind: output, shape index: {0}]   ;;  %s1443_s5 = inlined_call_operand.vmem [shape: f32[1,8], index: 5, kind: output, shape index: {1}]   ;;  %s1444_s6 = inlined_call_operand.vmem [shape: f32[1,8], index: 6, kind: output, shape index: {2}]  }
   0x1 LB: > { %s1080_s22 = sadd.s32 4294967295, %s1036_s21   ;;  %p935_p0 = scmp.ge.s32.totalorder %s1036_s21, 1  ;;  %s1036_s21 = sphi %s1074_s21, %s17_s21  }
   0x2   : > { %p208_p1 = scmp.lt.s32.totalorder %s1036_s21, 3 }
   0x4   : > { %p209_p2 = pnand %p935_p0, %p208_p1 }
   0x5   : > { %s936_s23 = sshll.u32 (!%p209_p2), %s1080_s22, 5  ;;  %p940_p4 = scmp.ne.s32.totalorder (!%p209_p2), %s1080_s22, 0 }
   0x6   : > { %212 = sbr.rel (%p209_p2) target bundleno = 369 (0x171), region = 36  ;;  %p239_p3 = scmp.lt.s32.totalorder (!%p209_p2), %s936_s23, 63 }
   0xd   : > { %s1446_s23 = smov (!%p239_p3, %s936_s23), 63  ;;  %254 = sbr.rel (%p940_p4) target bundleno = 20 (0x14), region = 40 }
   0xe   : > { %s937_s24 = sshll.u32 %s1446_s23, 3  ;;  %vm255_vm0 = vcmask (!%p940_p4), 57344   ;;  %v1038_v0 = vmov (!%p940_p4), 0.0  }
   0xf   : > { %s1088_s27 = scalar_lea.vmem %s1438_s0, %s937_s24  ;;  %s1093_s30 = scalar_lea.vmem %s1442_s4, %s937_s24  ;;  %256 = vst.msk [vmem:[#allocation2] sm:$0x1] (!%p940_p4), %vm255_vm0, %v1038_v0  ;;  %257 = vst.msk [vmem:[#allocation3] sm:$0x1] (!%p940_p4), %vm255_vm0, %v1038_v0 }
  0x14 PF: > { %v416_v1 = vld [vmem:[%s1441_s3] sm:$0xf]  ;;  %vm466_vm1 = vcmask 1043456   ;;  %v259_v3 = vld [vmem:[%s1088_s27 + $0x8] sm:$0xff]  ;;  %v260_v7 = vld [vmem:[%s1088_s27 + $0x10] sm:$0xff]  ;;  %vm417_vm2 = vcmask 64512  }
  0x15   : > { %v258_v2 = vld [vmem:[%s1088_s27] sm:$0xff]  ;;  %1015 = vmatprep.subr.msk.bf16.mxu0 %vm466_vm1, %v416_v1  ;;  %v468_v4 = vsel %vm466_vm1, %v416_v1, 0  ;;  %1016 = vmatprep.subr.msk.bf16.mxu1 %vm466_vm1, %v416_v1  ;;  %v261_v10 = vld [vmem:[%s1088_s27 + $0x18] sm:$0xff]  ;;  %v263_v13 = vld [vmem:[%s1088_s27 + $0x28] sm:$0xff]  ;;  %vm734_vm3 = vcmask 57344   ;;  %p959_p5 = scmp.ne.s32.totalorder %s1080_s22, 1 }
  0x16   : > { %v1104_v5 = vld [vmem:[%s1439_s1] ss:$0 sm:$0xff]  ;;  %980 = vmatpush3.bf16.msra.mxu0 %v468_v4  ;;  %1014 = vmatpush3.bf16.msra.mxu1 %v468_v4  ;;  %v264_v17 = vld [vmem:[%s1088_s27 + $0x30] sm:$0xff]  ;;  %v265_v18 = vld [vmem:[%s1088_s27 + $0x38] sm:$0xff] }
  0x17   : > { %v1109_v6 = vld [vmem:[%s1440_s2] ss:$0 sm:$0xff]  ;;  %v297_v8 = vsub.f32 %v258_v2, %v1104_v5  ;;  %v298_v9 = vsub.f32 %v259_v3, %v1104_v5  ;;  %v299_v11 = vsub.f32 %v260_v7, %v1104_v5  ;;  %v300_v14 = vsub.f32 %v261_v10, %v1104_v5  ;;  %v267_v28 = vld [vmem:[%s1088_s27 + $0x48] sm:$0xff]  ;;  %v268_v33 = vld [vmem:[%s1088_s27 + $0x50] sm:$0xff] }
  0x18   : > { %v262_v12 = vld [vmem:[%s1088_s27 + $0x20] sm:$0xff]  ;;  %v302_v16 = vsub.f32 %v263_v13, %v1104_v5  ;;  %v303_v22 = vsub.f32 %v264_v17, %v1104_v5  ;;  %v304_v26 = vsub.f32 %v265_v18, %v1104_v5  ;;  %v269_v38 = vld [vmem:[%s1088_s27 + $0x58] sm:$0xff]  ;;  %v306_v43 = vsub.f32 %v267_v28, %v1104_v5  ;;  %v271_v44 = vld [vmem:[%s1088_s27 + $0x68] sm:$0xff] }
  0x19   : > { %v301_v15 = vsub.f32 %v262_v12, %v1104_v5  ;;  %v336_v19 = vmul.f32 %v1109_v6, %v297_v8  ;;  %v337_v20 = vmul.f32 %v1109_v6, %v298_v9  ;;  %v338_v21 = vmul.f32 %v1109_v6, %v299_v11  ;;  %v266_v27 = vld [vmem:[%s1088_s27 + $0x40] sm:$0xff]  ;;  %v272_v45 = vld [vmem:[%s1088_s27 + $0x70] sm:$0xff]  ;;  %v273_v54 = vld [vmem:[%s1088_s27 + $0x78] sm:$0xff] }
  0x1a   : > { %v339_v23 = vmul.f32 %v1109_v6, %v300_v14  ;;  %v341_v25 = vmul.f32 %v1109_v6, %v302_v16  ;;  %v342_v32 = vmul.f32 %v1109_v6, %v303_v22  ;;  %v343_v37 = vmul.f32 %v1109_v6, %v304_v26  ;;  %v270_v39 = vld [vmem:[%s1088_s27 + $0x60] sm:$0xff]  ;;  %v275_v63 = vld [vmem:[%s1088_s27 + $0x88] sm:$0xff]  ;;  %v276_v2 = vld [vmem:[%s1088_s27 + $0x90] sm:$0xff] }
  0x1b   : > { %v340_v24 = vmul.f32 %v1109_v6, %v301_v15  ;;  %v368_v29 = vmax.f32 %v336_v19, 0.0  ;;  %v369_v30 = vmax.f32 %v337_v20, 0.0  ;;  %v370_v31 = vmax.f32 %v338_v21, 0.0  ;;  %v274_v58 = vld [vmem:[%s1088_s27 + $0x80] sm:$0xff]  ;;  %v277_v3 = vld [vmem:[%s1088_s27 + $0x98] sm:$0xff]  ;;  %v279_v14 = vld [vmem:[%s1088_s27 + $0xa8] sm:$0xff] }
  0x1c   : > { %v371_v34 = vmax.f32 %v339_v23, 0.0  ;;  %v373_v36 = vmax.f32 %v341_v25, 0.0  ;;  %v374_v41 = vmax.f32 %v342_v32, 0.0  ;;  %v305_v42 = vsub.f32 %v266_v27, %v1104_v5  ;;  %v278_v9 = vld [vmem:[%s1088_s27 + $0xa0] sm:$0xff]  ;;  %v280_v19 = vld [vmem:[%s1088_s27 + $0xb0] sm:$0xff] }
  0x1d   : > { %v372_v35 = vmax.f32 %v340_v24, 0.0  ;;  %v400_v40 = vpack.c.bf16 %v369_v30, %v368_v29  ;;  %v375_v48 = vmax.f32 %v343_v37, 0.0  ;;  %v307_v49 = vsub.f32 %v268_v33, %v1104_v5  ;;  %v281_v24 = vld [vmem:[%s1088_s27 + $0xb8] sm:$0xff]  ;;  %v282_v29 = vld [vmem:[%s1088_s27 + $0xc0] sm:$0xff] }
  0x1e   : > { %v401_v46 = vpack.c.bf16 %v371_v34, %v370_v31  ;;  %v344_v50 = vmul.f32 %v1109_v6, %v305_v42  ;;  %v345_v51 = vmul.f32 %v1109_v6, %v306_v43  ;;  %v308_v52 = vsub.f32 %v269_v38, %v1104_v5  ;;  %v283_v34 = vld [vmem:[%s1088_s27 + $0xc8] sm:$0xff] }
  0x1f   : > { %v402_v47 = vpack.c.bf16 %v373_v36, %v372_v35  ;;  %981 = vmatprep.mubr.msk.bf16.mxu0 %vm417_vm2, %v400_v40  ;;  %v309_v53 = vsub.f32 %v270_v39, %v1104_v5  ;;  %v346_v55 = vmul.f32 %v1109_v6, %v307_v49  ;;  %v310_v56 = vsub.f32 %v271_v44, %v1104_v5  ;;  %v284_v39 = vld [vmem:[%s1088_s27 + $0xd0] sm:$0xff]  ;;  %v285_v44 = vld [vmem:[%s1088_s27 + $0xd8] sm:$0xff]  ;;  %v286_v49 = vld [vmem:[%s1088_s27 + $0xe0] sm:$0xff] }
  0x20   : > { %982 = vmatmul.mubr.msk.bf16.vlgmr.msra.gmra.mrb[0].mxu0 %vm417_vm2, %v401_v46  ;;  %v311_v57 = vsub.f32 %v272_v45, %v1104_v5  ;;  %v376_v59 = vmax.f32 %v344_v50, 0.0  ;;  %v377_v60 = vmax.f32 %v345_v51, 0.0  ;;  %v347_v61 = vmul.f32 %v1109_v6, %v308_v52  ;;  %v287_v50 = vld [vmem:[%s1088_s27 + $0xe8] sm:$0xff] }
  0x21   : > { %985 = vmatprep.mubr.msk.bf16.mxu0 %vm417_vm2, %v402_v47  ;;  %v348_v62 = vmul.f32 %v1109_v6, %v309_v53  ;;  %v349_v0 = vmul.f32 %v1109_v6, %v310_v56  ;;  %v312_v1 = vsub.f32 %v273_v54, %v1104_v5  ;;  %v403_v4 = vpack.c.bf16 %v375_v48, %v374_v41 }
  0x22   : > { %v378_v7 = vmax.f32 %v346_v55, 0.0  ;;  %v313_v8 = vsub.f32 %v274_v58, %v1104_v5  ;;  %v404_v10 = vpack.c.bf16 %v377_v60, %v376_v59  ;;  %v379_v11 = vmax.f32 %v347_v61, 0.0 }
  0x23   : > { %v1165_v12 = vmul.f32 %v1109_v6, %v311_v57  ;;  %v314_v13 = vsub.f32 %v275_v63, %v1104_v5  ;;  %v380_v15 = vmax.f32 %v348_v62, 0.0  ;;  %v315_v17 = vsub.f32 %v276_v2, %v1104_v5 }
  0x24   : > { %v352_v16 = vmul.f32 %v1109_v6, %v313_v8  ;;  %v316_v18 = vsub.f32 %v277_v3, %v1104_v5  ;;  %v381_v20 = vmax.f32 %v349_v0, 0.0  ;;  %v351_v21 = vmul.f32 %v1109_v6, %v312_v1 }
  0x25   : > { %v353_v22 = vmul.f32 %v1109_v6, %v314_v13  ;;  %v317_v23 = vsub.f32 %v278_v9, %v1104_v5  ;;  %v354_v26 = vmul.f32 %v1109_v6, %v315_v17  ;;  %v318_v28 = vsub.f32 %v279_v14, %v1104_v5  ;;  %v288_v9 = vld [vmem:[%s1088_s27 + $0xf0] sm:$0xff] }
  0x26   : > { %v384_v25 = vmax.f32 %v352_v16, 0.0  ;;  %v355_v27 = vmul.f32 %v1109_v6, %v316_v18  ;;  %v405_v30 = vpack.c.bf16 %v379_v11, %v378_v7  ;;  %v319_v33 = vsub.f32 %v280_v19, %v1104_v5 }
  0x27   : > { %v385_v31 = vmax.f32 %v353_v22, 0.0  ;;  %v356_v32 = vmul.f32 %v1109_v6, %v317_v23  ;;  %v386_v35 = vmax.f32 %v354_v26, 0.0  ;;  %v357_v37 = vmul.f32 %v1109_v6, %v318_v28 }
  0x28   : > { %986 = vmatmul.mubr.msk.bf16.gmra.mrb[4].mxu0 %vm417_vm2, %v403_v4  ;;  %v387_v36 = vmax.f32 %v355_v27, 0.0  ;;  %v320_v38 = vsub.f32 %v281_v24, %v1104_v5  ;;  %v358_v42 = vmul.f32 %v1109_v6, %v319_v33  ;;  %v321_v43 = vsub.f32 %v282_v29, %v1104_v5 }
  0x29   : > { %989 = vmatprep.mubr.msk.bf16.mxu0 %vm417_vm2, %v404_v10  ;;  %v408_v40 = vpack.c.bf16 %v385_v31, %v384_v25  ;;  %v388_v41 = vmax.f32 %v356_v32, 0.0  ;;  %v389_v46 = vmax.f32 %v357_v37, 0.0  ;;  %v322_v48 = vsub.f32 %v283_v34, %v1104_v5  ;;  %v289_v10 = vld [vmem:[%s1088_s27 + $0xf8] sm:$0xff] }
  0x2a   : > { %v409_v45 = vpack.c.bf16 %v387_v36, %v386_v35  ;;  %v359_v47 = vmul.f32 %v1109_v6, %v320_v38  ;;  %v406_v51 = vpack.c.bf16 %v381_v20, %v380_v15  ;;  %v390_v52 = vmax.f32 %v358_v42, 0.0 }
  0x2b   : > { %997 = vmatprep.mubr.msk.bf16.mxu1 %vm417_vm2, %v408_v40  ;;  %v360_v53 = vmul.f32 %v1109_v6, %v321_v43  ;;  %v323_v54 = vsub.f32 %v284_v39, %v1104_v5  ;;  %v410_v55 = vpack.c.bf16 %v389_v46, %v388_v41  ;;  %v361_v57 = vmul.f32 %v1109_v6, %v322_v48 }
  0x2c   : > { %998 = vmatmul.mubr.msk.bf16.vlgmr.msra.gmra.mrb[0].mxu1 %vm417_vm2, %v409_v45  ;;  %v391_v56 = vmax.f32 %v359_v47, 0.0  ;;  %v324_v58 = vsub.f32 %v285_v44, %v1104_v5  ;;  %v325_v60 = vsub.f32 %v286_v49, %v1104_v5  ;;  %v326_v61 = vsub.f32 %v287_v50, %v1104_v5 }
  0x2d   : > { %v392_v59 = vmax.f32 %v360_v53, 0.0  ;;  %1001 = vmatprep.mubr.msk.bf16.mxu1 %vm417_vm2, %v410_v55  ;;  %v393_v62 = vmax.f32 %v361_v57, 0.0  ;;  %v382_v63 = vmax.f32 %v1165_v12, 0.0  ;;  %v383_v0 = vmax.f32 %v351_v21, 0.0 }
  0x2e   : > { %v411_v1 = vpack.c.bf16 %v391_v56, %v390_v52  ;;  %v362_v2 = vmul.f32 %v1109_v6, %v323_v54  ;;  %v363_v3 = vmul.f32 %v1109_v6, %v324_v58  ;;  %v364_v7 = vmul.f32 %v1109_v6, %v325_v60 }
  0x2f   : > { %v412_v4 = vpack.c.bf16 %v393_v62, %v392_v59  ;;  %v365_v8 = vmul.f32 %v1109_v6, %v326_v61  ;;  %v407_v11 = vpack.c.bf16 %v383_v0, %v382_v63  ;;  %v327_v14 = vsub.f32 %v288_v9, %v1104_v5 }
  0x30   : > { %990 = vmatmul.mubr.msk.bf16.gmra.mrb[8].mxu0 %vm417_vm2, %v405_v30  ;;  %v394_v13 = vmax.f32 %v362_v2, 0.0  ;;  %v395_v12 = vmax.f32 %v363_v3, 0.0  ;;  %v328_v15 = vsub.f32 %v289_v10, %v1104_v5  ;;  %v396_v16 = vmax.f32 %v364_v7, 0.0 }
  0x31   : > { %993 = vmatprep.mubr.msk.bf16.mxu0 %vm417_vm2, %v406_v51  ;;  %v397_v17 = vmax.f32 %v365_v8, 0.0  ;;  %v366_v19 = vmul.f32 %v1109_v6, %v327_v14 }
  0x32   : > { %v413_v18 = vpack.c.bf16 %v395_v12, %v394_v13  ;;  %v367_v20 = vmul.f32 %v1109_v6, %v328_v15 }
  0x33   : > { %v414_v21 = vpack.c.bf16 %v397_v17, %v396_v16  ;;  %v398_v22 = vmax.f32 %v366_v19, 0.0 }
  0x34   : > { %1002 = vmatmul.mubr.msk.bf16.gmra.mrb[4].mxu1 %vm417_vm2, %v411_v1  ;;  %v399_v5 = vmax.f32 %v367_v20, 0.0 }
  0x35   : > { %1005 = vmatprep.mubr.msk.bf16.mxu1 %vm417_vm2, %v412_v4 }
  0x36   : > { %v415_v23 = vpack.c.bf16 %v399_v5, %v398_v22 }
  0x38   : > { %994 = vmatmul.mubr.msk.bf16.gmra.mrb[12].mxu0 %vm417_vm2, %v407_v11 }
  0x3c   : > { %1006 = vmatmul.mubr.msk.bf16.gmra.mrb[8].mxu1 %vm417_vm2, %v413_v18 }
  0x3d   : > { %1009 = vmatprep.mubr.msk.bf16.mxu1 %vm417_vm2, %v414_v21 }
  0x44   : > { %1010 = vmatmul.mubr.msk.bf16.gmra.mrb[12].mxu1 %vm417_vm2, %v415_v23 }
  0xf3   : > { %v983_v24 = vpop.f32.mrb[0].mxu0 }
  0xf4   : > { %633 = vst.msk [vmem:[%s1093_s30 + $0x10] sm:$0xff] %vm417_vm2, %v983_v24  ;;  %v504_v25 = vpop.f32.mrb[1].mxu0  ;;  %v739_v28 = vmul.f32 %v983_v24, %v983_v24  ;;  %v667_v33 = vsel %vm417_vm2, %v983_v24, 0.0 }
  0xf5   : > { %631 = vst.msk [vmem:[%s1093_s30] sm:$0xff] %vm417_vm2, %v504_v25  ;;  %v737_v26 = vmul.f32 %v504_v25, %v504_v25  ;;  %v984_v27 = vpop.f32.mrb[2].mxu0  ;;  %v664_v29 = vsel %vm417_vm2, %v504_v25, 0.0 }
  0xf6   : > { %634 = vst.msk [vmem:[%s1093_s30 + $0x18] sm:$0xff] %vm417_vm2, %v984_v27  ;;  %v507_v6 = vpop.f32.mrb[3].mxu0  ;;  %v740_v35 = vmul.f32 %v984_v27, %v984_v27  ;;  %v772_v39 = vsel %vm417_vm2, %v739_v28, 0.0  ;;  %v669_v40 = vsel %vm417_vm2, %v984_v27, 0.0 }
  0xf7   : > { %632 = vst.msk [vmem:[%s1093_s30 + $0x8] sm:$0xff] %vm417_vm2, %v507_v6  ;;  %v665_v30 = vsel %vm417_vm2, %v507_v6, 0.0  ;;  %v738_v31 = vmul.f32 %v507_v6, %v507_v6  ;;  %v769_v34 = vsel %vm417_vm2, %v737_v26, 0.0 }
  0xf8   : > { %v666_v32 = vadd.f32 %v665_v30, %v664_v29  ;;  %v774_v45 = vsel %vm417_vm2, %v740_v35, 0.0 }
  0xf9   : > { %v770_v36 = vsel %vm417_vm2, %v738_v31, 0.0 }
  0xfa   : > { %v668_v37 = vadd.f32 %v667_v33, %v666_v32  ;;  %v771_v38 = vadd.f32 %v770_v36, %v769_v34 }
  0xfb   : > { %v987_v41 = vpop.f32.mrb[4].mxu0 }
  0xfc   : > { %v773_v42 = vadd.f32 %v772_v39, %v771_v38  ;;  %637 = vst.msk [vmem:[%s1093_s30 + $0x30] sm:$0xff] %vm417_vm2, %v987_v41  ;;  %v520_v43 = vpop.f32.mrb[5].mxu0  ;;  %v670_v44 = vadd.f32 %v669_v40, %v668_v37  ;;  %v743_v52 = vmul.f32 %v987_v41, %v987_v41  ;;  %v675_v59 = vsel %vm417_vm2, %v987_v41, 0.0 }
  0xfd   : > { %635 = vst.msk [vmem:[%s1093_s30 + $0x20] sm:$0xff] %vm417_vm2, %v520_v43  ;;  %v671_v46 = vsel %vm417_vm2, %v520_v43, 0.0  ;;  %v741_v47 = vmul.f32 %v520_v43, %v520_v43  ;;  %v988_v48 = vpop.f32.mrb[6].mxu0 }
  0xfe   : > { %v672_v49 = vadd.f32 %v671_v46, %v670_v44  ;;  %v775_v50 = vadd.f32 %v774_v45, %v773_v42  ;;  %638 = vst.msk [vmem:[%s1093_s30 + $0x38] sm:$0xff] %vm417_vm2, %v988_v48  ;;  %v523_v51 = vpop.f32.mrb[7].mxu0  ;;  %v744_v60 = vmul.f32 %v988_v48, %v988_v48  ;;  %v780_v2 = vsel %vm417_vm2, %v743_v52, 0.0 }
  0xff   : > { %v776_v53 = vsel %vm417_vm2, %v741_v47, 0.0  ;;  %636 = vst.msk [vmem:[%s1093_s30 + $0x28] sm:$0xff] %vm417_vm2, %v523_v51  ;;  %v673_v54 = vsel %vm417_vm2, %v523_v51, 0.0  ;;  %v742_v55 = vmul.f32 %v523_v51, %v523_v51  ;;  %v1251_v58 = vpop.f32.mrb[0].mxu1  ;;  %v677_v3 = vsel %vm417_vm2, %v988_v48, 0.0 }
 0x100   : > { %v777_v56 = vadd.f32 %v776_v53, %v775_v50  ;;  %v674_v57 = vadd.f32 %v673_v54, %v672_v49  ;;  %649 = vst.msk [vmem:[%s1093_s30 + $0x90] sm:$0xff] %vm417_vm2, %v1251_v58  ;;  %v1258_v62 = vpop.f32.mrb[1].mxu1  ;;  %v782_v11 = vsel %vm417_vm2, %v744_v60, 0.0 }
 0x101   : > { %v778_v61 = vsel %vm417_vm2, %v742_v55, 0.0  ;;  %647 = vst.msk [vmem:[%s1093_s30 + $0x80] sm:$0xff] %vm417_vm2, %v1258_v62  ;;  %v1263_v1 = vpop.f32.mrb[2].mxu1  ;;  %v753_v54 = vmul.f32 %v1258_v62, %v1258_v62 }
 0x102   : > { %v676_v63 = vadd.f32 %v675_v59, %v674_v57  ;;  %v779_v0 = vadd.f32 %v778_v61, %v777_v56  ;;  %650 = vst.msk [vmem:[%s1093_s30 + $0x98] sm:$0xff] %vm417_vm2, %v1263_v1  ;;  %v1270_v7 = vpop.f32.mrb[3].mxu1 }
 0x103   : > { %v991_v4 = vpop.f32.mrb[8].mxu0  ;;  %648 = vst.msk [vmem:[%s1093_s30 + $0x88] sm:$0xff] %vm417_vm2, %v1270_v7 }
 0x104   : > { %v781_v8 = vadd.f32 %v780_v2, %v779_v0  ;;  %641 = vst.msk [vmem:[%s1093_s30 + $0x50] sm:$0xff] %vm417_vm2, %v991_v4  ;;  %v536_v9 = vpop.f32.mrb[9].mxu0  ;;  %v678_v10 = vadd.f32 %v677_v3, %v676_v63  ;;  %v747_v18 = vmul.f32 %v991_v4, %v991_v4  ;;  %v683_v24 = vsel %vm417_vm2, %v991_v4, 0.0 }
 0x105   : > { %639 = vst.msk [vmem:[%s1093_s30 + $0x40] sm:$0xff] %vm417_vm2, %v536_v9  ;;  %v679_v13 = vsel %vm417_vm2, %v536_v9, 0.0  ;;  %v745_v12 = vmul.f32 %v536_v9, %v536_v9  ;;  %v992_v14 = vpop.f32.mrb[10].mxu0  ;;  %v695_v63 = vsel %vm417_vm2, %v1258_v62, 0.0  ;;  %v754_v9 = vmul.f32 %v1270_v7, %v1270_v7 }
 0x106   : > { %v680_v15 = vadd.f32 %v679_v13, %v678_v10  ;;  %v783_v16 = vadd.f32 %v782_v11, %v781_v8  ;;  %642 = vst.msk [vmem:[%s1093_s30 + $0x58] sm:$0xff] %vm417_vm2, %v992_v14  ;;  %v539_v17 = vpop.f32.mrb[11].mxu0  ;;  %v748_v25 = vmul.f32 %v992_v14, %v992_v14  ;;  %v788_v30 = vsel %vm417_vm2, %v747_v18, 0.0 }
 0x107   : > { %v784_v19 = vsel %vm417_vm2, %v745_v12, 0.0  ;;  %640 = vst.msk [vmem:[%s1093_s30 + $0x48] sm:$0xff] %vm417_vm2, %v539_v17  ;;  %v681_v20 = vsel %vm417_vm2, %v539_v17, 0.0  ;;  %v746_v21 = vmul.f32 %v539_v17, %v539_v17  ;;  %v1287_v23 = vpop.f32.mrb[4].mxu1  ;;  %v685_v31 = vsel %vm417_vm2, %v992_v14, 0.0 }
 0x108   : > { %v785_v22 = vadd.f32 %v784_v19, %v783_v16  ;;  %v682_v5 = vadd.f32 %v681_v20, %v680_v15  ;;  %653 = vst.msk [vmem:[%s1093_s30 + $0xb0] sm:$0xff] %vm417_vm2, %v1287_v23  ;;  %v1294_v27 = vpop.f32.mrb[5].mxu1  ;;  %v790_v37 = vsel %vm417_vm2, %v748_v25, 0.0  ;;  %v800_v8 = vsel %vm417_vm2, %v753_v54, 0.0 }
 0x109   : > { %v786_v26 = vsel %vm417_vm2, %v746_v21, 0.0  ;;  %651 = vst.msk [vmem:[%s1093_s30 + $0xa0] sm:$0xff] %vm417_vm2, %v1294_v27  ;;  %v1299_v29 = vpop.f32.mrb[6].mxu1  ;;  %v755_v62 = vmul.f32 %v1251_v58, %v1251_v58  ;;  %v697_v13 = vsel %vm417_vm2, %v1270_v7, 0.0  ;;  %v699_v16 = vsel %vm417_vm2, %v1251_v58, 0.0 }
 0x10a   : > { %v684_v6 = vadd.f32 %v683_v24, %v682_v5  ;;  %v787_v28 = vadd.f32 %v786_v26, %v785_v22  ;;  %654 = vst.msk [vmem:[%s1093_s30 + $0xb8] sm:$0xff] %vm417_vm2, %v1299_v29  ;;  %v1306_v33 = vpop.f32.mrb[7].mxu1  ;;  %v756_v17 = vmul.f32 %v1263_v1, %v1263_v1  ;;  %v802_v18 = vsel %vm417_vm2, %v754_v9, 0.0 }
 0x10b   : > { %v995_v32 = vpop.f32.mrb[12].mxu0  ;;  %652 = vst.msk [vmem:[%s1093_s30 + $0xa8] sm:$0xff] %vm417_vm2, %v1306_v33  ;;  %v757_v19 = vmul.f32 %v1294_v27, %v1294_v27  ;;  %v804_v58 = vsel %vm417_vm2, %v755_v62, 0.0  ;;  %v701_v5 = vsel %vm417_vm2, %v1263_v1, 0.0  ;;  %v703_v24 = vsel %vm417_vm2, %v1294_v27, 0.0 }
 0x10c   : > { %v789_v34 = vadd.f32 %v788_v30, %v787_v28  ;;  %645 = vst.msk [vmem:[%s1093_s30 + $0x70] sm:$0xff] %vm417_vm2, %v995_v32  ;;  %v552_v35 = vpop.f32.mrb[13].mxu0  ;;  %v686_v36 = vadd.f32 %v685_v31, %v684_v6  ;;  %v751_v44 = vmul.f32 %v995_v32, %v995_v32  ;;  %v691_v51 = vsel %vm417_vm2, %v995_v32, 0.0 }
 0x10d   : > { %643 = vst.msk [vmem:[%s1093_s30 + $0x60] sm:$0xff] %vm417_vm2, %v552_v35  ;;  %v687_v38 = vsel %vm417_vm2, %v552_v35, 0.0  ;;  %v749_v39 = vmul.f32 %v552_v35, %v552_v35  ;;  %v996_v40 = vpop.f32.mrb[14].mxu0  ;;  %v806_v28 = vsel %vm417_vm2, %v756_v17, 0.0  ;;  %v808_v30 = vsel %vm417_vm2, %v757_v19, 0.0 }
 0x10e   : > { %v688_v41 = vadd.f32 %v687_v38, %v686_v36  ;;  %v791_v42 = vadd.f32 %v790_v37, %v789_v34  ;;  %646 = vst.msk [vmem:[%s1093_s30 + $0x78] sm:$0xff] %vm417_vm2, %v996_v40  ;;  %v555_v43 = vpop.f32.mrb[15].mxu0  ;;  %v752_v52 = vmul.f32 %v996_v40, %v996_v40  ;;  %v796_v60 = vsel %vm417_vm2, %v751_v44, 0.0 }
 0x10f   : > { %v792_v45 = vsel %vm417_vm2, %v749_v39, 0.0  ;;  %644 = vst.msk [vmem:[%s1093_s30 + $0x68] sm:$0xff] %vm417_vm2, %v555_v43  ;;  %v689_v46 = vsel %vm417_vm2, %v555_v43, 0.0  ;;  %v750_v47 = vmul.f32 %v555_v43, %v555_v43  ;;  %v1323_v50 = vpop.f32.mrb[8].mxu1  ;;  %v693_v61 = vsel %vm417_vm2, %v996_v40, 0.0 }
 0x110   : > { %v793_v48 = vadd.f32 %v792_v45, %v791_v42  ;;  %v690_v49 = vadd.f32 %v689_v46, %v688_v41  ;;  %657 = vst.msk [vmem:[%s1093_s30 + $0xd0] sm:$0xff] %vm417_vm2, %v1323_v50  ;;  %v600_v55 = vpop.f32.mrb[9].mxu1  ;;  %v798_v4 = vsel %vm417_vm2, %v752_v52, 0.0  ;;  %v758_v31 = vmul.f32 %v1306_v33, %v1306_v33 }
 0x111   : > { %v794_v53 = vsel %vm417_vm2, %v750_v47, 0.0  ;;  %655 = vst.msk [vmem:[%s1093_s30 + $0xc0] sm:$0xff] %vm417_vm2, %v600_v55  ;;  %v1334_v59 = vpop.f32.mrb[10].mxu1  ;;  %v759_v27 = vmul.f32 %v1287_v23, %v1287_v23  ;;  %v705_v34 = vsel %vm417_vm2, %v1306_v33, 0.0  ;;  %v707_v37 = vsel %vm417_vm2, %v1287_v23, 0.0 }
 0x112   : > { %v692_v56 = vadd.f32 %v691_v51, %v690_v49  ;;  %v795_v57 = vadd.f32 %v794_v53, %v793_v48  ;;  %658 = vst.msk [vmem:[%s1093_s30 + $0xd8] sm:$0xff] %vm417_vm2, %v1334_v59  ;;  %v603_v0 = vpop.f32.mrb[11].mxu1  ;;  %v760_v38 = vmul.f32 %v1299_v29, %v1299_v29  ;;  %v810_v39 = vsel %vm417_vm2, %v758_v31, 0.0 }
 0x113   : > { %656 = vst.msk [vmem:[%s1093_s30 + $0xc8] sm:$0xff] %vm417_vm2, %v603_v0  ;;  %v761_v40 = vmul.f32 %v600_v55, %v600_v55  ;;  %v812_v43 = vsel %vm417_vm2, %v759_v27, 0.0  ;;  %v709_v44 = vsel %vm417_vm2, %v1299_v29, 0.0  ;;  %v711_v33 = vsel %vm417_vm2, %v600_v55, 0.0 }
 0x114   : > { %v797_v2 = vadd.f32 %v796_v60, %v795_v57  ;;  %v694_v3 = vadd.f32 %v693_v61, %v692_v56  ;;  %v814_v47 = vsel %vm417_vm2, %v760_v38, 0.0  ;;  %v762_v48 = vmul.f32 %v603_v0, %v603_v0 }
 0x115   : > { %v816_v23 = vsel %vm417_vm2, %v761_v40, 0.0  ;;  %v763_v52 = vmul.f32 %v1323_v50, %v1323_v50  ;;  %v713_v53 = vsel %vm417_vm2, %v603_v0, 0.0  ;;  %v715_v29 = vsel %vm417_vm2, %v1323_v50, 0.0 }
 0x116   : > { %v696_v10 = vadd.f32 %v695_v63, %v694_v3  ;;  %v799_v11 = vadd.f32 %v798_v4, %v797_v2  ;;  %v764_v55 = vmul.f32 %v1334_v59, %v1334_v59  ;;  %v818_v57 = vsel %vm417_vm2, %v762_v48, 0.0 }
 0x117   : > { %v1353_v15 = vpop.f32.mrb[12].mxu1  ;;  %v820_v2 = vsel %vm417_vm2, %v763_v52, 0.0  ;;  %v717_v3 = vsel %vm417_vm2, %v1334_v59, 0.0 }
 0x118   : > { %v801_v12 = vadd.f32 %v800_v8, %v799_v11  ;;  %v698_v14 = vadd.f32 %v697_v13, %v696_v10  ;;  %661 = vst.msk [vmem:[%s1093_s30 + $0xf0] sm:$0xff] %vm417_vm2, %v1353_v15  ;;  %v616_v7 = vpop.f32.mrb[13].mxu1  ;;  %v822_v9 = vsel %vm417_vm2, %v764_v55, 0.0  ;;  %v767_v13 = vmul.f32 %v1353_v15, %v1353_v15 }
 0x119   : > { %659 = vst.msk [vmem:[%s1093_s30 + $0xe0] sm:$0xff] %vm417_vm2, %v616_v7  ;;  %v1367_v22 = vpop.f32.mrb[14].mxu1  ;;  %v765_v60 = vmul.f32 %v616_v7, %v616_v7  ;;  %v719_v0 = vsel %vm417_vm2, %v616_v7, 0.0  ;;  %v723_v59 = vsel %vm417_vm2, %v1353_v15, 0.0 }
 0x11a   : > { %v700_v20 = vadd.f32 %v699_v16, %v698_v14  ;;  %v803_v21 = vadd.f32 %v802_v18, %v801_v12  ;;  %662 = vst.msk [vmem:[%s1093_s30 + $0xf8] sm:$0xff] %vm417_vm2, %v1367_v22  ;;  %v619_v25 = vpop.f32.mrb[15].mxu1  ;;  %v768_v17 = vmul.f32 %v1367_v22, %v1367_v22 }
 0x11b   : > { %660 = vst.msk [vmem:[%s1093_s30 + $0xe8] sm:$0xff] %vm417_vm2, %v619_v25  ;;  %v824_v50 = vsel %vm417_vm2, %v765_v60, 0.0  ;;  %v766_v10 = vmul.f32 %v619_v25, %v619_v25  ;;  %v721_v12 = vsel %vm417_vm2, %v619_v25, 0.0 }
 0x11c   : > { %v805_v26 = vadd.f32 %v804_v58, %v803_v21  ;;  %v702_v6 = vadd.f32 %v701_v5, %v700_v20  ;;  %v828_v20 = vsel %vm417_vm2, %v767_v13, 0.0  ;;  %v725_v21 = vsel %vm417_vm2, %v1367_v22, 0.0 }
 0x11d   : > { %v826_v18 = vsel %vm417_vm2, %v766_v10, 0.0 }
 0x11e   : > { %v704_v32 = vadd.f32 %v703_v24, %v702_v6  ;;  %v807_v1 = vadd.f32 %v806_v28, %v805_v26  ;;  %v830_v24 = vsel %vm417_vm2, %v768_v17, 0.0 }
 0x120   : > { %v809_v35 = vadd.f32 %v808_v30, %v807_v1  ;;  %v706_v36 = vadd.f32 %v705_v34, %v704_v32  ;;  %v663_v34 = vld [vmem:[#allocation2] sm:$0x1] }
 0x122   : > { %v708_v41 = vadd.f32 %v707_v37, %v706_v36  ;;  %v811_v42 = vadd.f32 %v810_v39, %v809_v35  ;;  %v736_v37 = vld [vmem:[#allocation3] sm:$0x1] }
 0x124   : > { %v813_v45 = vadd.f32 %v812_v43, %v811_v42  ;;  %v710_v46 = vadd.f32 %v709_v44, %v708_v41 }
 0x126   : > { %v712_v49 = vadd.f32 %v711_v33, %v710_v46  ;;  %v815_v51 = vadd.f32 %v814_v47, %v813_v45 }
 0x128   : > { %v817_v54 = vadd.f32 %v816_v23, %v815_v51  ;;  %v714_v56 = vadd.f32 %v713_v53, %v712_v49 }
 0x12a   : > { %v716_v61 = vadd.f32 %v715_v29, %v714_v56  ;;  %v819_v63 = vadd.f32 %v818_v57, %v817_v54 }
 0x12c   : > { %v821_v4 = vadd.f32 %v820_v2, %v819_v63  ;;  %v718_v8 = vadd.f32 %v717_v3, %v716_v61 }
 0x12e   : > { %v720_v11 = vadd.f32 %v719_v0, %v718_v8  ;;  %v823_v62 = vadd.f32 %v822_v9, %v821_v4 }
 0x130   : > { %v825_v14 = vadd.f32 %v824_v50, %v823_v62  ;;  %v722_v16 = vadd.f32 %v721_v12, %v720_v11 }
 0x132   : > { %v724_v19 = vadd.f32 %v723_v59, %v722_v16  ;;  %v827_v7 = vadd.f32 %v826_v18, %v825_v14 }
 0x134   : > { %v726_v58 = vadd.f32 %v725_v21, %v724_v19  ;;  %v829_v5 = vadd.f32 %v828_v20, %v827_v7 }
 0x136   : > { %v727_v25 = vrot.slane %v726_v58, 4  ;;  %v831_v26 = vadd.f32 %v830_v24, %v829_v5 }
 0x138   : > { %v728_v6 = vadd.f32 %v727_v25, %v726_v58  ;;  %v832_v15 = vrot.slane %v831_v26, 4 }
 0x13a   : > { %v729_v28 = vrot.slane %v728_v6, 2  ;;  %v833_v30 = vadd.f32 %v832_v15, %v831_v26 }
 0x13c   : > { %v730_v31 = vadd.f32 %v729_v28, %v728_v6  ;;  %v834_v32 = vrot.slane %v833_v30, 2 }
 0x13e   : > { %v731_v1 = vrot.slane %v730_v31, 1  ;;  %v835_v27 = vadd.f32 %v834_v32, %v833_v30 }
 0x140   : > { %v732_v35 = vadd.f32 %v731_v1, %v730_v31  ;;  %v836_v36 = vrot.slane %v835_v27, 1  ;;  %843 = sbr.rel (%p959_p5) target bundleno = 369 (0x171), region = 44 }
 0x142   : > { %v733_v22 = vadd.f32 %v732_v35, %v663_v34  ;;  %v837_v38 = vadd.f32 %v836_v36, %v835_v27 }
 0x144   : > { %735 = vst.msk [vmem:[#allocation2] sm:$0x1] %vm734_vm3, %v733_v22  ;;  %v838_v39 = vadd.f32 %v837_v38, %v736_v37 }
 0x146   : > { %839 = vst.msk [vmem:[#allocation3] sm:$0x1] %vm734_vm3, %v838_v39 }
 0x14b   : > { %v844_v40 = vld [vmem:[#allocation2] sm:$0x1] }
 0x14c   : > { %v845_v42 = vmul.f32 0.001953125, %v844_v40 }
 0x14d   : > { %v846_v41 = vld [vmem:[#allocation3] sm:$0x1] }
 0x14e   : > { %v847_v43 = vmul.f32 0.001953125, %v846_v41  ;;  %v848_v44 = vmul.f32 %v845_v42, %v845_v42  ;;  %851 = vst.msk [vmem:[%s1443_s5] sm:$0x1] %vm734_vm3, %v845_v42 }
 0x150   : > { %v849_v33 = vsub.f32 %v847_v43, %v848_v44 }
 0x152   : > { %v850_v45 = vmax.f32 %v849_v33, 0.0 }
 0x154   : > { %1026 = vrsqrt.f32 %v850_v45  ;;  %vm854_vm4 = vcmp.eq.f32.partialorder %v850_v45, inf  ;;  %v857_v47 = vand.u32 2147483648, %v850_v45  ;;  %vm856_vm5 = vcmp.eq.f32.partialorder %v850_v45, 0.0 }
 0x15e   : > { %v1027_v46 = vpop.eup %1026 }
 0x15f   : > { %v853_v23 = vmul.f32 %v1027_v46, %v850_v45 }
 0x161   : > { %v855_v48 = vsel %vm854_vm4, %v850_v45, %v853_v23 }
 0x162   : > { %v858_v49 = vsel %vm856_vm5, %v857_v47, %v855_v48 }
 0x163   : > { %v859_v51 = vadd.f32 1e-06, %v858_v49 }
 0x165   : > { %1028 = vrcp.f32 %v859_v51 }
 0x16f   : > { %v1029_v52 = vpop.eup %1028 }
 0x170   : > { %862 = vst.msk [vmem:[%s1444_s6] sm:$0x1] %vm734_vm3, %v1029_v52 }
 0x171 PF: > { %s17_s21 = sadd.s32 1, %s1036_s21  }
 0x172   : > { %p14_p6 = scmp.ge.s32.totalorder %s17_s21, 4  }
 0x174   :  { %16 = sbr.rel (!%p14_p6) target bundleno = 1 (0x1), region = 90 }

// kernel: flow_step_forward.10
= control target key start
LH: loop header
LB: loop body
LE: loop exit
PB: predicated region body
PF: predicated region fallthrough
CT: control target
= control target key end

     0   :  { %s646_s12 = smov 0   ;;  %s841_s0 = inlined_call_operand.vmem [shape: f32[512,8], index: 0, kind: input, shape index: {}]   ;;  %s842_s1 = inlined_call_operand.vmem [shape: f32[1,8], index: 1, kind: input, shape index: {}]   ;;  %s843_s2 = inlined_call_operand.vmem [shape: f32[1,8], index: 2, kind: input, shape index: {}]   ;;  %s844_s3 = inlined_call_operand.vmem [shape: bf16[512,8], index: 3, kind: output, shape index: {}]  }
   0x1 LB: > { %s533_s13 = sadd.s32 4294967295, %s624_s12   ;;  %p537_p0 = scmp.ge.s32.totalorder %s624_s12, 1  ;;  %s624_s12 = sphi %s646_s12, %s13_s12  }
   0x2   : > { %p138_p1 = scmp.lt.s32.totalorder %s624_s12, 3 }
   0x4   : > { %p139_p2 = pnand %p537_p0, %p138_p1 }
   0x5   : > { %s538_s14 = sshll.u32 (!%p139_p2), %s533_s13, 5  ;;  %v660_v0 = vld [vmem:[%s842_s1] ss:$0 sm:$0xff] (!%p139_p2)  ;;  %vm444_vm0 = vcmask (!%p139_p2), 60416  }
   0x6   : > { %142 = sbr.rel (%p139_p2) target bundleno = 56 (0x38), region = 32  ;;  %p163_p3 = scmp.lt.s32.totalorder (!%p139_p2), %s538_s14, 63  ;;  %v670_v1 = vld [vmem:[%s843_s2] ss:$0 sm:$0xff] (!%p139_p2) }
   0xd   : > { %s846_s14 = smov (!%p163_p3, %s538_s14), 63 }
   0xe   : > { %s539_s15 = sshll.u32 %s846_s14, 3  ;;  %s541_s23 = sshll.u32 %s846_s14, 2 }
   0xf   : > { %s665_s20 = scalar_lea.vmem %s841_s0, %s539_s15  ;;  %s699_s26 = scalar_lea.vmem %s844_s3, %s541_s23 }
  0x10   : > { %v174_v2 = vld [vmem:[%s665_s20] sm:$0xff]  ;;  %v175_v3 = vld [vmem:[%s665_s20 + $0x8] sm:$0xff]  ;;  %v176_v4 = vld [vmem:[%s665_s20 + $0x10] sm:$0xff] }
  0x11   : > { %v213_v5 = vsub.f32 %v174_v2, %v660_v0  ;;  %v214_v6 = vsub.f32 %v175_v3, %v660_v0  ;;  %v215_v7 = vsub.f32 %v176_v4, %v660_v0  ;;  %v177_v8 = vld [vmem:[%s665_s20 + $0x18] sm:$0xff]  ;;  %v178_v9 = vld [vmem:[%s665_s20 + $0x20] sm:$0xff]  ;;  %v179_v10 = vld [vmem:[%s665_s20 + $0x28] sm:$0xff] }
  0x12   : > { %v216_v11 = vsub.f32 %v177_v8, %v660_v0  ;;  %v217_v12 = vsub.f32 %v178_v9, %v660_v0  ;;  %v218_v13 = vsub.f32 %v179_v10, %v660_v0  ;;  %v180_v14 = vld [vmem:[%s665_s20 + $0x30] sm:$0xff]  ;;  %v181_v15 = vld [vmem:[%s665_s20 + $0x38] sm:$0xff]  ;;  %v182_v32 = vld [vmem:[%s665_s20 + $0x40] sm:$0xff] }
  0x13   : > { %v252_v16 = vmul.f32 %v670_v1, %v213_v5  ;;  %v253_v17 = vmul.f32 %v670_v1, %v214_v6  ;;  %v254_v18 = vmul.f32 %v670_v1, %v215_v7  ;;  %v219_v19 = vsub.f32 %v180_v14, %v660_v0  ;;  %v183_v33 = vld [vmem:[%s665_s20 + $0x48] sm:$0xff]  ;;  %v184_v34 = vld [vmem:[%s665_s20 + $0x50] sm:$0xff]  ;;  %v185_v39 = vld [vmem:[%s665_s20 + $0x58] sm:$0xff] }
  0x14   : > { %v255_v20 = vmul.f32 %v670_v1, %v216_v11  ;;  %v256_v21 = vmul.f32 %v670_v1, %v217_v12  ;;  %v257_v22 = vmul.f32 %v670_v1, %v218_v13  ;;  %v220_v23 = vsub.f32 %v181_v15, %v660_v0  ;;  %v186_v40 = vld [vmem:[%s665_s20 + $0x60] sm:$0xff]  ;;  %v187_v41 = vld [vmem:[%s665_s20 + $0x68] sm:$0xff]  ;;  %v188_v46 = vld [vmem:[%s665_s20 + $0x70] sm:$0xff] }
  0x15   : > { %v284_v24 = vmax.f32 %v252_v16, 0.0  ;;  %v285_v25 = vmax.f32 %v253_v17, 0.0  ;;  %v286_v26 = vmax.f32 %v254_v18, 0.0  ;;  %v258_v27 = vmul.f32 %v670_v1, %v219_v19  ;;  %v189_v51 = vld [vmem:[%s665_s20 + $0x78] sm:$0xff]  ;;  %v190_v10 = vld [vmem:[%s665_s20 + $0x80] sm:$0xff]  ;;  %v191_v11 = vld [vmem:[%s665_s20 + $0x88] sm:$0xff] }
  0x16   : > { %v287_v28 = vmax.f32 %v255_v20, 0.0  ;;  %v288_v29 = vmax.f32 %v256_v21, 0.0  ;;  %v289_v30 = vmax.f32 %v257_v22, 0.0  ;;  %v259_v31 = vmul.f32 %v670_v1, %v220_v23  ;;  %v192_v12 = vld [vmem:[%s665_s20 + $0x90] sm:$0xff]  ;;  %v193_v17 = vld [vmem:[%s665_s20 + $0x98] sm:$0xff]  ;;  %v194_v18 = vld [vmem:[%s665_s20 + $0xa0] sm:$0xff] }
  0x17   : > { %v578_v35 = vpack.c.bf16 %v284_v24, %v284_v24  ;;  %v579_v36 = vpack.c.bf16 %v285_v25, %v285_v25  ;;  %v580_v37 = vpack.c.bf16 %v286_v26, %v286_v26  ;;  %v290_v38 = vmax.f32 %v258_v27, 0.0  ;;  %v195_v19 = vld [vmem:[%s665_s20 + $0xa8] sm:$0xff]  ;;  %v196_v24 = vld [vmem:[%s665_s20 + $0xb0] sm:$0xff] }
  0x18   : > { %v581_v42 = vpack.c.bf16 %v287_v28, %v287_v28  ;;  %v582_v43 = vpack.c.bf16 %v288_v29, %v288_v29  ;;  %v583_v44 = vpack.c.bf16 %v289_v30, %v289_v30  ;;  %v291_v45 = vmax.f32 %v259_v31, 0.0  ;;  %v197_v29 = vld [vmem:[%s665_s20 + $0xb8] sm:$0xff] }
  0x19   : > { %445 = vst.msk [vmem:[%s699_s26] sm:$0xf] %vm444_vm0, %v578_v35  ;;  %446 = vst.msk [vmem:[%s699_s26 + $0x4] sm:$0xf] %vm444_vm0, %v579_v36  ;;  %v584_v47 = vpack.c.bf16 %v290_v38, %v290_v38  ;;  %v221_v48 = vsub.f32 %v182_v32, %v660_v0  ;;  %v222_v49 = vsub.f32 %v183_v33, %v660_v0 }
  0x1a   : > { %447 = vst.msk [vmem:[%s699_s26 + $0x8] sm:$0xf] %vm444_vm0, %v580_v37  ;;  %v223_v50 = vsub.f32 %v184_v34, %v660_v0  ;;  %448 = vst.msk [vmem:[%s699_s26 + $0xc] sm:$0xf] %vm444_vm0, %v581_v42  ;;  %v585_v52 = vpack.c.bf16 %v291_v45, %v291_v45  ;;  %v224_v53 = vsub.f32 %v185_v39, %v660_v0 }
  0x1b   : > { %449 = vst.msk [vmem:[%s699_s26 + $0x10] sm:$0xf] %vm444_vm0, %v582_v43  ;;  %450 = vst.msk [vmem:[%s699_s26 + $0x14] sm:$0xf] %vm444_vm0, %v583_v44  ;;  %v225_v54 = vsub.f32 %v186_v40, %v660_v0  ;;  %v226_v55 = vsub.f32 %v187_v41, %v660_v0  ;;  %v260_v56 = vmul.f32 %v670_v1, %v221_v48 }
  0x1c   : > { %451 = vst.msk [vmem:[%s699_s26 + $0x18] sm:$0xf] %vm444_vm0, %v584_v47  ;;  %v261_v57 = vmul.f32 %v670_v1, %v222_v49  ;;  %v262_v58 = vmul.f32 %v670_v1, %v223_v50  ;;  %v227_v59 = vsub.f32 %v188_v46, %v660_v0  ;;  %452 = vst.msk [vmem:[%s699_s26 + $0x1c] sm:$0xf] %vm444_vm0, %v585_v52  ;;  %v198_v50 = vld [vmem:[%s665_s20 + $0xc0] sm:$0xff]  ;;  %v200_v52 = vld [vmem:[%s665_s20 + $0xd0] sm:$0xff] }
  0x1d   : > { %v263_v60 = vmul.f32 %v670_v1, %v224_v53  ;;  %v264_v61 = vmul.f32 %v670_v1, %v225_v54  ;;  %v265_v62 = vmul.f32 %v670_v1, %v226_v55  ;;  %v228_v63 = vsub.f32 %v189_v51, %v660_v0  ;;  %v199_v51 = vld [vmem:[%s665_s20 + $0xc8] sm:$0xff] }
  0x1e   : > { %v292_v2 = vmax.f32 %v260_v56, 0.0  ;;  %v293_v3 = vmax.f32 %v261_v57, 0.0  ;;  %v294_v4 = vmax.f32 %v262_v58, 0.0  ;;  %v266_v5 = vmul.f32 %v670_v1, %v227_v59  ;;  %v201_v57 = vld [vmem:[%s665_s20 + $0xd8] sm:$0xff]  ;;  %v202_v58 = vld [vmem:[%s665_s20 + $0xe0] sm:$0xff]  ;;  %v203_v59 = vld [vmem:[%s665_s20 + $0xe8] sm:$0xff] }
  0x1f   : > { %v295_v6 = vmax.f32 %v263_v60, 0.0  ;;  %v296_v7 = vmax.f32 %v264_v61, 0.0  ;;  %v297_v8 = vmax.f32 %v265_v62, 0.0  ;;  %v267_v9 = vmul.f32 %v670_v1, %v228_v63 }
  0x20   : > { %v586_v13 = vpack.c.bf16 %v292_v2, %v292_v2  ;;  %v587_v14 = vpack.c.bf16 %v293_v3, %v293_v3  ;;  %v588_v15 = vpack.c.bf16 %v294_v4, %v294_v4  ;;  %v298_v16 = vmax.f32 %v266_v5, 0.0  ;;  %v204_v2 = vld [vmem:[%s665_s20 + $0xf0] sm:$0xff] }
  0x21   : > { %v589_v20 = vpack.c.bf16 %v295_v6, %v295_v6  ;;  %v590_v21 = vpack.c.bf16 %v296_v7, %v296_v7  ;;  %v591_v22 = vpack.c.bf16 %v297_v8, %v297_v8  ;;  %v299_v23 = vmax.f32 %v267_v9, 0.0  ;;  %v205_v7 = vld [vmem:[%s665_s20 + $0xf8] sm:$0xff] }
  0x22   : > { %453 = vst.msk [vmem:[%s699_s26 + $0x20] sm:$0xf] %vm444_vm0, %v586_v13  ;;  %454 = vst.msk [vmem:[%s699_s26 + $0x24] sm:$0xf] %vm444_vm0, %v587_v14  ;;  %v592_v25 = vpack.c.bf16 %v298_v16, %v298_v16  ;;  %v229_v26 = vsub.f32 %v190_v10, %v660_v0  ;;  %v230_v27 = vsub.f32 %v191_v11, %v660_v0 }
  0x23   : > { %455 = vst.msk [vmem:[%s699_s26 + $0x28] sm:$0xf] %vm444_vm0, %v588_v15  ;;  %v231_v28 = vsub.f32 %v192_v12, %v660_v0  ;;  %456 = vst.msk [vmem:[%s699_s26 + $0x2c] sm:$0xf] %vm444_vm0, %v589_v20  ;;  %v593_v30 = vpack.c.bf16 %v299_v23, %v299_v23  ;;  %v232_v31 = vsub.f32 %v193_v17, %v660_v0 }
  0x24   : > { %457 = vst.msk [vmem:[%s699_s26 + $0x30] sm:$0xf] %vm444_vm0, %v590_v21  ;;  %458 = vst.msk [vmem:[%s699_s26 + $0x34] sm:$0xf] %vm444_vm0, %v591_v22  ;;  %v233_v32 = vsub.f32 %v194_v18, %v660_v0  ;;  %v234_v33 = vsub.f32 %v195_v19, %v660_v0  ;;  %v268_v34 = vmul.f32 %v670_v1, %v229_v26 }
  0x25   : > { %459 = vst.msk [vmem:[%s699_s26 + $0x38] sm:$0xf] %vm444_vm0, %v592_v25  ;;  %v269_v35 = vmul.f32 %v670_v1, %v230_v27  ;;  %v270_v36 = vmul.f32 %v670_v1, %v231_v28  ;;  %v235_v37 = vsub.f32 %v196_v24, %v660_v0  ;;  %460 = vst.msk [vmem:[%s699_s26 + $0x3c] sm:$0xf] %vm444_vm0, %v593_v30 }
  0x26   : > { %v271_v38 = vmul.f32 %v670_v1, %v232_v31  ;;  %v272_v39 = vmul.f32 %v670_v1, %v233_v32  ;;  %v273_v40 = vmul.f32 %v670_v1, %v234_v33  ;;  %v236_v41 = vsub.f32 %v197_v29, %v660_v0 }
  0x27   : > { %v300_v42 = vmax.f32 %v268_v34, 0.0  ;;  %v301_v43 = vmax.f32 %v269_v35, 0.0  ;;  %v302_v44 = vmax.f32 %v270_v36, 0.0  ;;  %v274_v45 = vmul.f32 %v670_v1, %v235_v37 }
  0x28   : > { %v303_v46 = vmax.f32 %v271_v38, 0.0  ;;  %v304_v47 = vmax.f32 %v272_v39, 0.0  ;;  %v305_v48 = vmax.f32 %v273_v40, 0.0  ;;  %v275_v49 = vmul.f32 %v670_v1, %v236_v41 }
  0x29   : > { %v594_v53 = vpack.c.bf16 %v300_v42, %v300_v42  ;;  %v595_v54 = vpack.c.bf16 %v301_v43, %v301_v43  ;;  %v596_v55 = vpack.c.bf16 %v302_v44, %v302_v44  ;;  %v306_v56 = vmax.f32 %v274_v45, 0.0 }
  0x2a   : > { %v597_v60 = vpack.c.bf16 %v303_v46, %v303_v46  ;;  %v598_v61 = vpack.c.bf16 %v304_v47, %v304_v47  ;;  %v599_v62 = vpack.c.bf16 %v305_v48, %v305_v48  ;;  %v307_v63 = vmax.f32 %v275_v49, 0.0 }
  0x2b   : > { %461 = vst.msk [vmem:[%s699_s26 + $0x40] sm:$0xf] %vm444_vm0, %v594_v53  ;;  %462 = vst.msk [vmem:[%s699_s26 + $0x44] sm:$0xf] %vm444_vm0, %v595_v54  ;;  %v600_v3 = vpack.c.bf16 %v306_v56, %v306_v56  ;;  %v237_v4 = vsub.f32 %v198_v50, %v660_v0  ;;  %v238_v5 = vsub.f32 %v199_v51, %v660_v0 }
  0x2c   : > { %463 = vst.msk [vmem:[%s699_s26 + $0x48] sm:$0xf] %vm444_vm0, %v596_v55  ;;  %v239_v6 = vsub.f32 %v200_v52, %v660_v0  ;;  %464 = vst.msk [vmem:[%s699_s26 + $0x4c] sm:$0xf] %vm444_vm0, %v597_v60  ;;  %v601_v8 = vpack.c.bf16 %v307_v63, %v307_v63  ;;  %v240_v9 = vsub.f32 %v201_v57, %v660_v0 }
  0x2d   : > { %465 = vst.msk [vmem:[%s699_s26 + $0x50] sm:$0xf] %vm444_vm0, %v598_v61  ;;  %466 = vst.msk [vmem:[%s699_s26 + $0x54] sm:$0xf] %vm444_vm0, %v599_v62  ;;  %v241_v10 = vsub.f32 %v202_v58, %v660_v0  ;;  %v242_v11 = vsub.f32 %v203_v59, %v660_v0  ;;  %v276_v12 = vmul.f32 %v670_v1, %v237_v4 }
  0x2e   : > { %467 = vst.msk [vmem:[%s699_s26 + $0x58] sm:$0xf] %vm444_vm0, %v600_v3  ;;  %v277_v13 = vmul.f32 %v670_v1, %v238_v5  ;;  %v278_v14 = vmul.f32 %v670_v1, %v239_v6  ;;  %v243_v15 = vsub.f32 %v204_v2, %v660_v0  ;;  %468 = vst.msk [vmem:[%s699_s26 + $0x5c] sm:$0xf] %vm444_vm0, %v601_v8 }
  0x2f   : > { %v279_v16 = vmul.f32 %v670_v1, %v240_v9  ;;  %v280_v17 = vmul.f32 %v670_v1, %v241_v10  ;;  %v281_v18 = vmul.f32 %v670_v1, %v242_v11  ;;  %v244_v19 = vsub.f32 %v205_v7, %v660_v0 }
  0x30   : > { %v308_v20 = vmax.f32 %v276_v12, 0.0  ;;  %v309_v21 = vmax.f32 %v277_v13, 0.0  ;;  %v310_v22 = vmax.f32 %v278_v14, 0.0  ;;  %v282_v23 = vmul.f32 %v670_v1, %v243_v15 }
  0x31   : > { %v311_v24 = vmax.f32 %v279_v16, 0.0  ;;  %v312_v25 = vmax.f32 %v280_v17, 0.0  ;;  %v313_v26 = vmax.f32 %v281_v18, 0.0  ;;  %v283_v27 = vmul.f32 %v670_v1, %v244_v19 }
  0x32   : > { %v602_v28 = vpack.c.bf16 %v308_v20, %v308_v20  ;;  %v603_v29 = vpack.c.bf16 %v309_v21, %v309_v21  ;;  %v604_v0 = vpack.c.bf16 %v310_v22, %v310_v22  ;;  %v314_v30 = vmax.f32 %v282_v23, 0.0 }
  0x33   : > { %v605_v31 = vpack.c.bf16 %v311_v24, %v311_v24  ;;  %v606_v32 = vpack.c.bf16 %v312_v25, %v312_v25  ;;  %v607_v33 = vpack.c.bf16 %v313_v26, %v313_v26  ;;  %v315_v34 = vmax.f32 %v283_v27, 0.0 }
  0x34   : > { %469 = vst.msk [vmem:[%s699_s26 + $0x60] sm:$0xf] %vm444_vm0, %v602_v28  ;;  %470 = vst.msk [vmem:[%s699_s26 + $0x64] sm:$0xf] %vm444_vm0, %v603_v29  ;;  %v608_v35 = vpack.c.bf16 %v314_v30, %v314_v30 }
  0x35   : > { %471 = vst.msk [vmem:[%s699_s26 + $0x68] sm:$0xf] %vm444_vm0, %v604_v0  ;;  %472 = vst.msk [vmem:[%s699_s26 + $0x6c] sm:$0xf] %vm444_vm0, %v605_v31  ;;  %v609_v1 = vpack.c.bf16 %v315_v34, %v315_v34 }
  0x36   : > { %473 = vst.msk [vmem:[%s699_s26 + $0x70] sm:$0xf] %vm444_vm0, %v606_v32  ;;  %474 = vst.msk [vmem:[%s699_s26 + $0x74] sm:$0xf] %vm444_vm0, %v607_v33 }
  0x37   : > { %475 = vst.msk [vmem:[%s699_s26 + $0x78] sm:$0xf] %vm444_vm0, %v608_v35  ;;  %476 = vst.msk [vmem:[%s699_s26 + $0x7c] sm:$0xf] %vm444_vm0, %v609_v1 }
  0x38 PF: > { %s13_s12 = sadd.s32 1, %s624_s12  }
  0x39   : > { %p10_p4 = scmp.ge.s32.totalorder %s13_s12, 4  }
  0x3b   :  { %12 = sbr.rel (!%p10_p4) target bundleno = 1 (0x1), region = 62 }

// kernel: flow_step_forward.11
= control target key start
LH: loop header
LB: loop body
LE: loop exit
PB: predicated region body
PF: predicated region fallthrough
CT: control target
= control target key end

     0   :  { %s1999_s21 = smov 0   ;;  %s2603_s0 = inlined_call_operand.vmem [shape: bf16[512,72], index: 0, kind: input, shape index: {}]   ;;  %s2604_s1 = inlined_call_operand.vmem [shape: f32[512,2], index: 1, kind: input, shape index: {}]   ;;  %s2605_s2 = inlined_call_operand.vmem [shape: bf16[72,4], index: 2, kind: input, shape index: {}]   ;;  %s2606_s3 = inlined_call_operand.vmem [shape: f32[1,4], index: 3, kind: input, shape index: {}]   ;;  %s2607_s4 = inlined_call_operand.vmem [shape: f32[1,4], index: 4, kind: input, shape index: {}]   ;;  %s2608_s5 = inlined_call_operand.vmem [shape: f32[512,2], index: 5, kind: output, shape index: {0}]   ;;  %s2609_s6 = inlined_call_operand.vmem [shape: f32[512,1], index: 6, kind: output, shape index: {1}]  }
   0x1 LB: > { %s1604_s22 = sadd.s32 4294967295, %s1961_s21   ;;  %p1608_p0 = scmp.ge.s32.totalorder %s1961_s21, 1  ;;  %s1961_s21 = sphi %s1999_s21, %s17_s21  }
   0x2   : > { %p227_p1 = scmp.lt.s32.totalorder %s1961_s21, 3 }
   0x4   : > { %p228_p2 = pnand %p1608_p0, %p227_p1 }
   0x5   : > { %v1742_v0 = vld [vmem:[%s2605_s2] sm:$0xff] (!%p228_p2)   ;;  %v1743_v1 = vld [vmem:[%s2605_s2 + $0x8] sm:$0xff] (!%p228_p2)   ;;  %s1609_s27 = sshll.u32 (!%p228_p2), %s1604_s22, 5  ;;  %v1744_v2 = vld [vmem:[%s2605_s2 + $0x10] sm:$0xff] (!%p228_p2)   ;;  %vm447_vm0 = vcmask (!%p228_p2), 588800   ;;  %vm496_vm1 = vcmask (!%p228_p2), 1043456  }
   0x6   : > { %231 = sbr.rel (%p228_p2) target bundleno = 662 (0x296), region = 40  ;;  %1679 = vmatprep.subr.bf16.mxu0 (!%p228_p2), %v1742_v0  ;;  %1721 = vmatprep.subr.bf16.mxu1 (!%p228_p2), %v1742_v0  ;;  %p268_p3 = scmp.lt.s32.totalorder (!%p228_p2), %s1609_s27, 63  ;;  %v1745_v3 = vld [vmem:[%s2605_s2 + $0x18] sm:$0xff] (!%p228_p2)   ;;  %v1746_v6 = vld [vmem:[%s2605_s2 + $0x20] ss:$0 sps:$4 sm:$0xff] (!%p228_p2)   ;;  %vm1212_vm2 = vcmask (!%p228_p2), 15360  }
   0x7   : > { %1680 = vmatpush3.bf16.msra.mxu0 (!%p228_p2), %v1742_v0  ;;  %1726 = vmatpush3.bf16.msra.mxu1 (!%p228_p2), %v1742_v0  ;;  %v498_v7 = vsel (!%p228_p2), %vm496_vm1, %v1746_v6, 0  ;;  %v2065_v23 = vld [vmem:[%s2606_s3] ss:$0 sm:$0xff] (!%p228_p2)  ;;  %s1963_s18 = smov (!%p228_p2), 126   ;;  %vm1469_vm3 = vcmask (!%p228_p2), 7168  }
   0x8   : > { %1681 = vmatprep.subr.bf16.mxu0 (!%p228_p2), %v1743_v1  ;;  %1722 = vmatprep.subr.bf16.mxu1 (!%p228_p2), %v1743_v1  ;;  %v2072_v33 = vld [vmem:[%s2607_s4] ss:$0 sm:$0xff] (!%p228_p2) }
   0xb   : > { %1682 = vmatpush3.bf16.msra.mxu0 (!%p228_p2), %v1743_v1  ;;  %1727 = vmatpush3.bf16.msra.mxu1 (!%p228_p2), %v1743_v1 }
   0xc   : > { %1683 = vmatprep.subr.bf16.mxu0 (!%p228_p2), %v1744_v2  ;;  %1723 = vmatprep.subr.bf16.mxu1 (!%p228_p2), %v1744_v2 }
   0xd   : > { %s2611_s27 = smov (!%p268_p3, %s1609_s27), 63 }
   0xe   : > { %s1610_s30 = sshll.u32 %s2611_s27, 2  ;;  %s2345_s19 = sshll.u32 %s2611_s27, 3 }
   0xf   : > { %s2025_s11 = scalar_lea.vmem %s2603_s0, %s1610_s30  ;;  %1684 = vmatpush3.bf16.msra.mxu0 %v1744_v2  ;;  %1728 = vmatpush3.bf16.msra.mxu1 %v1744_v2  ;;  %s2352_s23 = scalar_lea.vmem %s2604_s1, %s2345_s19 }
  0x10   : > { %v1747_v4 = vld [vmem:[%s2025_s11] sm:$0xff]   ;;  %1685 = vmatprep.subr.bf16.mxu0 %v1745_v3  ;;  %1724 = vmatprep.subr.bf16.mxu1 %v1745_v3  ;;  %v1749_v8 = vld [vmem:[%s2025_s11 + $0x8] sm:$0xff]   ;;  %v1751_v10 = vld [vmem:[%s2025_s11 + $0x10] sm:$0xff]   ;;  %s2365_s26 = scalar_lea.vmem %s2608_s5, %s2345_s19  ;;  %s2534_s29 = scalar_lea.vmem %s2609_s6, %s2345_s19 }
  0x11   : > { %v1748_v5 = vld [vmem:[%s2025_s11 + $0x40] sm:$0xff]   ;;  %1689 = vmatprep.mubr.msk.bf16.mxu0 %vm447_vm0, %v1747_v4  ;;  %v1750_v9 = vld [vmem:[%s2025_s11 + $0x48] sm:$0xff]   ;;  %v1753_v11 = vld [vmem:[%s2025_s11 + $0x50] sm:$0xff]  }
  0x12   : > { %1705 = vmatprep.mubr.msk.bf16.mxu1 %vm447_vm0, %v1748_v5  ;;  %v1752_v12 = vld [vmem:[%s2025_s11 + $0x18] sm:$0xff]   ;;  %v1755_v14 = vld [vmem:[%s2025_s11 + $0x20] sm:$0xff]   ;;  %v1756_v16 = vld [vmem:[%s2025_s11 + $0x28] sm:$0xff]  }
  0x13   : > { %1686 = vmatpush3.bf16.msra.mxu0 %v1745_v3  ;;  %1729 = vmatpush3.bf16.msra.mxu1 %v1745_v3  ;;  %v1754_v13 = vld [vmem:[%s2025_s11 + $0x58] sm:$0xff]   ;;  %v1757_v15 = vld [vmem:[%s2025_s11 + $0x60] sm:$0xff]   ;;  %v1758_v17 = vld [vmem:[%s2025_s11 + $0x68] sm:$0xff]  }
  0x14   : > { %1731 = vmatprep.subr.msk.bf16.mxu0 %vm496_vm1, %v1746_v6  ;;  %1732 = vmatprep.subr.msk.bf16.mxu1 %vm496_vm1, %v1746_v6  ;;  %v1759_v18 = vld [vmem:[%s2025_s11 + $0x30] sm:$0xff]   ;;  %v1760_v20 = vld [vmem:[%s2025_s11 + $0x38] sm:$0xff]  }
  0x15   : > { %v1761_v19 = vld [vmem:[%s2025_s11 + $0x70] sm:$0xff]   ;;  %v1762_v21 = vld [vmem:[%s2025_s11 + $0x78] sm:$0xff]  }
  0x17   : > { %1688 = vmatpush3.bf16.msra.mxu0 %v498_v7  ;;  %1730 = vmatpush3.bf16.msra.mxu1 %v498_v7 }
  0x1a   : > { %1690 = vmatmul.mubr.msk.bf16.vlgmr.msra.gmra.mrb[0].mxu0 %vm447_vm0, %v1749_v8  ;;  %1706 = vmatmul.mubr.msk.bf16.vlgmr.msra.gmra.mrb[0].mxu1 %vm447_vm0, %v1750_v9 }
  0x1b   : > { %1693 = vmatprep.mubr.msk.bf16.mxu0 %vm447_vm0, %v1751_v10  ;;  %1709 = vmatprep.mubr.msk.bf16.mxu1 %vm447_vm0, %v1753_v11 }
  0x22   : > { %1694 = vmatmul.mubr.msk.bf16.gmra.mrb[4].mxu0 %vm447_vm0, %v1752_v12  ;;  %1710 = vmatmul.mubr.msk.bf16.gmra.mrb[4].mxu1 %vm447_vm0, %v1754_v13 }
  0x23   : > { %1697 = vmatprep.mubr.msk.bf16.mxu0 %vm447_vm0, %v1755_v14  ;;  %1713 = vmatprep.mubr.msk.bf16.mxu1 %vm447_vm0, %v1757_v15 }
  0x2a   : > { %1698 = vmatmul.mubr.msk.bf16.gmra.mrb[8].mxu0 %vm447_vm0, %v1756_v16  ;;  %1714 = vmatmul.mubr.msk.bf16.gmra.mrb[8].mxu1 %vm447_vm0, %v1758_v17 }
  0x2b   : > { %1701 = vmatprep.mubr.msk.bf16.mxu0 %vm447_vm0, %v1759_v18  ;;  %1717 = vmatprep.mubr.msk.bf16.mxu1 %vm447_vm0, %v1761_v19 }
  0x32   : > { %1702 = vmatmul.mubr.msk.bf16.gmra.mrb[12].mxu0 %vm447_vm0, %v1760_v20  ;;  %1718 = vmatmul.mubr.msk.bf16.gmra.mrb[12].mxu1 %vm447_vm0, %v1762_v21 }
  0xed   : > { %v1691_v22 = vpop.f32.mrb[0].mxu0  ;;  %v1707_v24 = vpop.f32.mrb[0].mxu1 }
  0xee   : > { %v534_v25 = vpop.f32.mrb[1].mxu0  ;;  %v598_v26 = vpop.f32.mrb[1].mxu1  ;;  %v607_v29 = vadd.f32 %v1707_v24, %v2065_v23  ;;  %v543_v32 = vadd.f32 %v1691_v22, %v2065_v23 }
  0xef   : > { %v1692_v27 = vpop.f32.mrb[2].mxu0  ;;  %v1708_v28 = vpop.f32.mrb[2].mxu1  ;;  %v535_v34 = vadd.f32 %v2065_v23, %v534_v25  ;;  %v599_v36 = vadd.f32 %v2065_v23, %v598_v26 }
  0xf0   : > { %v537_v30 = vpop.f32.mrb[3].mxu0  ;;  %v601_v31 = vpop.f32.mrb[3].mxu1  ;;  %v2076_v35 = vmul.f32 %v2072_v33, %v607_v29  ;;  %v2080_v37 = vmul.f32 %v2072_v33, %v543_v32  ;;  %v546_v38 = vadd.f32 %v1692_v27, %v2065_v23  ;;  %v610_v41 = vadd.f32 %v1708_v28, %v2065_v23 }
  0xf1   : > { %v2087_v42 = vmul.f32 %v2072_v33, %v535_v34  ;;  %v2091_v44 = vmul.f32 %v2072_v33, %v599_v36  ;;  %v538_v45 = vadd.f32 %v2065_v23, %v537_v30  ;;  %v602_v53 = vadd.f32 %v2065_v23, %v601_v31 }
  0xf2   : > { %v718_v43 = vadd.f32 2.0, %v2076_v35  ;;  %v702_v48 = vadd.f32 2.0, %v2080_v37  ;;  %v2098_v49 = vmul.f32 %v2072_v33, %v546_v38  ;;  %v2103_v52 = vmul.f32 %v2072_v33, %v610_v41 }
  0xf3   : > { %v700_v56 = vadd.f32 2.0, %v2087_v42  ;;  %v716_v58 = vadd.f32 2.0, %v2091_v44  ;;  %v2113_v59 = vmul.f32 %v2072_v33, %v538_v45  ;;  %v2118_v1 = vmul.f32 %v2072_v33, %v602_v53 }
  0xf4   : > { %v750_v57 = vsub.f32 0.0, %v718_v43  ;;  %v734_v60 = vsub.f32 0.0, %v702_v48  ;;  %v703_v61 = vadd.f32 2.0, %v2098_v49  ;;  %v719_v0 = vadd.f32 2.0, %v2103_v52 }
  0xf5   : > { %v1695_v39 = vpop.f32.mrb[4].mxu0  ;;  %v2083_v40 = vpop.f32.mrb[4].mxu1  ;;  %v732_v4 = vsub.f32 0.0, %v700_v56  ;;  %v748_v9 = vsub.f32 0.0, %v716_v58  ;;  %v701_v10 = vadd.f32 2.0, %v2113_v59  ;;  %v717_v16 = vadd.f32 2.0, %v2118_v1 }
  0xf6   : > { %v550_v46 = vpop.f32.mrb[5].mxu0  ;;  %v2094_v47 = vpop.f32.mrb[5].mxu1  ;;  %v559_v5 = vadd.f32 %v1695_v39, %v2065_v23  ;;  %v800_v8 = vmul.f32 1.442695, %v750_v57  ;;  %v768_v13 = vmul.f32 1.442695, %v734_v60  ;;  %v623_v56 = vadd.f32 %v2083_v40, %v2065_v23 }
  0xf7   : > { %v1696_v50 = vpop.f32.mrb[6].mxu0  ;;  %v2100_v51 = vpop.f32.mrb[6].mxu1  ;;  %v735_v14 = vsub.f32 0.0, %v703_v61  ;;  %v751_v15 = vsub.f32 0.0, %v719_v0  ;;  %v764_v17 = vmul.f32 1.442695, %v732_v4  ;;  %v551_v19 = vadd.f32 %v2065_v23, %v550_v46 }
  0xf8   : > { %v2106_v54 = vpop.f32.mrb[7].mxu0  ;;  %v2108_v55 = vpop.f32.mrb[7].mxu1  ;;  %v2128_v18 = vmul.f32 %v2072_v33, %v559_v5  ;;  %1763 = vpow2.f32 %v800_v8  ;;  %v796_v20 = vmul.f32 1.442695, %v748_v9  ;;  %v733_v21 = vsub.f32 0.0, %v701_v10 }
  0xf9   : > { %v562_v22 = vadd.f32 %v1696_v50, %v2065_v23  ;;  %1765 = vpow2.f32 %v768_v13  ;;  %v770_v24 = vmul.f32 1.442695, %v735_v14  ;;  %v802_v29 = vmul.f32 1.442695, %v751_v15 }
  0xfa   : > { %v749_v30 = vsub.f32 0.0, %v717_v16  ;;  %v706_v34 = vadd.f32 2.0, %v2128_v18  ;;  %v2142_v36 = vmul.f32 %v2072_v33, %v551_v19  ;;  %1767 = vpow2.f32 %v764_v17 }
  0xfb   : > { %v2153_v45 = vmul.f32 %v2072_v33, %v562_v22  ;;  %1769 = vpow2.f32 %v770_v24  ;;  %v766_v50 = vmul.f32 1.442695, %v733_v21  ;;  %v554_v40 = vadd.f32 %v2065_v23, %v2106_v54 }
  0xfc   : > { %1771 = vpow2.f32 %v796_v20  ;;  %v798_v53 = vmul.f32 1.442695, %v749_v30  ;;  %v738_v58 = vsub.f32 0.0, %v706_v34  ;;  %v704_v60 = vadd.f32 2.0, %v2142_v36 }
  0xfd   : > { %v1699_v62 = vpop.f32.mrb[8].mxu0  ;;  %v1715_v63 = vpop.f32.mrb[8].mxu1  ;;  %1773 = vpow2.f32 %v802_v29  ;;  %v615_v8 = vadd.f32 %v2065_v23, %v2094_v47  ;;  %v2187_v15 = vmul.f32 %v2072_v33, %v554_v40  ;;  %v626_v24 = vadd.f32 %v2100_v51, %v2065_v23 }
  0xfe   : > { %v566_v2 = vpop.f32.mrb[9].mxu0  ;;  %v630_v3 = vpop.f32.mrb[9].mxu1  ;;  %v575_v25 = vadd.f32 %v1699_v62, %v2065_v23  ;;  %v707_v62 = vadd.f32 2.0, %v2153_v45  ;;  %1775 = vpow2.f32 %v766_v50  ;;  %v776_v54 = vmul.f32 1.442695, %v738_v58 }
  0xff   : > { %v1700_v6 = vpop.f32.mrb[10].mxu0  ;;  %v2121_v7 = vpop.f32.mrb[10].mxu1  ;;  %v567_v26 = vadd.f32 %v2065_v23, %v566_v2  ;;  %v639_v2 = vadd.f32 %v1715_v63, %v2065_v23  ;;  %v631_v4 = vadd.f32 %v2065_v23, %v630_v3  ;;  %1777 = vpow2.f32 %v798_v53 }
 0x100   : > { %v569_v11 = vpop.f32.mrb[11].mxu0  ;;  %v2124_v12 = vpop.f32.mrb[11].mxu1  ;;  %v2145_v38 = vmul.f32 %v2072_v33, %v575_v25  ;;  %v578_v57 = vadd.f32 %v1700_v6, %v2065_v23  ;;  %v2171_v6 = vmul.f32 %v2072_v33, %v623_v56  ;;  %v739_v13 = vsub.f32 0.0, %v707_v62 }
 0x101   : > { %v2148_v39 = vmul.f32 %v2072_v33, %v567_v26  ;;  %v570_v61 = vadd.f32 %v2065_v23, %v569_v11  ;;  %v736_v11 = vsub.f32 0.0, %v704_v60  ;;  %v2179_v63 = vmul.f32 %v2072_v33, %v639_v2 }
 0x102   : > { %v2164_v0 = vmul.f32 %v2072_v33, %v578_v57  ;;  %v1764_v5 = vpop.eup %1763  ;;  %v2182_v3 = vmul.f32 %v2072_v33, %v631_v4  ;;  %v2190_v17 = vmul.f32 %v2072_v33, %v615_v8  ;;  %v642_v19 = vadd.f32 %v2121_v7, %v2065_v23 }
 0x103   : > { %v2176_v9 = vmul.f32 %v2072_v33, %v570_v61  ;;  %v1766_v10 = vpop.eup %1765  ;;  %v2184_v14 = vadd.f32 1.0, %v1764_v5  ;;  %v772_v21 = vmul.f32 1.442695, %v736_v11  ;;  %v722_v22 = vadd.f32 2.0, %v2171_v6 }
 0x104   : > { %v1768_v47 = vpop.eup %1767  ;;  %v830_v16 = vadd.f32 1.0, %v1766_v10  ;;  %v634_v25 = vadd.f32 %v2065_v23, %v2124_v12  ;;  %1779 = vpow2.f32 %v776_v54  ;;  %v778_v29 = vmul.f32 1.442695, %v739_v13 }
 0x105   : > { %v1703_v27 = vpop.f32.mrb[12].mxu0  ;;  %v2134_v28 = vpop.f32.mrb[12].mxu1  ;;  %v2200_v30 = vmul.f32 %v2072_v33, %v642_v19  ;;  %v2203_v7 = vadd.f32 1.0, %v1768_v47  ;;  %v705_v53 = vadd.f32 2.0, %v2187_v15  ;;  %1781 = vrcp.f32 %v2184_v14 }
 0x106   : > { %v2136_v31 = vpop.f32.mrb[13].mxu0  ;;  %v2138_v32 = vpop.f32.mrb[13].mxu1  ;;  %v591_v34 = vadd.f32 %v1703_v27, %v2065_v23  ;;  %v2208_v51 = vmul.f32 %v2072_v33, %v634_v25  ;;  %1783 = vrcp.f32 %v830_v16  ;;  %v2220_v2 = vmul.f32 %v2072_v33, %v626_v24 }
 0x107   : > { %v1704_v41 = vpop.f32.mrb[14].mxu0  ;;  %v2150_v43 = vpop.f32.mrb[14].mxu1  ;;  %v583_v57 = vadd.f32 %v2065_v23, %v2136_v31  ;;  %1785 = vpow2.f32 %v772_v21  ;;  %v720_v40 = vadd.f32 2.0, %v2190_v17  ;;  %v737_v5 = vsub.f32 0.0, %v705_v53 }
 0x108   : > { %v585_v46 = vpop.f32.mrb[15].mxu0  ;;  %v2155_v48 = vpop.f32.mrb[15].mxu1  ;;  %v2211_v12 = vmul.f32 %v2072_v33, %v591_v34  ;;  %v594_v27 = vadd.f32 %v1704_v41, %v2065_v23  ;;  %1787 = vpow2.f32 %v778_v29  ;;  %v754_v8 = vsub.f32 0.0, %v722_v22 }
 0x109   : > { %v1770_v20 = vpop.eup %1769  ;;  %v586_v60 = vadd.f32 %v2065_v23, %v585_v46  ;;  %1789 = vrcp.f32 %v2203_v7  ;;  %v2225_v31 = vmul.f32 %v2072_v33, %v583_v57  ;;  %v618_v10 = vadd.f32 %v2065_v23, %v2108_v55 }
 0x10a   : > { %v1772_v26 = vpop.eup %1771  ;;  %v831_v56 = vadd.f32 1.0, %v1770_v20  ;;  %v2228_v41 = vmul.f32 %v2072_v33, %v594_v27  ;;  %v723_v13 = vadd.f32 2.0, %v2220_v2  ;;  %v655_v47 = vadd.f32 %v2134_v28, %v2065_v23 }
 0x10b   : > { %v1774_v50 = vpop.eup %1773  ;;  %v2215_v58 = vadd.f32 1.0, %v1772_v26  ;;  %v2234_v11 = vmul.f32 %v2072_v33, %v586_v60  ;;  %v647_v19 = vadd.f32 %v2065_v23, %v2138_v32  ;;  %v658_v55 = vadd.f32 %v2150_v43, %v2065_v23 }
 0x10c   : > { %v1776_v61 = vpop.eup %1775  ;;  %v847_v62 = vadd.f32 1.0, %v1774_v50  ;;  %1791 = vrcp.f32 %v831_v56  ;;  %v2244_v21 = vmul.f32 %v2072_v33, %v655_v47  ;;  %v774_v24 = vmul.f32 1.442695, %v737_v5 }
 0x10d   : > { %v1778_v4 = vpop.eup %1777  ;;  %1793 = vrcp.f32 %v2215_v58  ;;  %v829_v46 = vadd.f32 1.0, %v1776_v61  ;;  %v752_v25 = vsub.f32 0.0, %v720_v40  ;;  %v2249_v26 = vmul.f32 %v2072_v33, %v618_v10 }
 0x10e   : > { %1795 = vrcp.f32 %v847_v62  ;;  %v845_v54 = vadd.f32 1.0, %v1778_v4  ;;  %v2241_v20 = vpop.eup %1779  ;;  %v755_v32 = vsub.f32 0.0, %v723_v13  ;;  %v2253_v29 = vmul.f32 %v2072_v33, %v647_v19 }
 0x10f   : > { %1797 = vlog2.f32 %v830_v16  ;;  %v1782_v22 = vpop.eup %1781  ;;  %v808_v16 = vmul.f32 1.442695, %v754_v8  ;;  %v2258_v43 = vmul.f32 %v2072_v33, %v658_v55  ;;  %v650_v50 = vadd.f32 %v2065_v23, %v2155_v48 }
 0x110   : > { %1799 = vlog2.f32 %v831_v56  ;;  %v1784_v28 = vpop.eup %1783  ;;  %1120 = vrot.lane.b32.xlu0 %v1782_v22, %s1963_s18  ;;  %v804_v57 = vmul.f32 1.442695, %v752_v25  ;;  %v721_v27 = vadd.f32 2.0, %v2249_v26  ;;  %v810_v4 = vmul.f32 1.442695, %v755_v32 }
 0x111   : > { %1801 = vrcp.f32 %v829_v46  ;;  %v1786_v34 = vpop.eup %1785  ;;  %1088 = vrot.lane.b32.xlu1 %v1784_v28, %s1963_s18  ;;  %v2264_v60 = vmul.f32 %v2072_v33, %v650_v50  ;;  %v834_v32 = vadd.f32 1.0, %v2241_v20  ;;  %v708_v50 = vadd.f32 2.0, %v2148_v39 }
 0x112   : > { %1803 = vrcp.f32 %v845_v54  ;;  %v1788_v53 = vpop.eup %1787 }
 0x113   : > { %1805 = vlog2.f32 %v2184_v14  ;;  %v1790_v56 = vpop.eup %1789 }
 0x114   : > { %1807 = vlog2.f32 %v847_v62  ;;  %1084 = vrot.lane.b32.xlu0 %v1790_v56, %s1963_s18  ;;  %v753_v62 = vsub.f32 0.0, %v721_v27 }
 0x115   : > { %1809 = vpow2.f32 %v774_v24 }
 0x116   : > { %v1792_v61 = vpop.eup %1791  ;;  %1811 = vpow2.f32 %v808_v16  ;;  %v806_v13 = vmul.f32 1.442695, %v753_v62 }
 0x117   : > { %v1794_v14 = vpop.eup %1793  ;;  %1090 = vrot.lane.b32.xlu1 %v1792_v61, %s1963_s18  ;;  %1813 = vlog2.f32 %v2203_v7 }
 0x118   : > { %v1796_v23 = vpop.eup %1795  ;;  %1815 = vlog2.f32 %v829_v46  ;;  %1116 = vrot.lane.b32.xlu0 %v1794_v14, %s1963_s18  ;;  %v2279_v14 = vadd.f32 1.0, %v1786_v34 }
 0x119   : > { %v1798_v48 = vpop.eup %1797  ;;  %1817 = vpow2.f32 %v804_v57  ;;  %v835_v57 = vadd.f32 1.0, %v1788_v53  ;;  %v711_v53 = vadd.f32 2.0, %v2164_v0 }
 0x11a   : > { %v1800_v40 = vpop.eup %1799  ;;  %1819 = vpow2.f32 %v810_v4  ;;  %v897_v8 = vmul.f32 0.6931472, %v1798_v48 }
 0x11b   : > { %v1802_v33 = vpop.eup %1801  ;;  %1122 = vrot.lane.b32.xlu1 %v1796_v23, %s1963_s18  ;;  %1821 = vlog2.f32 %v2215_v58  ;;  %v899_v7 = vmul.f32 0.6931472, %v1800_v40 }
 0x11c   : > { %v1804_v5 = vpop.eup %1803  ;;  %1823 = vlog2.f32 %v845_v54  ;;  %1086 = vrot.lane.b32.xlu0 %v1802_v33, %s1963_s18  ;;  %v958_v55 = vsub.f32 0.0, %v897_v8  ;;  %v710_v54 = vadd.f32 2.0, %v2145_v38 }
 0x11d   : > { %v1806_v10 = vpop.eup %1805  ;;  %1825 = vpow2.f32 %v806_v13  ;;  %v959_v25 = vsub.f32 0.0, %v899_v7 }
 0x11e   : > { %v1808_v47 = vpop.eup %1807  ;;  %v929_v22 = vmul.f32 0.6931472, %v1806_v10  ;;  %v742_v33 = vsub.f32 0.0, %v710_v54  ;;  %1827 = vrcp.f32 %v834_v32 }
 0x11f   : > { %v1810_v46 = vpop.eup %1809  ;;  %1118 = vrot.lane.b32.xlu1 %v1804_v5, %s1963_s18  ;;  %v931_v28 = vmul.f32 0.6931472, %v1808_v47  ;;  %v740_v5 = vsub.f32 0.0, %v708_v50  ;;  %1829 = vrcp.f32 %v835_v57  ;;  %v727_v50 = vadd.f32 2.0, %v2200_v30 }
 0x120   : > { %v1812_v19 = vpop.eup %1811  ;;  %1281 = vrot.lane.b32.xlu0 %v958_v55, %s1963_s18  ;;  %v974_v27 = vsub.f32 0.0, %v929_v22  ;;  %v2281_v40 = vadd.f32 1.0, %v1810_v46  ;;  %1831 = vrcp.f32 %v2279_v14  ;;  %v784_v46 = vmul.f32 1.442695, %v742_v33 }
 0x121   : > { %v1814_v24 = vpop.eup %1813  ;;  %v975_v23 = vsub.f32 0.0, %v931_v28  ;;  %v850_v20 = vadd.f32 1.0, %v1812_v19  ;;  %v709_v19 = vadd.f32 2.0, %v2176_v9  ;;  %v780_v22 = vmul.f32 1.442695, %v740_v5 }
 0x122   : > { %v1816_v58 = vpop.eup %1815  ;;  %v893_v61 = vmul.f32 0.6931472, %v1814_v24  ;;  %1833 = vrcp.f32 %v2281_v40  ;;  %v726_v28 = vadd.f32 2.0, %v2179_v63  ;;  %v724_v5 = vadd.f32 2.0, %v2182_v3 }
 0x123   : > { %v1818_v16 = vpop.eup %1817  ;;  %1283 = vrot.lane.b32.xlu1 %v959_v25, %s1963_s18  ;;  %v895_v48 = vmul.f32 0.6931472, %v1816_v58  ;;  %1835 = vrcp.f32 %v850_v20  ;;  %v743_v25 = vsub.f32 0.0, %v711_v53  ;;  %v725_v53 = vadd.f32 2.0, %v2208_v51 }
 0x124   : > { %v1820_v56 = vpop.eup %1819  ;;  %1313 = vrot.lane.b32.xlu0 %v974_v27, %s1963_s18  ;;  %v956_v10 = vsub.f32 0.0, %v893_v61  ;;  %v848_v13 = vadd.f32 1.0, %v1818_v16  ;;  %v741_v16 = vsub.f32 0.0, %v709_v19  ;;  %v758_v61 = vsub.f32 0.0, %v726_v28 }
 0x125   : > { %v1822_v4 = vpop.eup %1821  ;;  %v851_v8 = vadd.f32 1.0, %v1820_v56  ;;  %v957_v7 = vsub.f32 0.0, %v895_v48  ;;  %v786_v27 = vmul.f32 1.442695, %v743_v25  ;;  %v759_v48 = vsub.f32 0.0, %v727_v50 }
 0x126   : > { %v1824_v62 = vpop.eup %1823  ;;  %v925_v34 = vmul.f32 0.6931472, %v1822_v4 }
 0x127   : > { %1315 = vrot.lane.b32.xlu1 %v975_v23, %s1963_s18  ;;  %v927_v47 = vmul.f32 0.6931472, %v1824_v62  ;;  %v1826_v55 = vpop.eup %1825  ;;  %1837 = vrcp.f32 %v851_v8  ;;  %v782_v23 = vmul.f32 1.442695, %v741_v16 }
 0x128   : > { %1277 = vrot.lane.b32.xlu0 %v956_v10, %s1963_s18  ;;  %v972_v24 = vsub.f32 0.0, %v925_v34  ;;  %1839 = vrcp.f32 %v848_v13  ;;  %v849_v54 = vadd.f32 1.0, %v1826_v55  ;;  %v1828_v56 = vpop.eup %1827  ;;  %v818_v34 = vmul.f32 1.442695, %v759_v48 }
 0x129   : > { %v973_v58 = vsub.f32 0.0, %v927_v47  ;;  %1841 = vpow2.f32 %v784_v46  ;;  %v1830_v4 = vpop.eup %1829  ;;  %v756_v47 = vsub.f32 0.0, %v724_v5  ;;  %v757_v46 = vsub.f32 0.0, %v725_v53 }
 0x12a   : > { %1843 = vlog2.f32 %v834_v32  ;;  %v1832_v62 = vpop.eup %1831 }
 0x12b   : > { %1279 = vrot.lane.b32.xlu1 %v957_v7, %s1963_s18  ;;  %1845 = vlog2.f32 %v835_v57  ;;  %v816_v57 = vmul.f32 1.442695, %v758_v61  ;;  %v814_v28 = vmul.f32 1.442695, %v757_v46 }
 0x12c   : > { %1309 = vrot.lane.b32.xlu0 %v972_v24, %s1963_s18  ;;  %1847 = vpow2.f32 %v780_v22  ;;  %v1834_v33 = vpop.eup %1833  ;;  %v812_v24 = vmul.f32 1.442695, %v756_v47 }
 0x12d   : > { %1849 = vrcp.f32 %v849_v54  ;;  %v1836_v32 = vpop.eup %1835 }
 0x12e   : > { %1851 = vlog2.f32 %v850_v20 }
 0x12f   : > { %1311 = vrot.lane.b32.xlu1 %v973_v58, %s1963_s18  ;;  %1853 = vlog2.f32 %v851_v8 }
 0x130   : > { %1096 = vrot.lane.b32.xlu0 %v1828_v56, %s1963_s18  ;;  %1855 = vpow2.f32 %v786_v27 }
 0x131   : > { %v1838_v10 = vpop.eup %1837  ;;  %1857 = vpow2.f32 %v782_v23 }
 0x132   : > { %v1840_v7 = vpop.eup %1839  ;;  %1859 = vlog2.f32 %v2279_v14 }
 0x133   : > { %1098 = vrot.lane.b32.xlu1 %v1830_v4, %s1963_s18  ;;  %v1842_v20 = vpop.eup %1841  ;;  %1861 = vlog2.f32 %v2281_v40 }
 0x134   : > { %1128 = vrot.lane.b32.xlu0 %v1836_v32, %s1963_s18  ;;  %v1844_v8 = vpop.eup %1843  ;;  %1863 = vpow2.f32 %v816_v57 }
 0x135   : > { %v1846_v19 = vpop.eup %1845  ;;  %1865 = vpow2.f32 %v818_v34  ;;  %v905_v25 = vmul.f32 0.6931472, %v1844_v8 }
 0x136   : > { %v1848_v55 = vpop.eup %1847  ;;  %1867 = vlog2.f32 %v848_v13  ;;  %v907_v58 = vmul.f32 0.6931472, %v1846_v19 }
 0x137   : > { %1130 = vrot.lane.b32.xlu1 %v1838_v10, %s1963_s18  ;;  %v1850_v22 = vpop.eup %1849  ;;  %1869 = vlog2.f32 %v849_v54  ;;  %v962_v56 = vsub.f32 0.0, %v905_v25  ;;  %v714_v54 = vadd.f32 2.0, %v2211_v12  ;;  %v836_v47 = vadd.f32 1.0, %v1848_v55 }
 0x138   : > { %1092 = vrot.lane.b32.xlu0 %v1832_v62, %s1963_s18  ;;  %v1852_v14 = vpop.eup %1851  ;;  %1871 = vpow2.f32 %v812_v24  ;;  %v963_v13 = vsub.f32 0.0, %v907_v58  ;;  %v838_v62 = vadd.f32 1.0, %v1842_v20  ;;  %v712_v20 = vadd.f32 2.0, %v2225_v31 }
 0x139   : > { %v1854_v16 = vpop.eup %1853  ;;  %v937_v27 = vmul.f32 0.6931472, %v1852_v14  ;;  %1873 = vpow2.f32 %v814_v28  ;;  %v746_v8 = vsub.f32 0.0, %v714_v54  ;;  %v715_v55 = vadd.f32 2.0, %v2228_v41 }
 0x13a   : > { %v1856_v40 = vpop.eup %1855  ;;  %v939_v4 = vmul.f32 0.6931472, %v1854_v16  ;;  %1875 = vrcp.f32 %v838_v62  ;;  %v731_v54 = vadd.f32 2.0, %v2258_v43 }
 0x13b   : > { %1094 = vrot.lane.b32.xlu1 %v1834_v33, %s1963_s18  ;;  %v1858_v50 = vpop.eup %1857  ;;  %v839_v5 = vadd.f32 1.0, %v1856_v40  ;;  %v978_v32 = vsub.f32 0.0, %v937_v27  ;;  %v792_v16 = vmul.f32 1.442695, %v746_v8  ;;  %v728_v8 = vadd.f32 2.0, %v2253_v29 }
 0x13c   : > { %1124 = vrot.lane.b32.xlu0 %v1840_v7, %s1963_s18  ;;  %v1860_v61 = vpop.eup %1859  ;;  %v979_v10 = vsub.f32 0.0, %v939_v4  ;;  %v837_v25 = vadd.f32 1.0, %v1858_v50  ;;  %v730_v50 = vadd.f32 2.0, %v2244_v21 }
 0x13d   : > { %v1862_v23 = vpop.eup %1861  ;;  %v901_v57 = vmul.f32 0.6931472, %v1860_v61  ;;  %1877 = vrcp.f32 %v839_v5 }
 0x13e   : > { %v1864_v48 = vpop.eup %1863  ;;  %v903_v34 = vmul.f32 0.6931472, %v1862_v23  ;;  %1879 = vrcp.f32 %v836_v47  ;;  %v747_v23 = vsub.f32 0.0, %v715_v55 }
 0x13f   : > { %1126 = vrot.lane.b32.xlu1 %v1850_v22, %s1963_s18  ;;  %v1866_v33 = vpop.eup %1865  ;;  %v854_v46 = vadd.f32 1.0, %v1864_v48  ;;  %v960_v22 = vsub.f32 0.0, %v901_v57  ;;  %v762_v57 = vsub.f32 0.0, %v730_v50 }
 0x140   : > { %1289 = vrot.lane.b32.xlu0 %v962_v56, %s1963_s18  ;;  %v1868_v53 = vpop.eup %1867  ;;  %v855_v19 = vadd.f32 1.0, %v1866_v33  ;;  %v961_v14 = vsub.f32 0.0, %v903_v34  ;;  %v744_v56 = vsub.f32 0.0, %v712_v20  ;;  %v763_v34 = vsub.f32 0.0, %v731_v54 }
 0x141   : > { %v1870_v7 = vpop.eup %1869  ;;  %v933_v24 = vmul.f32 0.6931472, %v1868_v53  ;;  %1881 = vrcp.f32 %v854_v46  ;;  %v824_v20 = vmul.f32 1.442695, %v762_v57 }
 0x142   : > { %v935_v28 = vmul.f32 0.6931472, %v1870_v7  ;;  %v1872_v58 = vpop.eup %1871  ;;  %1883 = vrcp.f32 %v855_v19  ;;  %v788_v33 = vmul.f32 1.442695, %v744_v56 }
 0x143   : > { %1291 = vrot.lane.b32.xlu1 %v963_v13, %s1963_s18  ;;  %v1874_v40 = vpop.eup %1873  ;;  %v976_v27 = vsub.f32 0.0, %v933_v24  ;;  %1885 = vrcp.f32 %v837_v25  ;;  %v852_v61 = vadd.f32 1.0, %v1872_v58  ;;  %v760_v58 = vsub.f32 0.0, %v728_v8 }
 0x144   : > { %1321 = vrot.lane.b32.xlu0 %v978_v32, %s1963_s18  ;;  %v977_v13 = vsub.f32 0.0, %v935_v28  ;;  %v853_v4 = vadd.f32 1.0, %v1874_v40  ;;  %1887 = vpow2.f32 %v792_v16  ;;  %v1876_v48 = vpop.eup %1875  ;;  %v713_v32 = vadd.f32 2.0, %v2234_v11 }
 0x145   : > { %1889 = vlog2.f32 %v838_v62  ;;  %v820_v50 = vmul.f32 1.442695, %v760_v58 }
 0x146   : > { %1891 = vlog2.f32 %v839_v5  ;;  %v745_v5 = vsub.f32 0.0, %v713_v32 }
 0x147   : > { %1323 = vrot.lane.b32.xlu1 %v979_v10, %s1963_s18  ;;  %1893 = vrcp.f32 %v852_v61  ;;  %v1878_v53 = vpop.eup %1877  ;;  %v794_v10 = vmul.f32 1.442695, %v747_v23 }
 0x148   : > { %1285 = vrot.lane.b32.xlu0 %v960_v22, %s1963_s18  ;;  %1895 = vrcp.f32 %v853_v4  ;;  %v1880_v7 = vpop.eup %1879  ;;  %v729_v22 = vadd.f32 2.0, %v2264_v60 }
 0x149   : > { %1897 = vlog2.f32 %v854_v46 }
 0x14a   : > { %1899 = vlog2.f32 %v855_v19  ;;  %v790_v19 = vmul.f32 1.442695, %v745_v5  ;;  %v761_v55 = vsub.f32 0.0, %v729_v22 }
 0x14b   : > { %1287 = vrot.lane.b32.xlu1 %v961_v14, %s1963_s18  ;;  %v1882_v62 = vpop.eup %1881  ;;  %1901 = vpow2.f32 %v788_v33  ;;  %v826_v14 = vmul.f32 1.442695, %v763_v34 }
 0x14c   : > { %1317 = vrot.lane.b32.xlu0 %v976_v27, %s1963_s18  ;;  %v1884_v24 = vpop.eup %1883  ;;  %1903 = vpow2.f32 %v794_v10  ;;  %v822_v23 = vmul.f32 1.442695, %v761_v55 }
 0x14d   : > { %v1886_v28 = vpop.eup %1885  ;;  %1905 = vlog2.f32 %v836_v47 }
 0x14e   : > { %v1888_v46 = vpop.eup %1887  ;;  %1907 = vlog2.f32 %v837_v25 }
 0x14f   : > { %1319 = vrot.lane.b32.xlu1 %v977_v13, %s1963_s18  ;;  %v1890_v16 = vpop.eup %1889  ;;  %1909 = vpow2.f32 %v824_v20 }
 0x150   : > { %1104 = vrot.lane.b32.xlu0 %v1876_v48, %s1963_s18  ;;  %v1892_v40 = vpop.eup %1891  ;;  %1911 = vpow2.f32 %v826_v14  ;;  %v913_v13 = vmul.f32 0.6931472, %v1890_v16 }
 0x151   : > { %v1894_v56 = vpop.eup %1893  ;;  %1913 = vlog2.f32 %v852_v61  ;;  %v915_v25 = vmul.f32 0.6931472, %v1892_v40 }
 0x152   : > { %v1896_v27 = vpop.eup %1895  ;;  %1915 = vlog2.f32 %v853_v4  ;;  %v966_v32 = vsub.f32 0.0, %v913_v13 }
 0x153   : > { %1106 = vrot.lane.b32.xlu1 %v1878_v53, %s1963_s18  ;;  %v1898_v47 = vpop.eup %1897  ;;  %1917 = vpow2.f32 %v790_v19  ;;  %v967_v61 = vsub.f32 0.0, %v915_v25 }
 0x154   : > { %1136 = vrot.lane.b32.xlu0 %v1882_v62, %s1963_s18  ;;  %v1900_v54 = vpop.eup %1899  ;;  %1919 = vpow2.f32 %v820_v50  ;;  %v945_v57 = vmul.f32 0.6931472, %v1898_v47 }
 0x155   : > { %v1902_v48 = vpop.eup %1901  ;;  %1921 = vpow2.f32 %v822_v23  ;;  %v947_v10 = vmul.f32 0.6931472, %v1900_v54 }
 0x156   : > { %v1904_v33 = vpop.eup %1903  ;;  %v982_v5 = vsub.f32 0.0, %v945_v57  ;;  %v840_v40 = vadd.f32 1.0, %v1902_v48 }
 0x157   : > { %1138 = vrot.lane.b32.xlu1 %v1884_v24, %s1963_s18  ;;  %v1906_v53 = vpop.eup %1905  ;;  %v843_v62 = vadd.f32 1.0, %v1904_v33  ;;  %v983_v24 = vsub.f32 0.0, %v947_v10 }
 0x158   : > { %1100 = vrot.lane.b32.xlu0 %v1880_v7, %s1963_s18  ;;  %v1908_v34 = vpop.eup %1907  ;;  %v842_v7 = vadd.f32 1.0, %v1888_v46  ;;  %v909_v20 = vmul.f32 0.6931472, %v1906_v53 }
 0x159   : > { %v1910_v4 = vpop.eup %1909  ;;  %v911_v14 = vmul.f32 0.6931472, %v1908_v34 }
 0x15a   : > { %v1912_v8 = vpop.eup %1911  ;;  %1923 = vrcp.f32 %v842_v7  ;;  %v858_v16 = vadd.f32 1.0, %v1910_v4  ;;  %v964_v46 = vsub.f32 0.0, %v909_v20 }
 0x15b   : > { %1102 = vrot.lane.b32.xlu1 %v1886_v28, %s1963_s18  ;;  %v1914_v22 = vpop.eup %1913  ;;  %1925 = vrcp.f32 %v843_v62  ;;  %v859_v19 = vadd.f32 1.0, %v1912_v8 }
 0x15c   : > { %1132 = vrot.lane.b32.xlu0 %v1894_v56, %s1963_s18  ;;  %v1916_v28 = vpop.eup %1915  ;;  %v941_v55 = vmul.f32 0.6931472, %v1914_v22  ;;  %v965_v56 = vsub.f32 0.0, %v911_v14  ;;  %1927 = vrcp.f32 %v858_v16  ;;  %v1006_v14 = vld [vmem:[%s2352_s23 + $0x90] sm:$0xff] }
 0x15d   : > { %v1918_v58 = vpop.eup %1917  ;;  %1929 = vrcp.f32 %v859_v19 }
 0x15e   : > { %v1920_v50 = vpop.eup %1919  ;;  %v841_v13 = vadd.f32 1.0, %v1918_v58  ;;  %v980_v23 = vsub.f32 0.0, %v941_v55  ;;  %1931 = vrcp.f32 %v840_v40 }
 0x15f   : > { %1134 = vrot.lane.b32.xlu1 %v1896_v27, %s1963_s18  ;;  %v943_v27 = vmul.f32 0.6931472, %v1916_v28  ;;  %v1922_v47 = vpop.eup %1921  ;;  %v856_v25 = vadd.f32 1.0, %v1920_v50 }
 0x160   : > { %1297 = vrot.lane.b32.xlu0 %v966_v32, %s1963_s18  ;;  %1933 = vrcp.f32 %v841_v13  ;;  %v857_v33 = vadd.f32 1.0, %v1922_v47 }
 0x161   : > { %v981_v54 = vsub.f32 0.0, %v943_v27  ;;  %1935 = vlog2.f32 %v842_v7 }
 0x162   : > { %1937 = vlog2.f32 %v843_v62 }
 0x163   : > { %1299 = vrot.lane.b32.xlu1 %v967_v61, %s1963_s18  ;;  %1939 = vrcp.f32 %v856_v25 }
 0x164   : > { %1329 = vrot.lane.b32.xlu0 %v982_v5, %s1963_s18  ;;  %v1924_v48 = vpop.eup %1923  ;;  %1941 = vrcp.f32 %v857_v33 }
 0x165   : > { %v1926_v32 = vpop.eup %1925  ;;  %1943 = vlog2.f32 %v858_v16 }
 0x166   : > { %1945 = vlog2.f32 %v859_v19  ;;  %v1928_v57 = vpop.eup %1927  ;;  %v990_v19 = vld [vmem:[%s2352_s23 + $0x10] sm:$0xff] }
 0x167   : > { %1331 = vrot.lane.b32.xlu1 %v983_v24, %s1963_s18  ;;  %v1930_v53 = vpop.eup %1929  ;;  %1947 = vlog2.f32 %v840_v40  ;;  %v1038_v40 = vadd.f32 %v1006_v14, %v2076_v35  ;;  %v1022_v27 = vadd.f32 %v990_v19, %v2080_v37  ;;  %v991_v35 = vld [vmem:[%s2352_s23 + $0x18] sm:$0xff] }
 0x168   : > { %1293 = vrot.lane.b32.xlu0 %v964_v46, %s1963_s18  ;;  %v1932_v61 = vpop.eup %1931  ;;  %1949 = vlog2.f32 %v841_v13  ;;  %v988_v13 = vld [vmem:[%s2352_s23] sm:$0xff] }
 0x169   : > { %1951 = vlog2.f32 %v856_v25  ;;  %v1020_v37 = vadd.f32 %v988_v13, %v2087_v42 }
 0x16a   : > { %v1934_v10 = vpop.eup %1933  ;;  %1953 = vlog2.f32 %v857_v33 }
 0x16b   : > { %1295 = vrot.lane.b32.xlu1 %v965_v56, %s1963_s18  ;;  %v1936_v34 = vpop.eup %1935 }
 0x16c   : > { %1325 = vrot.lane.b32.xlu0 %v980_v23, %s1963_s18  ;;  %v1938_v4 = vpop.eup %1937  ;;  %v921_v62 = vmul.f32 0.6931472, %v1936_v34  ;;  %v1004_v34 = vld [vmem:[%s2352_s23 + $0x80] sm:$0xff] }
 0x16d   : > { %v1940_v7 = vpop.eup %1939  ;;  %v923_v20 = vmul.f32 0.6931472, %v1938_v4  ;;  %v1036_v42 = vadd.f32 %v1004_v34, %v2091_v44  ;;  %v1011_v34 = vld [vmem:[%s2352_s23 + $0xb8] sm:$0xff] }
 0x16e   : > { %v1942_v8 = vpop.eup %1941  ;;  %v970_v24 = vsub.f32 0.0, %v921_v62 }
 0x16f   : > { %1327 = vrot.lane.b32.xlu1 %v981_v54, %s1963_s18  ;;  %v1944_v5 = vpop.eup %1943  ;;  %v971_v16 = vsub.f32 0.0, %v923_v20 }
 0x170   : > { %1112 = vrot.lane.b32.xlu0 %v1924_v48, %s1963_s18  ;;  %v1946_v22 = vpop.eup %1945  ;;  %v953_v28 = vmul.f32 0.6931472, %v1944_v5  ;;  %v1007_v5 = vld [vmem:[%s2352_s23 + $0x98] sm:$0xff] }
 0x171   : > { %v1948_v58 = vpop.eup %1947  ;;  %v955_v46 = vmul.f32 0.6931472, %v1946_v22 }
 0x172   : > { %v1950_v55 = vpop.eup %1949  ;;  %v986_v50 = vsub.f32 0.0, %v953_v28  ;;  %v917_v47 = vmul.f32 0.6931472, %v1948_v58  ;;  %v989_v28 = vld [vmem:[%s2352_s23 + $0x8] sm:$0xff] }
 0x173   : > { %1114 = vrot.lane.b32.xlu1 %v1926_v32, %s1963_s18  ;;  %v1952_v23 = vpop.eup %1951  ;;  %v987_v33 = vsub.f32 0.0, %v955_v46  ;;  %v919_v48 = vmul.f32 0.6931472, %v1950_v55  ;;  %v1005_v46 = vld [vmem:[%s2352_s23 + $0x88] sm:$0xff]  ;;  %v1021_v44 = vadd.f32 %v989_v28, %v2113_v59 }
 0x174   : > { %1144 = vrot.lane.b32.xlu0 %v1928_v57, %s1963_s18  ;;  %v1954_v32 = vpop.eup %1953  ;;  %v949_v4 = vmul.f32 0.6931472, %v1952_v23 }
 0x175   : > { %v969_v62 = vsub.f32 0.0, %v919_v48  ;;  %v951_v20 = vmul.f32 0.6931472, %v1954_v32  ;;  %v995_v48 = vld [vmem:[%s2352_s23 + $0x38] sm:$0xff] }
 0x176   : > { %v984_v14 = vsub.f32 0.0, %v949_v4 }
 0x177   : > { %1146 = vrot.lane.b32.xlu1 %v1930_v53, %s1963_s18  ;;  %v1023_v53 = vadd.f32 %v991_v35, %v2098_v49  ;;  %v1039_v49 = vadd.f32 %v1007_v5, %v2103_v52  ;;  %v985_v19 = vsub.f32 0.0, %v951_v20  ;;  %v1037_v52 = vadd.f32 %v1005_v46, %v2118_v1  ;;  %v993_v20 = vld [vmem:[%s2352_s23 + $0x28] sm:$0xff] }
 0x178   : > { %1108 = vrot.lane.b32.xlu0 %v1932_v61, %s1963_s18 }
 0x17b   : > { %1110 = vrot.lane.b32.xlu1 %v1934_v10, %s1963_s18  ;;  %v968_v10 = vsub.f32 0.0, %v917_v47 }
 0x17c   : > { %1140 = vrot.lane.b32.xlu0 %v1940_v7, %s1963_s18 }
 0x17f   : > { %1142 = vrot.lane.b32.xlu1 %v1942_v8, %s1963_s18 }
 0x180   : > { %1305 = vrot.lane.b32.xlu0 %v970_v24, %s1963_s18 }
 0x182   : > { %v1121_v56 = vpop.permute.xlu0 %1120 }
 0x183   : > { %1307 = vrot.lane.b32.xlu1 %v971_v16, %s1963_s18  ;;  %v1198_v25 = vmul.f32 %v1121_v56, %v1038_v40  ;;  %v1089_v54 = vpop.permute.xlu1 %1088 }
 0x184   : > { %v1182_v57 = vmul.f32 %v1089_v54, %v1022_v27  ;;  %1337 = vrot.lane.b32.xlu0 %v986_v50, %s1963_s18 }
 0x185   : > { %1231 = vst.msk [vmem:[%s2365_s26 + $0x90] sm:$0xff] %vm1212_vm2, %v1198_v25 }
 0x186   : > { %1215 = vst.msk [vmem:[%s2365_s26 + $0x10] sm:$0xff] %vm1212_vm2, %v1182_v57  ;;  %v1085_v61 = vpop.permute.xlu0 %1084  ;;  %v1027_v57 = vadd.f32 %v995_v48, %v2153_v45  ;;  %v992_v45 = vld [vmem:[%s2352_s23 + $0x20] sm:$0xff] }
 0x187   : > { %1339 = vrot.lane.b32.xlu1 %v987_v33, %s1963_s18  ;;  %v1180_v8 = vmul.f32 %v1085_v61, %v1020_v37  ;;  %v994_v33 = vld [vmem:[%s2352_s23 + $0x30] sm:$0xff] }
 0x188   : > { %1301 = vrot.lane.b32.xlu0 %v968_v10, %s1963_s18  ;;  %v1026_v32 = vadd.f32 %v994_v33, %v2128_v18  ;;  %v1043_v18 = vadd.f32 %v1011_v34, %v2220_v2 }
 0x189   : > { %v1091_v7 = vpop.permute.xlu1 %1090  ;;  %1213 = vst.msk [vmem:[%s2365_s26] sm:$0xff] %vm1212_vm2, %v1180_v8 }
 0x18a   : > { %v1183_v22 = vmul.f32 %v1091_v7, %v1023_v53  ;;  %v1117_v24 = vpop.permute.xlu0 %1116  ;;  %v1010_v53 = vld [vmem:[%s2352_s23 + $0xb0] sm:$0xff] }
 0x18b   : > { %1303 = vrot.lane.b32.xlu1 %v969_v62, %s1963_s18  ;;  %v1196_v16 = vmul.f32 %v1117_v24, %v1036_v42  ;;  %v1042_v7 = vadd.f32 %v1010_v53, %v2171_v6  ;;  %v1024_v42 = vadd.f32 %v992_v45, %v2142_v36  ;;  %v1025_v6 = vadd.f32 %v993_v20, %v2187_v15  ;;  %v1008_v24 = vld [vmem:[%s2352_s23 + $0xa0] sm:$0xff]  ;;  %v999_v53 = vld [vmem:[%s2352_s23 + $0x58] sm:$0xff] }
 0x18c   : > { %1216 = vst.msk [vmem:[%s2365_s26 + $0x18] sm:$0xff] %vm1212_vm2, %v1183_v22  ;;  %1333 = vrot.lane.b32.xlu0 %v984_v14, %s1963_s18 }
 0x18d   : > { %v1123_v58 = vpop.permute.xlu1 %1122  ;;  %1229 = vst.msk [vmem:[%s2365_s26 + $0x80] sm:$0xff] %vm1212_vm2, %v1196_v16 }
 0x18e   : > { %v1199_v55 = vmul.f32 %v1123_v58, %v1039_v49  ;;  %v1087_v40 = vpop.permute.xlu0 %1086  ;;  %v1009_v58 = vld [vmem:[%s2352_s23 + $0xa8] sm:$0xff] }
 0x18f   : > { %1335 = vrot.lane.b32.xlu1 %v985_v19, %s1963_s18  ;;  %v1181_v27 = vmul.f32 %v1087_v40, %v1021_v44  ;;  %v1040_v19 = vadd.f32 %v1008_v24, %v2190_v17  ;;  %v1041_v36 = vadd.f32 %v1009_v58, %v2249_v26  ;;  %v1012_v58 = vld [vmem:[%s2352_s23 + $0xc0] sm:$0xff] }
 0x190   : > { %1232 = vst.msk [vmem:[%s2365_s26 + $0x98] sm:$0xff] %vm1212_vm2, %v1199_v55 }
 0x191   : > { %v1119_v56 = vpop.permute.xlu1 %1118  ;;  %1214 = vst.msk [vmem:[%s2365_s26 + $0x8] sm:$0xff] %vm1212_vm2, %v1181_v27 }
 0x192   : > { %v1197_v50 = vmul.f32 %v1119_v56, %v1037_v52  ;;  %v1282_v13 = vpop.permute.xlu0 %1281 }
 0x193   : > { %v1379_v2 = vsel %vm1212_vm2, %v1282_v13, 0.0 }
 0x194   : > { %1230 = vst.msk [vmem:[%s2365_s26 + $0x88] sm:$0xff] %vm1212_vm2, %v1197_v50 }
 0x195   : > { %v1284_v47 = vpop.permute.xlu1 %1283 }
 0x196   : > { %v1314_v23 = vpop.permute.xlu0 %1313  ;;  %v1382_v17 = vsel %vm1212_vm2, %v1284_v47, 0.0 }
 0x197   : > { %v1427_v40 = vsel %vm1212_vm2, %v1314_v23, 0.0 }
 0x199   : > { %v1316_v59 = vpop.permute.xlu1 %1315 }
 0x19a   : > { %v1278_v25 = vpop.permute.xlu0 %1277  ;;  %v1430_v13 = vsel %vm1212_vm2, %v1316_v59, 0.0  ;;  %v998_v59 = vld [vmem:[%s2352_s23 + $0x50] sm:$0xff] }
 0x19b   : > { %v1373_v46 = vsel %vm1212_vm2, %v1278_v25, 0.0 }
 0x19d   : > { %v1280_v54 = vpop.permute.xlu1 %1279 }
 0x19e   : > { %v1310_v1 = vpop.permute.xlu0 %1309  ;;  %v1376_v23 = vsel %vm1212_vm2, %v1280_v54, 0.0 }
 0x19f   : > { %v1421_v26 = vsel %vm1212_vm2, %v1310_v1, 0.0 }
 0x1a1   : > { %v1312_v35 = vpop.permute.xlu1 %1311 }
 0x1a2   : > { %v1097_v37 = vpop.permute.xlu0 %1096  ;;  %v1424_v48 = vsel %vm1212_vm2, %v1312_v35, 0.0  ;;  %v1030_v35 = vadd.f32 %v998_v59, %v2145_v38 }
 0x1a3   : > { %v1186_v10 = vmul.f32 %v1097_v37, %v1026_v32 }
 0x1a5   : > { %v1099_v61 = vpop.permute.xlu1 %1098  ;;  %1219 = vst.msk [vmem:[%s2365_s26 + $0x30] sm:$0xff] %vm1212_vm2, %v1186_v10 }
 0x1a6   : > { %v1187_v4 = vmul.f32 %v1099_v61, %v1027_v57  ;;  %v1129_v8 = vpop.permute.xlu0 %1128  ;;  %v1031_v61 = vadd.f32 %v999_v53, %v2164_v0 }
 0x1a7   : > { %v1202_v5 = vmul.f32 %v1129_v8, %v1042_v7  ;;  %v1015_v8 = vld [vmem:[%s2352_s23 + $0xd8] sm:$0xff] }
 0x1a8   : > { %1220 = vst.msk [vmem:[%s2365_s26 + $0x38] sm:$0xff] %vm1212_vm2, %v1187_v4  ;;  %v1014_v4 = vld [vmem:[%s2352_s23 + $0xd0] sm:$0xff]  ;;  %v1047_v0 = vadd.f32 %v1015_v8, %v2200_v30 }
 0x1a9   : > { %v1131_v62 = vpop.permute.xlu1 %1130  ;;  %1235 = vst.msk [vmem:[%s2365_s26 + $0xb0] sm:$0xff] %vm1212_vm2, %v1202_v5  ;;  %v1046_v38 = vadd.f32 %v1014_v4, %v2179_v63 }
 0x1aa   : > { %v1203_v22 = vmul.f32 %v1131_v62, %v1043_v18  ;;  %v1093_v49 = vpop.permute.xlu0 %1092 }
 0x1ab   : > { %v1184_v28 = vmul.f32 %v1093_v49, %v1024_v42  ;;  %1380 = vadd.xlane.f32.xlu0 %v1379_v2  ;;  %v997_v49 = vld [vmem:[%s2352_s23 + $0x48] sm:$0xff] }
 0x1ac   : > { %1236 = vst.msk [vmem:[%s2365_s26 + $0xb8] sm:$0xff] %vm1212_vm2, %v1203_v22  ;;  %v996_v22 = vld [vmem:[%s2352_s23 + $0x40] sm:$0xff]  ;;  %v1029_v30 = vadd.f32 %v997_v49, %v2176_v9 }
 0x1ad   : > { %v1095_v14 = vpop.permute.xlu1 %1094  ;;  %1217 = vst.msk [vmem:[%s2365_s26 + $0x20] sm:$0xff] %vm1212_vm2, %v1184_v28  ;;  %v1028_v63 = vadd.f32 %v996_v22, %v2148_v39 }
 0x1ae   : > { %v1185_v16 = vmul.f32 %v1095_v14, %v1025_v6  ;;  %v1125_v15 = vpop.permute.xlu0 %1124 }
 0x1af   : > { %v1200_v44 = vmul.f32 %v1125_v15, %v1040_v19  ;;  %1374 = vadd.xlane.f32.xlu0 %v1373_v46  ;;  %v1044_v46 = vadd.f32 %v1012_v58, %v2182_v3 }
 0x1b0   : > { %1218 = vst.msk [vmem:[%s2365_s26 + $0x28] sm:$0xff] %vm1212_vm2, %v1185_v16 }
 0x1b1   : > { %v1127_v55 = vpop.permute.xlu1 %1126  ;;  %1233 = vst.msk [vmem:[%s2365_s26 + $0xa0] sm:$0xff] %vm1212_vm2, %v1200_v44 }
 0x1b2   : > { %v1201_v52 = vmul.f32 %v1127_v55, %v1041_v36  ;;  %v1290_v56 = vpop.permute.xlu0 %1289  ;;  %v1013_v36 = vld [vmem:[%s2352_s23 + $0xc8] sm:$0xff] }
 0x1b3   : > { %1428 = vadd.xlane.f32.xlu1 %v1427_v40  ;;  %1383 = vadd.xlane.f32.xlu0 %v1382_v17  ;;  %v1391_v47 = vsel %vm1212_vm2, %v1290_v56, 0.0  ;;  %v1045_v39 = vadd.f32 %v1013_v36, %v2208_v51 }
 0x1b4   : > { %1234 = vst.msk [vmem:[%s2365_s26 + $0xa8] sm:$0xff] %vm1212_vm2, %v1201_v52 }
 0x1b5   : > { %v1292_v27 = vpop.permute.xlu1 %1291 }
 0x1b6   : > { %v1322_v50 = vpop.permute.xlu0 %1321  ;;  %v1394_v57 = vsel %vm1212_vm2, %v1292_v27, 0.0 }
 0x1b7   : > { %1422 = vadd.xlane.f32.xlu1 %v1421_v26  ;;  %1431 = vadd.xlane.f32.xlu0 %v1430_v13  ;;  %v1439_v54 = vsel %vm1212_vm2, %v1322_v50, 0.0 }
 0x1b9   : > { %v1324_v25 = vpop.permute.xlu1 %1323 }
 0x1ba   : > { %v1286_v33 = vpop.permute.xlu0 %1285  ;;  %v1442_v34 = vsel %vm1212_vm2, %v1324_v25, 0.0 }
 0x1bb   : > { %1377 = vadd.xlane.f32.xlu1 %v1376_v23  ;;  %1425 = vadd.xlane.f32.xlu0 %v1424_v48  ;;  %v1385_v62 = vsel %vm1212_vm2, %v1286_v33, 0.0 }
 0x1bd   : > { %v1288_v32 = vpop.permute.xlu1 %1287 }
 0x1be   : > { %v1318_v1 = vpop.permute.xlu0 %1317  ;;  %v1388_v20 = vsel %vm1212_vm2, %v1288_v32, 0.0  ;;  %v1002_v32 = vld [vmem:[%s2352_s23 + $0x70] sm:$0xff] }
 0x1bf   : > { %1392 = vadd.xlane.f32.xlu1 %v1391_v47  ;;  %1395 = vadd.xlane.f32.xlu0 %v1394_v57  ;;  %v1433_v24 = vsel %vm1212_vm2, %v1318_v1, 0.0  ;;  %v1003_v57 = vld [vmem:[%s2352_s23 + $0x78] sm:$0xff] }
 0x1c0   : > { %v1035_v53 = vadd.f32 %v1003_v57, %v2228_v41  ;;  %v1000_v41 = vld [vmem:[%s2352_s23 + $0x60] sm:$0xff] }
 0x1c1   : > { %v1320_v37 = vpop.permute.xlu1 %1319 }
 0x1c2   : > { %v1105_v10 = vpop.permute.xlu0 %1104  ;;  %v1436_v28 = vsel %vm1212_vm2, %v1320_v37, 0.0  ;;  %v1034_v37 = vadd.f32 %v1002_v32, %v2211_v12 }
 0x1c3   : > { %1440 = vadd.xlane.f32.xlu1 %v1439_v54  ;;  %v1190_v18 = vmul.f32 %v1105_v10, %v1030_v35  ;;  %1443 = vadd.xlane.f32.xlu0 %v1442_v34  ;;  %v1018_v35 = vld [vmem:[%s2352_s23 + $0xf0] sm:$0xff]  ;;  %v1019_v34 = vld [vmem:[%s2352_s23 + $0xf8] sm:$0xff] }
 0x1c4   : > { %v1051_v12 = vadd.f32 %v1019_v34, %v2258_v43  ;;  %v1016_v43 = vld [vmem:[%s2352_s23 + $0xe0] sm:$0xff] }
 0x1c5   : > { %v1107_v7 = vpop.permute.xlu1 %1106  ;;  %1223 = vst.msk [vmem:[%s2365_s26 + $0x50] sm:$0xff] %vm1212_vm2, %v1190_v18  ;;  %v1048_v49 = vadd.f32 %v1016_v43, %v2253_v29 }
 0x1c6   : > { %v1191_v45 = vmul.f32 %v1107_v7, %v1031_v61  ;;  %v1137_v5 = vpop.permute.xlu0 %1136  ;;  %v1050_v7 = vadd.f32 %v1018_v35, %v2244_v21 }
 0x1c7   : > { %1386 = vadd.xlane.f32.xlu1 %v1385_v62  ;;  %v1206_v6 = vmul.f32 %v1137_v5, %v1046_v38  ;;  %1389 = vadd.xlane.f32.xlu0 %v1388_v20  ;;  %v1001_v62 = vld [vmem:[%s2352_s23 + $0x68] sm:$0xff] }
 0x1c8   : > { %1224 = vst.msk [vmem:[%s2365_s26 + $0x58] sm:$0xff] %vm1212_vm2, %v1191_v45  ;;  %v1033_v21 = vadd.f32 %v1001_v62, %v2234_v11 }
 0x1c9   : > { %v1139_v42 = vpop.permute.xlu1 %1138  ;;  %1239 = vst.msk [vmem:[%s2365_s26 + $0xd0] sm:$0xff] %vm1212_vm2, %v1206_v6 }
 0x1ca   : > { %v1207_v2 = vmul.f32 %v1139_v42, %v1047_v0  ;;  %v1101_v14 = vpop.permute.xlu0 %1100  ;;  %v1032_v0 = vadd.f32 %v1000_v41, %v2225_v31  ;;  %v1017_v42 = vld [vmem:[%s2352_s23 + $0xe8] sm:$0xff] }
 0x1cb   : > { %1434 = vadd.xlane.f32.xlu1 %v1433_v24  ;;  %v1188_v19 = vmul.f32 %v1101_v14, %v1028_v63  ;;  %1437 = vadd.xlane.f32.xlu0 %v1436_v28  ;;  %v1049_v31 = vadd.f32 %v1017_v42, %v2264_v60 }
 0x1cc   : > { %1240 = vst.msk [vmem:[%s2365_s26 + $0xd8] sm:$0xff] %vm1212_vm2, %v1207_v2 }
 0x1cd   : > { %v1103_v16 = vpop.permute.xlu1 %1102  ;;  %1221 = vst.msk [vmem:[%s2365_s26 + $0x40] sm:$0xff] %vm1212_vm2, %v1188_v19 }
 0x1ce   : > { %v1189_v15 = vmul.f32 %v1103_v16, %v1029_v30  ;;  %v1133_v9 = vpop.permute.xlu0 %1132 }
 0x1cf   : > { %v1204_v44 = vmul.f32 %v1133_v9, %v1044_v46 }
 0x1d0   : > { %1222 = vst.msk [vmem:[%s2365_s26 + $0x48] sm:$0xff] %vm1212_vm2, %v1189_v15 }
 0x1d1   : > { %v1135_v55 = vpop.permute.xlu1 %1134  ;;  %1237 = vst.msk [vmem:[%s2365_s26 + $0xc0] sm:$0xff] %vm1212_vm2, %v1204_v44 }
 0x1d2   : > { %v1205_v52 = vmul.f32 %v1135_v55, %v1045_v39  ;;  %v1298_v40 = vpop.permute.xlu0 %1297 }
 0x1d3   : > { %v1403_v17 = vsel %vm1212_vm2, %v1298_v40, 0.0 }
 0x1d4   : > { %1238 = vst.msk [vmem:[%s2365_s26 + $0xc8] sm:$0xff] %vm1212_vm2, %v1205_v52  ;;  %1404 = vadd.xlane.f32.xlu1 %v1403_v17 }
 0x1d5   : > { %v1300_v56 = vpop.permute.xlu1 %1299 }
 0x1d6   : > { %v1406_v27 = vsel %vm1212_vm2, %v1300_v56, 0.0  ;;  %v1330_v3 = vpop.permute.xlu0 %1329 }
 0x1d7   : > { %1407 = vadd.xlane.f32.xlu0 %v1406_v27  ;;  %v1451_v26 = vsel %vm1212_vm2, %v1330_v3, 0.0 }
 0x1d8   : > { %1452 = vadd.xlane.f32.xlu1 %v1451_v26 }
 0x1d9   : > { %v1332_v51 = vpop.permute.xlu1 %1331 }
 0x1da   : > { %v1454_v50 = vsel %vm1212_vm2, %v1332_v51, 0.0  ;;  %v1294_v13 = vpop.permute.xlu0 %1293 }
 0x1db   : > { %1455 = vadd.xlane.f32.xlu0 %v1454_v50  ;;  %v1397_v23 = vsel %vm1212_vm2, %v1294_v13, 0.0 }
 0x1dc   : > { %1398 = vadd.xlane.f32.xlu1 %v1397_v23 }
 0x1dd   : > { %v1296_v25 = vpop.permute.xlu1 %1295 }
 0x1de   : > { %v1400_v33 = vsel %vm1212_vm2, %v1296_v25, 0.0  ;;  %v1326_v48 = vpop.permute.xlu0 %1325 }
 0x1df   : > { %1401 = vadd.xlane.f32.xlu0 %v1400_v33  ;;  %v1445_v1 = vsel %vm1212_vm2, %v1326_v48, 0.0 }
 0x1e0   : > { %1446 = vadd.xlane.f32.xlu1 %v1445_v1 }
 0x1e1   : > { %v1328_v47 = vpop.permute.xlu1 %1327 }
 0x1e2   : > { %v1448_v59 = vsel %vm1212_vm2, %v1328_v47, 0.0  ;;  %v1113_v54 = vpop.permute.xlu0 %1112 }
 0x1e3   : > { %1449 = vadd.xlane.f32.xlu0 %v1448_v59  ;;  %v1194_v10 = vmul.f32 %v1113_v54, %v1034_v37 }
 0x1e5   : > { %v1115_v61 = vpop.permute.xlu1 %1114  ;;  %1227 = vst.msk [vmem:[%s2365_s26 + $0x70] sm:$0xff] %vm1212_vm2, %v1194_v10 }
 0x1e6   : > { %v1195_v4 = vmul.f32 %v1115_v61, %v1035_v53  ;;  %v1145_v18 = vpop.permute.xlu0 %1144 }
 0x1e7   : > { %v1210_v45 = vmul.f32 %v1145_v18, %v1050_v7 }
 0x1e8   : > { %1228 = vst.msk [vmem:[%s2365_s26 + $0x78] sm:$0xff] %vm1212_vm2, %v1195_v4 }
 0x1e9   : > { %v1147_v8 = vpop.permute.xlu1 %1146  ;;  %1243 = vst.msk [vmem:[%s2365_s26 + $0xf0] sm:$0xff] %vm1212_vm2, %v1210_v45 }
 0x1ea   : > { %v1211_v38 = vmul.f32 %v1147_v8, %v1051_v12  ;;  %v1109_v5 = vpop.permute.xlu0 %1108 }
 0x1eb   : > { %v1192_v22 = vmul.f32 %v1109_v5, %v1032_v0 }
 0x1ec   : > { %1244 = vst.msk [vmem:[%s2365_s26 + $0xf8] sm:$0xff] %vm1212_vm2, %v1211_v38 }
 0x1ed   : > { %v1111_v20 = vpop.permute.xlu1 %1110  ;;  %1225 = vst.msk [vmem:[%s2365_s26 + $0x60] sm:$0xff] %vm1212_vm2, %v1192_v22 }
 0x1ee   : > { %v1193_v6 = vmul.f32 %v1111_v20, %v1033_v21  ;;  %v1141_v2 = vpop.permute.xlu0 %1140 }
 0x1ef   : > { %v1208_v63 = vmul.f32 %v1141_v2, %v1048_v49 }
 0x1f0   : > { %1226 = vst.msk [vmem:[%s2365_s26 + $0x68] sm:$0xff] %vm1212_vm2, %v1193_v6 }
 0x1f1   : > { %v1143_v24 = vpop.permute.xlu1 %1142  ;;  %1241 = vst.msk [vmem:[%s2365_s26 + $0xe0] sm:$0xff] %vm1212_vm2, %v1208_v63 }
 0x1f2   : > { %v1209_v30 = vmul.f32 %v1143_v24, %v1049_v31  ;;  %v1306_v11 = vpop.permute.xlu0 %1305 }
 0x1f3   : > { %v1415_v28 = vsel %vm1212_vm2, %v1306_v11, 0.0 }
 0x1f4   : > { %1242 = vst.msk [vmem:[%s2365_s26 + $0xe8] sm:$0xff] %vm1212_vm2, %v1209_v30  ;;  %1416 = vadd.xlane.f32.xlu1 %v1415_v28 }
 0x1f5   : > { %v1308_v14 = vpop.permute.xlu1 %1307 }
 0x1f6   : > { %v1418_v58 = vsel %vm1212_vm2, %v1308_v14, 0.0  ;;  %v1338_v29 = vpop.permute.xlu0 %1337 }
 0x1f7   : > { %1419 = vadd.xlane.f32.xlu0 %v1418_v58  ;;  %v1463_v44 = vsel %vm1212_vm2, %v1338_v29, 0.0 }
 0x1f9   : > { %v1340_v16 = vpop.permute.xlu1 %1339 }
 0x1fa   : > { %v1302_v19 = vpop.permute.xlu0 %1301  ;;  %v1466_v52 = vsel %vm1212_vm2, %v1340_v16, 0.0 }
 0x1fb   : > { %v1409_v36 = vsel %vm1212_vm2, %v1302_v19, 0.0 }
 0x1fc   : > { %1410 = vadd.xlane.f32.xlu1 %v1409_v36 }
 0x1fd   : > { %v1304_v60 = vpop.permute.xlu1 %1303 }
 0x1fe   : > { %v1412_v15 = vsel %vm1212_vm2, %v1304_v60, 0.0  ;;  %v1334_v46 = vpop.permute.xlu0 %1333 }
 0x1ff   : > { %1413 = vadd.xlane.f32.xlu0 %v1412_v15  ;;  %v1457_v9 = vsel %vm1212_vm2, %v1334_v46, 0.0 }
 0x200   : > { %1458 = vadd.xlane.f32.xlu1 %v1457_v9 }
 0x201   : > { %v1336_v39 = vpop.permute.xlu1 %1335 }
 0x202   : > { %v1460_v55 = vsel %vm1212_vm2, %v1336_v39, 0.0 }
 0x203   : > { %1461 = vadd.xlane.f32.xlu0 %v1460_v55 }
 0x204   : > { %1464 = vadd.xlane.f32.xlu1 %v1463_v44 }
 0x207   : > { %1467 = vadd.xlane.f32.xlu0 %v1466_v52 }
 0x238   : > { %v1381_v40 = vpop.xlane.xlu0 %1380 }
 0x239   : > { %1472 = vst.msk [vmem:[%s2534_s29 + $0x10] sm:$0xff] %vm1469_vm3, %v1381_v40 }
 0x23c   : > { %v1375_v56 = vpop.xlane.xlu0 %1374 }
 0x23d   : > { %1470 = vst.msk [vmem:[%s2534_s29] sm:$0xff] %vm1469_vm3, %v1375_v56 }
 0x240   : > { %v1429_v17 = vpop.xlane.xlu1 %1428  ;;  %v1384_v27 = vpop.xlane.xlu0 %1383 }
 0x241   : > { %1488 = vst.msk [vmem:[%s2534_s29 + $0x90] sm:$0xff] %vm1469_vm3, %v1429_v17  ;;  %1473 = vst.msk [vmem:[%s2534_s29 + $0x18] sm:$0xff] %vm1469_vm3, %v1384_v27 }
 0x244   : > { %v1423_v3 = vpop.xlane.xlu1 %1422  ;;  %v1432_v51 = vpop.xlane.xlu0 %1431 }
 0x245   : > { %1486 = vst.msk [vmem:[%s2534_s29 + $0x80] sm:$0xff] %vm1469_vm3, %v1423_v3  ;;  %1489 = vst.msk [vmem:[%s2534_s29 + $0x98] sm:$0xff] %vm1469_vm3, %v1432_v51 }
 0x248   : > { %v1378_v26 = vpop.xlane.xlu1 %1377  ;;  %v1426_v50 = vpop.xlane.xlu0 %1425 }
 0x249   : > { %1471 = vst.msk [vmem:[%s2534_s29 + $0x8] sm:$0xff] %vm1469_vm3, %v1378_v26  ;;  %1487 = vst.msk [vmem:[%s2534_s29 + $0x88] sm:$0xff] %vm1469_vm3, %v1426_v50 }
 0x24c   : > { %v1393_v13 = vpop.xlane.xlu1 %1392  ;;  %v1396_v25 = vpop.xlane.xlu0 %1395 }
 0x24d   : > { %1476 = vst.msk [vmem:[%s2534_s29 + $0x30] sm:$0xff] %vm1469_vm3, %v1393_v13  ;;  %1477 = vst.msk [vmem:[%s2534_s29 + $0x38] sm:$0xff] %vm1469_vm3, %v1396_v25 }
 0x250   : > { %v1441_v23 = vpop.xlane.xlu1 %1440  ;;  %v1444_v33 = vpop.xlane.xlu0 %1443 }
 0x251   : > { %1492 = vst.msk [vmem:[%s2534_s29 + $0xb0] sm:$0xff] %vm1469_vm3, %v1441_v23  ;;  %1493 = vst.msk [vmem:[%s2534_s29 + $0xb8] sm:$0xff] %vm1469_vm3, %v1444_v33 }
 0x254   : > { %v1387_v48 = vpop.xlane.xlu1 %1386  ;;  %v1390_v32 = vpop.xlane.xlu0 %1389 }
 0x255   : > { %1474 = vst.msk [vmem:[%s2534_s29 + $0x20] sm:$0xff] %vm1469_vm3, %v1387_v48  ;;  %1475 = vst.msk [vmem:[%s2534_s29 + $0x28] sm:$0xff] %vm1469_vm3, %v1390_v32 }
 0x258   : > { %v1435_v47 = vpop.xlane.xlu1 %1434  ;;  %v1438_v1 = vpop.xlane.xlu0 %1437 }
 0x259   : > { %1490 = vst.msk [vmem:[%s2534_s29 + $0xa0] sm:$0xff] %vm1469_vm3, %v1435_v47  ;;  %1491 = vst.msk [vmem:[%s2534_s29 + $0xa8] sm:$0xff] %vm1469_vm3, %v1438_v1 }
 0x261   : > { %v1405_v57 = vpop.xlane.xlu1 %1404 }
 0x262   : > { %1480 = vst.msk [vmem:[%s2534_s29 + $0x50] sm:$0xff] %vm1469_vm3, %v1405_v57 }
 0x264   : > { %v1408_v59 = vpop.xlane.xlu0 %1407 }
 0x265   : > { %1481 = vst.msk [vmem:[%s2534_s29 + $0x58] sm:$0xff] %vm1469_vm3, %v1408_v59  ;;  %v1453_v37 = vpop.xlane.xlu1 %1452 }
 0x266   : > { %1496 = vst.msk [vmem:[%s2534_s29 + $0xd0] sm:$0xff] %vm1469_vm3, %v1453_v37 }
 0x268   : > { %v1456_v53 = vpop.xlane.xlu0 %1455 }
 0x269   : > { %1497 = vst.msk [vmem:[%s2534_s29 + $0xd8] sm:$0xff] %vm1469_vm3, %v1456_v53  ;;  %v1399_v54 = vpop.xlane.xlu1 %1398 }
 0x26a   : > { %1478 = vst.msk [vmem:[%s2534_s29 + $0x40] sm:$0xff] %vm1469_vm3, %v1399_v54 }
 0x26c   : > { %v1402_v35 = vpop.xlane.xlu0 %1401 }
 0x26d   : > { %1479 = vst.msk [vmem:[%s2534_s29 + $0x48] sm:$0xff] %vm1469_vm3, %v1402_v35  ;;  %v1447_v61 = vpop.xlane.xlu1 %1446 }
 0x26e   : > { %1494 = vst.msk [vmem:[%s2534_s29 + $0xc0] sm:$0xff] %vm1469_vm3, %v1447_v61 }
 0x270   : > { %v1450_v10 = vpop.xlane.xlu0 %1449 }
 0x271   : > { %1495 = vst.msk [vmem:[%s2534_s29 + $0xc8] sm:$0xff] %vm1469_vm3, %v1450_v10 }
 0x281   : > { %v1417_v34 = vpop.xlane.xlu1 %1416 }
 0x282   : > { %1484 = vst.msk [vmem:[%s2534_s29 + $0x70] sm:$0xff] %vm1469_vm3, %v1417_v34 }
 0x284   : > { %v1420_v4 = vpop.xlane.xlu0 %1419 }
 0x285   : > { %1485 = vst.msk [vmem:[%s2534_s29 + $0x78] sm:$0xff] %vm1469_vm3, %v1420_v4 }
 0x289   : > { %v1411_v7 = vpop.xlane.xlu1 %1410 }
 0x28a   : > { %1482 = vst.msk [vmem:[%s2534_s29 + $0x60] sm:$0xff] %vm1469_vm3, %v1411_v7 }
 0x28c   : > { %v1414_v12 = vpop.xlane.xlu0 %1413 }
 0x28d   : > { %1483 = vst.msk [vmem:[%s2534_s29 + $0x68] sm:$0xff] %vm1469_vm3, %v1414_v12  ;;  %v1459_v18 = vpop.xlane.xlu1 %1458 }
 0x28e   : > { %1498 = vst.msk [vmem:[%s2534_s29 + $0xe0] sm:$0xff] %vm1469_vm3, %v1459_v18 }
 0x290   : > { %v1462_v41 = vpop.xlane.xlu0 %1461 }
 0x291   : > { %1499 = vst.msk [vmem:[%s2534_s29 + $0xe8] sm:$0xff] %vm1469_vm3, %v1462_v41  ;;  %v1465_v8 = vpop.xlane.xlu1 %1464 }
 0x292   : > { %1500 = vst.msk [vmem:[%s2534_s29 + $0xf0] sm:$0xff] %vm1469_vm3, %v1465_v8 }
 0x294   : > { %v1468_v45 = vpop.xlane.xlu0 %1467 }
 0x295   : > { %1501 = vst.msk [vmem:[%s2534_s29 + $0xf8] sm:$0xff] %vm1469_vm3, %v1468_v45 }
 0x296 PF: > { %s17_s21 = sadd.s32 1, %s1961_s21  }
 0x297   : > { %p14_p4 = scmp.ge.s32.totalorder %s17_s21, 4  }
 0x299   :  { %16 = sbr.rel (!%p14_p4) target bundleno = 1 (0x1), region = 85 }

</bundles_post_ra>
